<compile_context>
chip_gen: v7x
topology: tpu7x:2x2x1
jax: 0.10.0
libtpu: 0.0.40
codegen_flags: <defaults>
</compile_context>

<pallas_src>
import functools

import jax
import jax.numpy as jnp
from jax.experimental import pallas as pl
from jax.experimental.pallas import tpu as pltpu

INTER = 64          # inter_channels in the PyTorch module
MARGIN = 128        # lane margin in the shift scratch (>= Wp + 1, lane aligned)


def _round_up(x, m):
    return (x + m - 1) // m * m


def _dec_blk_kernel(x_ref, mask_ref, dwi_w_ref, pwi_w_ref, pwi_b_ref,
                    dwo_w_ref, pwo_w_ref, pwo_b_ref, out_ref, buf_ref, *, wp):
    cin, L = x_ref.shape            # cin padded to a multiple of 8
    cmid = dwo_w_ref.shape[0]       # == INTER

    # ---- stage the (already zero-padded) input into the margin scratch ----
    buf_ref[0:cin, MARGIN:MARGIN + L] = x_ref[...]

    # ---- depthwise 3x3 (in): 9 lane-shifted windows, per-channel FMA ------
    acc1 = None
    for i in range(3):
        for j in range(3):
            d = (i - 1) * wp + (j - 1)
            win = buf_ref[0:cin, MARGIN + d:MARGIN + d + L]
            w_t = dwi_w_ref[:, i * 3 + j:i * 3 + j + 1]          # (cin, 1)
            term = w_t * win
            acc1 = term if acc1 is None else acc1 + term

    # ---- pointwise 1x1 (cin -> INTER) with folded BN + biases, ReLU -------
    y = jnp.dot(pwi_w_ref[...], acc1, preferred_element_type=jnp.float32)
    y = jnp.maximum(y + pwi_b_ref[...], 0.0)
    # zero the per-image border / tail lanes so they act as the next conv's
    # zero padding (also kills any garbage picked up from the scratch margins)
    y = jnp.where(mask_ref[...] > 0.5, y, 0.0)

    # ---- depthwise 3x3 (out) over the staged activation --------------------
    buf_ref[:, MARGIN:MARGIN + L] = y
    acc2 = None
    for i in range(3):
        for j in range(3):
            d = (i - 1) * wp + (j - 1)
            win = buf_ref[:, MARGIN + d:MARGIN + d + L]
            w_t = dwo_w_ref[:, i * 3 + j:i * 3 + j + 1]          # (cmid, 1)
            term = w_t * win
            acc2 = term if acc2 is None else acc2 + term

    # ---- pointwise 1x1 (INTER -> cout) + folded BN, lane-dense store -------
    z = jnp.dot(pwo_w_ref[...], acc2, preferred_element_type=jnp.float32)
    out_ref[...] = z + pwo_b_ref[...]


def _pick_batch_block(n, s_pad, cin_p, cout_p, vmem_budget_bytes=8 << 20):
    """Images per grid step: fit a conservative VMEM budget (safe on v7x's
    64 MiB) and keep >= 2 grid steps so both v7x TensorCores get work."""
    per_img = 4 * s_pad * (2 * (cin_p + cout_p)            # double-buffered IO
                           + INTER                         # scratch slab
                           + 2 * INTER + cin_p + cout_p)   # live values
    b = max(1, vmem_budget_bytes // max(per_img, 1))
    if n >= 2:
        b = min(b, n // 2)
    b = max(1, min(b, n))
    while n % b:
        b -= 1
    return b


def basic_dec_blk_lite(x_nchw, params, eps=1e-5):
    """Pallas implementation. x_nchw: (N, Cin, H, W) -> (N, Cout, H, W)."""
    N, Cin, H, W = x_nchw.shape
    Cout = params["pwo_w"].shape[0]
    Hp, Wp = H + 2, W + 2
    Sp = Hp * Wp
    S_pad = _round_up(Sp, 128)
    Cin_p = _round_up(Cin, 8)
    Cout_p = _round_up(Cout, 8)

    B = _pick_batch_block(N, S_pad, Cin_p, Cout_p)
    L = B * S_pad
    grid = (N // B,)

    # ---- activations: NCHW -> (Cin_p, N * S_pad), zero padded --------------
    x = x_nchw.astype(jnp.float32)
    x = jnp.pad(x, ((0, 0), (0, Cin_p - Cin), (1, 1), (1, 1)))
    x = x.reshape(N, Cin_p, Sp)
    x = jnp.pad(x, ((0, 0), (0, 0), (0, S_pad - Sp)))
    x_flat = jnp.transpose(x, (1, 0, 2)).reshape(Cin_p, N * S_pad)

    # interior mask for one grid block (identical layout for every block)
    s = jnp.arange(S_pad)
    hh, ww = s // Wp, s % Wp
    m = (s < Sp) & (hh >= 1) & (hh <= H) & (ww >= 1) & (ww <= W)
    mask = jnp.tile(m.astype(jnp.float32), B)[None, :]            # (1, L)

    # ---- fold BN + depthwise biases into the pointwise convs ---------------
    s1 = params["bni_g"] / jnp.sqrt(params["bni_v"] + eps)        # (INTER,)
    pwi_w = params["pwi_w"] * s1[:, None]                         # (INTER, Cin)
    pwi_w = jnp.pad(pwi_w, ((0, 0), (0, Cin_p - Cin)))
    pwi_b = (s1 * (params["pwi_w"] @ params["dwi_b"] + params["pwi_b"])
             + params["bni_b"] - params["bni_m"] * s1)[:, None]   # (INTER, 1)

    s2 = params["bno_g"] / jnp.sqrt(params["bno_v"] + eps)        # (Cout,)
    pwo_w = params["pwo_w"] * s2[:, None]                         # (Cout, INTER)
    pwo_w = jnp.pad(pwo_w, ((0, Cout_p - Cout), (0, 0)))
    pwo_b = (s2 * (params["pwo_w"] @ params["dwo_b"] + params["pwo_b"])
             + params["bno_b"] - params["bno_m"] * s2)
    pwo_b = jnp.pad(pwo_b, (0, Cout_p - Cout))[:, None]           # (Cout_p, 1)

    dwi_w = jnp.pad(params["dwi_w"].reshape(Cin, 9),
                    ((0, Cin_p - Cin), (0, 0)))                   # (Cin_p, 9)
    dwo_w = params["dwo_w"].reshape(INTER, 9)                     # (INTER, 9)

    def fixed(shape):
        return pl.BlockSpec(shape, lambda n: (0, 0))

    out_flat = pl.pallas_call(
        functools.partial(_dec_blk_kernel, wp=Wp),
        out_shape=jax.ShapeDtypeStruct((Cout_p, N * S_pad), jnp.float32),
        grid=grid,
        in_specs=[
            pl.BlockSpec((Cin_p, L), lambda n: (0, n)),   # input block
            fixed((1, L)),                                # interior mask
            fixed((Cin_p, 9)),                            # dw-in weights
            fixed((INTER, Cin_p)), fixed((INTER, 1)),     # folded pw-in
            fixed((INTER, 9)),                            # dw-out weights
            fixed((Cout_p, INTER)), fixed((Cout_p, 1)),   # folded pw-out
        ],
        out_specs=pl.BlockSpec((Cout_p, L), lambda n: (0, n)),
        scratch_shapes=[pltpu.VMEM((INTER, 2 * MARGIN + L), jnp.float32)],
        compiler_params=pltpu.CompilerParams(
            dimension_semantics=("parallel",)),
    )(x_flat, mask, dwi_w, pwi_w, pwi_b, dwo_w, pwo_w, pwo_b)

    # ---- back to NCHW, dropping channel / spatial padding -------------------
    out = out_flat.reshape(Cout_p, N, S_pad)[:Cout, :, :Sp]
    out = out.reshape(Cout, N, Hp, Wp)[:, :, 1:Hp - 1, 1:Wp - 1]
    return jnp.transpose(out, (1, 0, 2, 3))


def ref_forward(x_nchw, params, eps=1e-5):
    """Plain-JAX reference mirroring the PyTorch forward (BN in eval mode)."""
    x = jnp.transpose(x_nchw, (0, 2, 3, 1)).astype(jnp.float32)

    def dwconv(x, w, b):                       # w: (C, 3, 3)
        k = jnp.transpose(w, (1, 2, 0))[:, :, None, :]   # HWIO, I=1
        y = jax.lax.conv_general_dilated(
            x, k, (1, 1), "SAME", feature_group_count=x.shape[-1],
            dimension_numbers=("NHWC", "HWIO", "NHWC"))
        return y + b

    def pwconv(x, w, b):                       # w: (Cout, Cin)
        return jnp.einsum("nhwc,oc->nhwo", x, w) + b

    def bn(x, g, bta, m, v):
        return (x - m) / jnp.sqrt(v + eps) * g + bta

    x = dwconv(x, params["dwi_w"], params["dwi_b"])
    x = pwconv(x, params["pwi_w"], params["pwi_b"])
    x = bn(x, params["bni_g"], params["bni_b"], params["bni_m"], params["bni_v"])
    x = jnp.maximum(x, 0.0)
    x = dwconv(x, params["dwo_w"], params["dwo_b"])
    x = pwconv(x, params["pwo_w"], params["pwo_b"])
    x = bn(x, params["bno_g"], params["bno_b"], params["bno_m"], params["bno_v"])
    return jnp.transpose(x, (0, 3, 1, 2))


if __name__ == "__main__":
    N, Cin, H, W, Cout = 2, 4, 16, 16, 8

    key = jax.random.PRNGKey(0)
    keys = jax.random.split(key, 17)

    def u(k, shape, lo=-0.3, hi=0.3):
        return jax.random.uniform(k, shape, jnp.float32, lo, hi)

    params = dict(
        dwi_w=u(keys[0], (Cin, 3, 3)),   dwi_b=u(keys[1], (Cin,)),
        pwi_w=u(keys[2], (INTER, Cin)),  pwi_b=u(keys[3], (INTER,)),
        bni_g=u(keys[4], (INTER,), 0.8, 1.2), bni_b=u(keys[5], (INTER,)),
        bni_m=u(keys[6], (INTER,)),      bni_v=u(keys[7], (INTER,), 0.5, 1.5),
        dwo_w=u(keys[8], (INTER, 3, 3)), dwo_b=u(keys[9], (INTER,)),
        pwo_w=u(keys[10], (Cout, INTER)), pwo_b=u(keys[11], (Cout,)),
        bno_g=u(keys[12], (Cout,), 0.8, 1.2), bno_b=u(keys[13], (Cout,)),
        bno_m=u(keys[14], (Cout,)),      bno_v=u(keys[15], (Cout,), 0.5, 1.5),
    )

    x = jax.random.normal(keys[16], (N, Cin, H, W), jnp.float32)

    out = jax.block_until_ready(basic_dec_blk_lite(x, params))
    ref = ref_forward(x, params)

    assert out.shape == (N, Cout, H, W), out.shape
    assert jnp.allclose(out, ref, atol=1e-3, rtol=1e-3), \
        float(jnp.max(jnp.abs(out - ref)))
    print("KERNEL_OK")
</pallas_src>

<mosaic_0001>
module attributes {stable_mosaic.version = 11 : i64} {
  func.func @_dec_blk_kernel(%arg0: i32, %arg1: memref<8x384xf32, #tpu.memory_space<vmem>>, %arg2: memref<1x384xf32, #tpu.memory_space<vmem>>, %arg3: memref<8x9xf32, #tpu.memory_space<vmem>>, %arg4: memref<64x8xf32, #tpu.memory_space<vmem>>, %arg5: memref<64x1xf32, #tpu.memory_space<vmem>>, %arg6: memref<64x9xf32, #tpu.memory_space<vmem>>, %arg7: memref<8x64xf32, #tpu.memory_space<vmem>>, %arg8: memref<8x1xf32, #tpu.memory_space<vmem>>, %arg9: memref<8x384xf32, #tpu.memory_space<vmem>>, %arg10: memref<64x640xf32, #tpu.memory_space<vmem>>) attributes {dimension_semantics = [#tpu.dimension_semantics<parallel>], iteration_bounds = array<i64: 2>, scalar_prefetch = 0 : i64, scratch_operands = 1 : i64, tpu.core_type = #tpu.core_type<tc>, window_params = [{transform_indices = @transform_0, window_bounds = array<i64: 8, 384>}, {pipeline_mode = #tpu.pipeline_mode<synchronous>, transform_indices = @transform_1, window_bounds = array<i64: 1, 384>}, {pipeline_mode = #tpu.pipeline_mode<synchronous>, transform_indices = @transform_2, window_bounds = array<i64: 8, 9>}, {pipeline_mode = #tpu.pipeline_mode<synchronous>, transform_indices = @transform_3, window_bounds = array<i64: 64, 8>}, {pipeline_mode = #tpu.pipeline_mode<synchronous>, transform_indices = @transform_4, window_bounds = array<i64: 64, 1>}, {pipeline_mode = #tpu.pipeline_mode<synchronous>, transform_indices = @transform_5, window_bounds = array<i64: 64, 9>}, {pipeline_mode = #tpu.pipeline_mode<synchronous>, transform_indices = @transform_6, window_bounds = array<i64: 8, 64>}, {pipeline_mode = #tpu.pipeline_mode<synchronous>, transform_indices = @transform_7, window_bounds = array<i64: 8, 1>}, {transform_indices = @transform_8, window_bounds = array<i64: 8, 384>}]} {
    %c0 = arith.constant 0 : index
    %c0_0 = arith.constant 0 : index
    %0 = vector.load %arg1[%c0, %c0_0] : memref<8x384xf32, #tpu.memory_space<vmem>>, vector<8x384xf32>
    %c0_1 = arith.constant 0 : index
    %c128 = arith.constant 128 : index
    %1 = vector.load %arg10[%c0_1, %c128] : memref<64x640xf32, #tpu.memory_space<vmem>>, vector<8x384xf32>
    tpu.vector_store %arg10[%c0_1, %c128], %0 {strides = array<i32>} : memref<64x640xf32, #tpu.memory_space<vmem>>, vector<8x384xf32>,
    %c0_2 = arith.constant 0 : index
    %c109 = arith.constant 109 : index
    %2 = vector.load %arg10[%c0_2, %c109] : memref<64x640xf32, #tpu.memory_space<vmem>>, vector<8x384xf32>
    %c0_3 = arith.constant 0 : index
    %c0_4 = arith.constant 0 : index
    %3 = vector.load %arg3[%c0_3, %c0_4] : memref<8x9xf32, #tpu.memory_space<vmem>>, vector<8x1xf32>
    %4 = vector.broadcast %3 : vector<8x1xf32> to vector<8x384xf32>
    %5 = arith.mulf %4, %2 : vector<8x384xf32>
    %c0_5 = arith.constant 0 : index
    %c110 = arith.constant 110 : index
    %6 = vector.load %arg10[%c0_5, %c110] : memref<64x640xf32, #tpu.memory_space<vmem>>, vector<8x384xf32>
    %c0_6 = arith.constant 0 : index
    %c1 = arith.constant 1 : index
    %7 = vector.load %arg3[%c0_6, %c1] : memref<8x9xf32, #tpu.memory_space<vmem>>, vector<8x1xf32>
    %8 = vector.broadcast %7 : vector<8x1xf32> to vector<8x384xf32>
    %9 = arith.mulf %8, %6 : vector<8x384xf32>
    %10 = arith.addf %5, %9 : vector<8x384xf32>
    %c0_7 = arith.constant 0 : index
    %c111 = arith.constant 111 : index
    %11 = vector.load %arg10[%c0_7, %c111] : memref<64x640xf32, #tpu.memory_space<vmem>>, vector<8x384xf32>
    %c0_8 = arith.constant 0 : index
    %c2 = arith.constant 2 : index
    %12 = vector.load %arg3[%c0_8, %c2] : memref<8x9xf32, #tpu.memory_space<vmem>>, vector<8x1xf32>
    %13 = vector.broadcast %12 : vector<8x1xf32> to vector<8x384xf32>
    %14 = arith.mulf %13, %11 : vector<8x384xf32>
    %15 = arith.addf %10, %14 : vector<8x384xf32>
    %c0_9 = arith.constant 0 : index
    %c127 = arith.constant 127 : index
    %16 = vector.load %arg10[%c0_9, %c127] : memref<64x640xf32, #tpu.memory_space<vmem>>, vector<8x384xf32>
    %c0_10 = arith.constant 0 : index
    %c3 = arith.constant 3 : index
    %17 = vector.load %arg3[%c0_10, %c3] : memref<8x9xf32, #tpu.memory_space<vmem>>, vector<8x1xf32>
    %18 = vector.broadcast %17 : vector<8x1xf32> to vector<8x384xf32>
    %19 = arith.mulf %18, %16 : vector<8x384xf32>
    %20 = arith.addf %15, %19 : vector<8x384xf32>
    %c0_11 = arith.constant 0 : index
    %c128_12 = arith.constant 128 : index
    %21 = vector.load %arg10[%c0_11, %c128_12] : memref<64x640xf32, #tpu.memory_space<vmem>>, vector<8x384xf32>
    %c0_13 = arith.constant 0 : index
    %c4 = arith.constant 4 : index
    %22 = vector.load %arg3[%c0_13, %c4] : memref<8x9xf32, #tpu.memory_space<vmem>>, vector<8x1xf32>
    %23 = vector.broadcast %22 : vector<8x1xf32> to vector<8x384xf32>
    %24 = arith.mulf %23, %21 : vector<8x384xf32>
    %25 = arith.addf %20, %24 : vector<8x384xf32>
    %c0_14 = arith.constant 0 : index
    %c129 = arith.constant 129 : index
    %26 = vector.load %arg10[%c0_14, %c129] : memref<64x640xf32, #tpu.memory_space<vmem>>, vector<8x384xf32>
    %c0_15 = arith.constant 0 : index
    %c5 = arith.constant 5 : index
    %27 = vector.load %arg3[%c0_15, %c5] : memref<8x9xf32, #tpu.memory_space<vmem>>, vector<8x1xf32>
    %28 = vector.broadcast %27 : vector<8x1xf32> to vector<8x384xf32>
    %29 = arith.mulf %28, %26 : vector<8x384xf32>
    %30 = arith.addf %25, %29 : vector<8x384xf32>
    %c0_16 = arith.constant 0 : index
    %c145 = arith.constant 145 : index
    %31 = vector.load %arg10[%c0_16, %c145] : memref<64x640xf32, #tpu.memory_space<vmem>>, vector<8x384xf32>
    %c0_17 = arith.constant 0 : index
    %c6 = arith.constant 6 : index
    %32 = vector.load %arg3[%c0_17, %c6] : memref<8x9xf32, #tpu.memory_space<vmem>>, vector<8x1xf32>
    %33 = vector.broadcast %32 : vector<8x1xf32> to vector<8x384xf32>
    %34 = arith.mulf %33, %31 : vector<8x384xf32>
    %35 = arith.addf %30, %34 : vector<8x384xf32>
    %c0_18 = arith.constant 0 : index
    %c146 = arith.constant 146 : index
    %36 = vector.load %arg10[%c0_18, %c146] : memref<64x640xf32, #tpu.memory_space<vmem>>, vector<8x384xf32>
    %c0_19 = arith.constant 0 : index
    %c7 = arith.constant 7 : index
    %37 = vector.load %arg3[%c0_19, %c7] : memref<8x9xf32, #tpu.memory_space<vmem>>, vector<8x1xf32>
    %38 = vector.broadcast %37 : vector<8x1xf32> to vector<8x384xf32>
    %39 = arith.mulf %38, %36 : vector<8x384xf32>
    %40 = arith.addf %35, %39 : vector<8x384xf32>
    %c0_20 = arith.constant 0 : index
    %c147 = arith.constant 147 : index
    %41 = vector.load %arg10[%c0_20, %c147] : memref<64x640xf32, #tpu.memory_space<vmem>>, vector<8x384xf32>
    %c0_21 = arith.constant 0 : index
    %c8 = arith.constant 8 : index
    %42 = vector.load %arg3[%c0_21, %c8] : memref<8x9xf32, #tpu.memory_space<vmem>>, vector<8x1xf32>
    %43 = vector.broadcast %42 : vector<8x1xf32> to vector<8x384xf32>
    %44 = arith.mulf %43, %41 : vector<8x384xf32>
    %45 = arith.addf %40, %44 : vector<8x384xf32>
    %c0_22 = arith.constant 0 : index
    %c0_23 = arith.constant 0 : index
    %46 = vector.load %arg4[%c0_22, %c0_23] : memref<64x8xf32, #tpu.memory_space<vmem>>, vector<64x8xf32>
    %cst = arith.constant dense<0.000000e+00> : vector<64x384xf32>
    %47 = tpu.matmul %46, %45, %cst {dimension_numbers = #tpu.dot_dimension_numbers<[1], [0], [0], [1], [0, 0, 1, 1], [], []>} : vector<64x8xf32>, vector<8x384xf32>, vector<64x384xf32> -> vector<64x384xf32>
    %c0_24 = arith.constant 0 : index
    %c0_25 = arith.constant 0 : index
    %48 = vector.load %arg5[%c0_24, %c0_25] : memref<64x1xf32, #tpu.memory_space<vmem>>, vector<64x1xf32>
    %49 = vector.broadcast %48 : vector<64x1xf32> to vector<64x384xf32>
    %50 = arith.addf %47, %49 : vector<64x384xf32>
    %cst_26 = arith.constant 0.000000e+00 : f32
    %51 = vector.broadcast %cst_26 : f32 to vector<64x384xf32>
    %52 = arith.maximumf %50, %51 : vector<64x384xf32>
    %c0_27 = arith.constant 0 : index
    %c0_28 = arith.constant 0 : index
    %53 = vector.load %arg2[%c0_27, %c0_28] : memref<1x384xf32, #tpu.memory_space<vmem>>, vector<1x384xf32>
    %cst_29 = arith.constant 5.000000e-01 : f32
    %54 = vector.broadcast %cst_29 : f32 to vector<1x384xf32>
    %55 = arith.cmpf ogt, %53, %54 : vector<1x384xf32>
    %cst_30 = arith.constant 0.000000e+00 : f32
    %56 = vector.shape_cast %55 : vector<1x384xi1> to vector<1x384xi1>
    %57 = vector.broadcast %56 : vector<1x384xi1> to vector<64x384xi1>
    %58 = vector.broadcast %cst_30 : f32 to vector<64x384xf32>
    %59 = arith.select %57, %52, %58 : vector<64x384xi1>, vector<64x384xf32>
    %c0_31 = arith.constant 0 : index
    %c128_32 = arith.constant 128 : index
    %60 = vector.load %arg10[%c0_31, %c128_32] : memref<64x640xf32, #tpu.memory_space<vmem>>, vector<64x384xf32>
    tpu.vector_store %arg10[%c0_31, %c128_32], %59 {strides = array<i32>} : memref<64x640xf32, #tpu.memory_space<vmem>>, vector<64x384xf32>,
    %c0_33 = arith.constant 0 : index
    %c109_34 = arith.constant 109 : index
    %61 = vector.load %arg10[%c0_33, %c109_34] : memref<64x640xf32, #tpu.memory_space<vmem>>, vector<64x384xf32>
    %c0_35 = arith.constant 0 : index
    %c0_36 = arith.constant 0 : index
    %62 = vector.load %arg6[%c0_35, %c0_36] : memref<64x9xf32, #tpu.memory_space<vmem>>, vector<64x1xf32>
    %63 = vector.broadcast %62 : vector<64x1xf32> to vector<64x384xf32>
    %64 = arith.mulf %63, %61 : vector<64x384xf32>
    %c0_37 = arith.constant 0 : index
    %c110_38 = arith.constant 110 : index
    %65 = vector.load %arg10[%c0_37, %c110_38] : memref<64x640xf32, #tpu.memory_space<vmem>>, vector<64x384xf32>
    %c0_39 = arith.constant 0 : index
    %c1_40 = arith.constant 1 : index
    %66 = vector.load %arg6[%c0_39, %c1_40] : memref<64x9xf32, #tpu.memory_space<vmem>>, vector<64x1xf32>
    %67 = vector.broadcast %66 : vector<64x1xf32> to vector<64x384xf32>
    %68 = arith.mulf %67, %65 : vector<64x384xf32>
    %69 = arith.addf %64, %68 : vector<64x384xf32>
    %c0_41 = arith.constant 0 : index
    %c111_42 = arith.constant 111 : index
    %70 = vector.load %arg10[%c0_41, %c111_42] : memref<64x640xf32, #tpu.memory_space<vmem>>, vector<64x384xf32>
    %c0_43 = arith.constant 0 : index
    %c2_44 = arith.constant 2 : index
    %71 = vector.load %arg6[%c0_43, %c2_44] : memref<64x9xf32, #tpu.memory_space<vmem>>, vector<64x1xf32>
    %72 = vector.broadcast %71 : vector<64x1xf32> to vector<64x384xf32>
    %73 = arith.mulf %72, %70 : vector<64x384xf32>
    %74 = arith.addf %69, %73 : vector<64x384xf32>
    %c0_45 = arith.constant 0 : index
    %c127_46 = arith.constant 127 : index
    %75 = vector.load %arg10[%c0_45, %c127_46] : memref<64x640xf32, #tpu.memory_space<vmem>>, vector<64x384xf32>
    %c0_47 = arith.constant 0 : index
    %c3_48 = arith.constant 3 : index
    %76 = vector.load %arg6[%c0_47, %c3_48] : memref<64x9xf32, #tpu.memory_space<vmem>>, vector<64x1xf32>
    %77 = vector.broadcast %76 : vector<64x1xf32> to vector<64x384xf32>
    %78 = arith.mulf %77, %75 : vector<64x384xf32>
    %79 = arith.addf %74, %78 : vector<64x384xf32>
    %c0_49 = arith.constant 0 : index
    %c128_50 = arith.constant 128 : index
    %80 = vector.load %arg10[%c0_49, %c128_50] : memref<64x640xf32, #tpu.memory_space<vmem>>, vector<64x384xf32>
    %c0_51 = arith.constant 0 : index
    %c4_52 = arith.constant 4 : index
    %81 = vector.load %arg6[%c0_51, %c4_52] : memref<64x9xf32, #tpu.memory_space<vmem>>, vector<64x1xf32>
    %82 = vector.broadcast %81 : vector<64x1xf32> to vector<64x384xf32>
    %83 = arith.mulf %82, %80 : vector<64x384xf32>
    %84 = arith.addf %79, %83 : vector<64x384xf32>
    %c0_53 = arith.constant 0 : index
    %c129_54 = arith.constant 129 : index
    %85 = vector.load %arg10[%c0_53, %c129_54] : memref<64x640xf32, #tpu.memory_space<vmem>>, vector<64x384xf32>
    %c0_55 = arith.constant 0 : index
    %c5_56 = arith.constant 5 : index
    %86 = vector.load %arg6[%c0_55, %c5_56] : memref<64x9xf32, #tpu.memory_space<vmem>>, vector<64x1xf32>
    %87 = vector.broadcast %86 : vector<64x1xf32> to vector<64x384xf32>
    %88 = arith.mulf %87, %85 : vector<64x384xf32>
    %89 = arith.addf %84, %88 : vector<64x384xf32>
    %c0_57 = arith.constant 0 : index
    %c145_58 = arith.constant 145 : index
    %90 = vector.load %arg10[%c0_57, %c145_58] : memref<64x640xf32, #tpu.memory_space<vmem>>, vector<64x384xf32>
    %c0_59 = arith.constant 0 : index
    %c6_60 = arith.constant 6 : index
    %91 = vector.load %arg6[%c0_59, %c6_60] : memref<64x9xf32, #tpu.memory_space<vmem>>, vector<64x1xf32>
    %92 = vector.broadcast %91 : vector<64x1xf32> to vector<64x384xf32>
    %93 = arith.mulf %92, %90 : vector<64x384xf32>
    %94 = arith.addf %89, %93 : vector<64x384xf32>
    %c0_61 = arith.constant 0 : index
    %c146_62 = arith.constant 146 : index
    %95 = vector.load %arg10[%c0_61, %c146_62] : memref<64x640xf32, #tpu.memory_space<vmem>>, vector<64x384xf32>
    %c0_63 = arith.constant 0 : index
    %c7_64 = arith.constant 7 : index
    %96 = vector.load %arg6[%c0_63, %c7_64] : memref<64x9xf32, #tpu.memory_space<vmem>>, vector<64x1xf32>
    %97 = vector.broadcast %96 : vector<64x1xf32> to vector<64x384xf32>
    %98 = arith.mulf %97, %95 : vector<64x384xf32>
    %99 = arith.addf %94, %98 : vector<64x384xf32>
    %c0_65 = arith.constant 0 : index
    %c147_66 = arith.constant 147 : index
    %100 = vector.load %arg10[%c0_65, %c147_66] : memref<64x640xf32, #tpu.memory_space<vmem>>, vector<64x384xf32>
    %c0_67 = arith.constant 0 : index
    %c8_68 = arith.constant 8 : index
    %101 = vector.load %arg6[%c0_67, %c8_68] : memref<64x9xf32, #tpu.memory_space<vmem>>, vector<64x1xf32>
    %102 = vector.broadcast %101 : vector<64x1xf32> to vector<64x384xf32>
    %103 = arith.mulf %102, %100 : vector<64x384xf32>
    %104 = arith.addf %99, %103 : vector<64x384xf32>
    %c0_69 = arith.constant 0 : index
    %c0_70 = arith.constant 0 : index
    %105 = vector.load %arg7[%c0_69, %c0_70] : memref<8x64xf32, #tpu.memory_space<vmem>>, vector<8x64xf32>
    %cst_71 = arith.constant dense<0.000000e+00> : vector<8x384xf32>
    %106 = tpu.matmul %105, %104, %cst_71 {dimension_numbers = #tpu.dot_dimension_numbers<[1], [0], [0], [1], [0, 0, 1, 1], [], []>} : vector<8x64xf32>, vector<64x384xf32>, vector<8x384xf32> -> vector<8x384xf32>
    %c0_72 = arith.constant 0 : index
    %c0_73 = arith.constant 0 : index
    %107 = vector.load %arg8[%c0_72, %c0_73] : memref<8x1xf32, #tpu.memory_space<vmem>>, vector<8x1xf32>
    %108 = vector.broadcast %107 : vector<8x1xf32> to vector<8x384xf32>
    %109 = arith.addf %106, %108 : vector<8x384xf32>
    %c0_74 = arith.constant 0 : index
    %c0_75 = arith.constant 0 : index
    %110 = vector.load %arg9[%c0_74, %c0_75] : memref<8x384xf32, #tpu.memory_space<vmem>>, vector<8x384xf32>
    tpu.vector_store %arg9[%c0_74, %c0_75], %109 {strides = array<i32>} : memref<8x384xf32, #tpu.memory_space<vmem>>, vector<8x384xf32>,
    return
  }
  func.func @transform_0(%arg0: i32) -> (i32, i32) {
    %c0_i32 = arith.constant 0 : i32
    %c0_i32_0 = arith.constant 0 : i32
    return %c0_i32, %arg0 : i32, i32
  }
  func.func @transform_1(%arg0: i32) -> (i32, i32) {
    %c0_i32 = arith.constant 0 : i32
    %c0_i32_0 = arith.constant 0 : i32
    %c0_i32_1 = arith.constant 0 : i32
    return %c0_i32, %c0_i32_0 : i32, i32
  }
  func.func @transform_2(%arg0: i32) -> (i32, i32) {
    %c0_i32 = arith.constant 0 : i32
    %c0_i32_0 = arith.constant 0 : i32
    %c0_i32_1 = arith.constant 0 : i32
    return %c0_i32, %c0_i32_0 : i32, i32
  }
  func.func @transform_3(%arg0: i32) -> (i32, i32) {
    %c0_i32 = arith.constant 0 : i32
    %c0_i32_0 = arith.constant 0 : i32
    %c0_i32_1 = arith.constant 0 : i32
    return %c0_i32, %c0_i32_0 : i32, i32
  }
  func.func @transform_4(%arg0: i32) -> (i32, i32) {
    %c0_i32 = arith.constant 0 : i32
    %c0_i32_0 = arith.constant 0 : i32
    %c0_i32_1 = arith.constant 0 : i32
    return %c0_i32, %c0_i32_0 : i32, i32
  }
  func.func @transform_5(%arg0: i32) -> (i32, i32) {
    %c0_i32 = arith.constant 0 : i32
    %c0_i32_0 = arith.constant 0 : i32
    %c0_i32_1 = arith.constant 0 : i32
    return %c0_i32, %c0_i32_0 : i32, i32
  }
  func.func @transform_6(%arg0: i32) -> (i32, i32) {
    %c0_i32 = arith.constant 0 : i32
    %c0_i32_0 = arith.constant 0 : i32
    %c0_i32_1 = arith.constant 0 : i32
    return %c0_i32, %c0_i32_0 : i32, i32
  }
  func.func @transform_7(%arg0: i32) -> (i32, i32) {
    %c0_i32 = arith.constant 0 : i32
    %c0_i32_0 = arith.constant 0 : i32
    %c0_i32_1 = arith.constant 0 : i32
    return %c0_i32, %c0_i32_0 : i32, i32
  }
  func.func @transform_8(%arg0: i32) -> (i32, i32) {
    %c0_i32 = arith.constant 0 : i32
    %c0_i32_0 = arith.constant 0 : i32
    return %c0_i32, %arg0 : i32, i32
  }
}

</mosaic_0001>

<bundles_post_ra>
// kernel: tpu_custom_call.1
= control target key start
LH: loop header
LB: loop body
LE: loop exit
PB: predicated region body
PF: predicated region fallthrough
CT: control target
= control target key end

     0   :  { %13 = vsyncpa [#allocation4], 0  ;;  %s6792_s0 = inlined_call_operand.vmem [shape: f32[8,768], index: 0, kind: input, shape index: {}]   ;;  %s6793_s1 = inlined_call_operand.vmem [shape: f32[1,384], index: 1, kind: input, shape index: {}]   ;;  %s6794_s2 = inlined_call_operand.vmem [shape: f32[8,9], index: 2, kind: input, shape index: {}]   ;;  %s6795_s3 = inlined_call_operand.vmem [shape: f32[64,8], index: 3, kind: input, shape index: {}]   ;;  %s6796_s4 = inlined_call_operand.vmem [shape: f32[64,1], index: 4, kind: input, shape index: {}]   ;;  %s6797_s5 = inlined_call_operand.vmem [shape: f32[64,9], index: 5, kind: input, shape index: {}]   ;;  %s6798_s6 = inlined_call_operand.vmem [shape: f32[8,64], index: 6, kind: input, shape index: {}]   ;;  %s6799_s7 = inlined_call_operand.vmem [shape: f32[8,1], index: 7, kind: input, shape index: {}]   ;;  %s6800_s8 = inlined_call_operand.hbm [shape: f32[8,768], index: 8, kind: output, shape index: {}]  }
   0x1   :  { %15 = vsyncpa [#allocation4 + $0x1], 0  ;;  %s3899_s27 = smov 0   ;;  %s3901_s28 = smov 0  }
   0x2   :  { %s3903_s29 = smov 0   ;;  %s3905_s30 = smov 0  }
   0x3 LB: > { %s3920_s9 = sadd.s32 4294967295, %s3830_s30   ;;  %s3451_s10 = sadd.s32 4294967294, %s3830_s30   ;;  %s3830_s30 = sphi %s3905_s30, %s7486_s30   ;;  %s3826_s29 = sphi %s3903_s29, %s7485_s29   ;;  %s3822_s28 = sphi %s3901_s28, %s7484_s28   ;;  %s3818_s27 = sphi %s3899_s27, %s7483_s27  }
   0x4   : > { %s3924_s11 = sadd.s32 1, %s3830_s30   ;;  %s201_s12 = sadd.s32 1, %s3826_s29 }
   0x5   : > { %s198_s13 = ssub.s32 %s3830_s30, %s3924_s11  ;;  %p211_p0 = scmp.ne.s32.totalorder %s3826_s29, %s3822_s28 }
   0x6   : > { %p199_p1 = scmp.eq.s32.totalorder %s198_s13, 0  ;;  %p212_p2 = scmp.eq.s32.totalorder %s3920_s9, 1 }
   0x7   : > { %p217_p3 = scmp.ne.s32.totalorder %s3822_s28, %s3818_s27  ;;  %p218_p4 = scmp.eq.s32.totalorder %s3451_s10, 1 }
   0x8   : > { %s3935_s14 = scalar_select %p199_p1, %s3826_s29, %s201_s12  }
   0x9   : > { %p3937_p5 = por %p212_p2, %p211_p0  ;;  %p3941_p6 = por %p218_p4, %p217_p3 }
   0xa   : > { %p3454_p7 = scmp.ge.s32.totalorder %s3830_s30, 1  ;;  %p266_p8 = scmp.lt.s32.totalorder %s3830_s30, 3 }
   0xc   : > { %p267_p9 = pnand %p3454_p7, %p266_p8 }
   0xe   : > { %270 = sbr.rel (%p267_p9) target bundleno = 2044 (0x7fc), region = 52 }
  0x15   : > { %v317_v0 = vld [vmem:[%s6794_s2] sm:$0xff]  ;;  %v6801_v1 = vmov 0   ;;  %v3833_v2 = vmov 2   ;;  %v6813_v3 = vmov 3   ;;  %v6809_v4 = vmov 5   ;;  %v591_v6 = vld [vmem:[%s6796_s4 + $0x8] sm:$0xff] }
  0x16   : > { %3620 = vset.pattern.permute.xlu0 %v6801_v1  ;;  %3621 = vset.pattern.permute.xlu1 %v3833_v2  ;;  %v6811_v5 = vmov 4   ;;  %v592_v7 = vld [vmem:[%s6796_s4 + $0x10] sm:$0xff]  ;;  %v6807_v8 = vmov 6   ;;  %v594_v9 = vld [vmem:[%s6796_s4 + $0x20] sm:$0xff]  ;;  %v6805_v10 = vmov 7   ;;  %v6803_v12 = vmov 8  }
  0x17   : > { %320 = vperm.xlu0 %3620, %v317_v0   ;;  %360 = vperm.xlu1 %3621, %v317_v0   ;;  %v596_v11 = vld [vmem:[%s6796_s4 + $0x30] sm:$0xff]  ;;  %v3974_v13 = vld [vmem:[%s6797_s5] sm:$0xff]  ;;  %v3840_v14 = vmov 1   ;;  %v3985_v16 = vld [vmem:[%s6797_s5 + $0x8] sm:$0xff]  ;;  %s300_s26 = smul.u32 3, %s3920_s9  ;;  %s3841_s18 = smov 127  }
  0x18   : > { %v3980_v15 = vld [vmem:[%s6797_s5 + $0x10] sm:$0xff]  ;;  %v3992_v17 = vld [vmem:[%s6797_s5 + $0x20] sm:$0xff]  ;;  %v4007_v19 = vld [vmem:[%s6797_s5 + $0x18] sm:$0xff]  ;;  %s3842_s19 = smov 126   ;;  %s3843_s20 = smov 110   ;;  %vm347_vm0 = vcmask 1039360  }
  0x19   : > { %v3998_v18 = vld [vmem:[%s6797_s5 + $0x30] sm:$0xff]  ;;  %p301_p10 = scmp.lt.s32.totalorder %s300_s26, 5  ;;  %v4030_v31 = vld [vmem:[#allocation2] sm:$0xff]  ;;  %s6855_s21 = smov 109   ;;  %vm379_vm1 = vcmask 1031168   ;;  %vm411_vm2 = vcmask 900096  }
  0x1a   : > { %s3845_s22 = smov 108   ;;  %s3846_s23 = smov 92   ;;  %vm439_vm3 = vcmask 891904   ;;  %vm474_vm4 = vcmask 883712   ;;  %vm506_vm5 = vcmask 752640   ;;  %vm538_vm6 = vcmask 744448  }
  0x1b   : > { %3622 = vset.pattern.permute.xlu0 %v6813_v3  ;;  %3624 = vset.pattern.permute.xlu1 %v6809_v4  ;;  %s7488_s26 = smov (!%p301_p10, %s300_s26), 5  ;;  %s3847_s24 = smov 91   ;;  %vm570_vm7 = vcmask 736256   ;;  %vm650_vm8 = vcmask 154624   ;;  %vm657_vm9 = vcmask 64512   ;;  %vm3852_vm14 = vmmov 0  }
  0x1c   : > { %392 = vperm.xlu0 %3622, %v317_v0   ;;  %455 = vperm.xlu1 %3624, %v317_v0   ;;  %s3455_s10 = sshll.u32 %s7488_s26, 3  ;;  %s3848_s25 = smov 90   ;;  %vm3229_vm15 = vcmask 523264  }
  0x1d   : > { %s304_s17 = scalar_lea.vmem %s6792_s0, %s3455_s10 }
  0x1e   : > { %v4032_v32 = vld [vmem:[%s304_s17 + $0x10] sm:$0xff]  ;;  %v4039_v36 = vld [vmem:[%s304_s17] sm:$0xff]  ;;  %v4044_v39 = vld [vmem:[%s304_s17 + $0x8] sm:$0xff]  ;;  %s6853_s17 = smov 19  }
  0x20   : > { %3623 = vset.pattern.permute.xlu0 %v6811_v5  ;;  %3629 = vset.pattern.permute.xlu1 %v6801_v1  ;;  %v4248_v5 = vld [vmem:[#allocation2 + $0xc8] sm:$0xff] }
  0x21   : > { %424 = vperm.xlu0 %3623, %v317_v0   ;;  %605 = vperm.xlu1 %3629, %v591_v6  }
  0x25   : > { %3625 = vset.pattern.permute.xlu0 %v6807_v8  ;;  %610 = vperm.xlu1 %3629, %v592_v7  }
  0x26   : > { %487 = vperm.xlu0 %3625, %v317_v0  }
  0x29   : > { %620 = vperm.xlu1 %3629, %v594_v9   ;;  %v4112_v9 = vld [vmem:[#allocation2 + $0x28] sm:$0xff] }
  0x2a   : > { %3626 = vset.pattern.permute.xlu0 %v6805_v10 }
  0x2b   : > { %519 = vperm.xlu0 %3626, %v317_v0  }
  0x2d   : > { %630 = vperm.xlu1 %3629, %v596_v11  }
  0x2f   : > { %3627 = vset.pattern.permute.xlu0 %v6803_v12 }
  0x30   : > { %551 = vperm.xlu0 %3627, %v317_v0  }
  0x31   : > { %1032 = vperm.xlu1 %3629, %v3974_v13  }
  0x34   : > { %3628 = vset.pattern.permute.xlu0 %v3840_v14 }
  0x35   : > { %328 = vperm.xlu0 %3628, %v317_v0   ;;  %1042 = vperm.xlu1 %3629, %v3980_v15   ;;  %v4106_v0 = vld [vmem:[#allocation2 + $0x20] sm:$0xff] }
  0x39   : > { %1107 = vperm.xlu0 %3628, %v3985_v16   ;;  %1052 = vperm.xlu1 %3629, %v3992_v17  }
  0x3d   : > { %1119 = vperm.xlu0 %3628, %v3992_v17   ;;  %1062 = vperm.xlu1 %3629, %v3998_v18  }
  0x41   : > { %3630 = vset.pattern.permute.xlu1 %v3840_v14  ;;  %v4118_v14 = vld [vmem:[#allocation2 + $0x50] sm:$0xff] }
  0x42   : > { %1103 = vperm.xlu1 %3630, %v3974_v13  }
  0x46   : > { %1111 = vperm.xlu1 %3630, %v3980_v15  }
  0x4a   : > { %1115 = vperm.xlu1 %3630, %v4007_v19  }
  0x96   : > { %v4010_v20 = vpop.permute.xlu0 %320  ;;  %v361_v23 = vpop.permute.xlu1 %360 }
  0x97   : > { %v363_v35 = vmul.f32 %v361_v23, %v4030_v31  ;;  %v365_v40 = vmul.f32 %v361_v23, %v4044_v39  ;;  %v364_v43 = vmul.f32 %v361_v23, %v4039_v36  ;;  %v366_v47 = vmul.f32 %v361_v23, %v4032_v32 }
  0x9b   : > { %v393_v21 = vpop.permute.xlu0 %392  ;;  %v4017_v25 = vpop.permute.xlu1 %455 }
  0x9c   : > { %v397_v44 = vmul.f32 %v393_v21, %v4044_v39  ;;  %v458_v48 = vmul.f32 %v4017_v25, %v4039_v36  ;;  %v395_v49 = vmul.f32 %v393_v21, %v4030_v31  ;;  %v460_v51 = vmul.f32 %v4017_v25, %v4032_v32 }
  0x9d   : > { %v396_v52 = vmul.f32 %v393_v21, %v4039_v36  ;;  %v398_v55 = vmul.f32 %v393_v21, %v4032_v32  ;;  %v459_v61 = vmul.f32 %v4017_v25, %v4044_v39  ;;  %v461_v6 = vmul.f32 %v4017_v25, %v4106_v0 }
  0xa0   : > { %v4012_v22 = vpop.permute.xlu0 %424  ;;  %v4021_v27 = vpop.permute.xlu1 %605 }
  0xa1   : > { %7024 = vst [vmem:[#allocation6_spill] sm:$0xff] %v4021_v27  ;;  %v429_v46 = vmul.f32 %v4012_v22, %v4032_v32  ;;  %v427_v57 = vmul.f32 %v4012_v22, %v4039_v36  ;;  %v428_v60 = vmul.f32 %v4012_v22, %v4044_v39 }
  0xa4   : > { %v4028_v29 = vpop.permute.xlu1 %610 }
  0xa5   : > { %v4015_v24 = vpop.permute.xlu0 %487  ;;  %7025 = vst [vmem:[#allocation7_spill] sm:$0xff] %v4028_v29 }
  0xa6   : > { %v492_v54 = vmul.f32 %v4015_v24, %v4032_v32  ;;  %v490_v22 = vmul.f32 %v4015_v24, %v4039_v36 }
  0xa8   : > { %v4041_v37 = vpop.permute.xlu1 %620 }
  0xa9   : > { %7026 = vst [vmem:[#allocation8_spill] sm:$0xff] %v4041_v37 }
  0xaa   : > { %v4019_v26 = vpop.permute.xlu0 %519 }
  0xab   : > { %v524_v56 = vmul.f32 %v4019_v26, %v4032_v32 }
  0xac   : > { %v4050_v42 = vpop.permute.xlu1 %630 }
  0xaf   : > { %v4023_v28 = vpop.permute.xlu0 %551 }
  0xb0   : > { %v4058_v45 = vpop.permute.xlu1 %1032  ;;  %v556_v59 = vmul.f32 %v4023_v28, %v4032_v32 }
  0xb1   : > { %7027 = vst [vmem:[#allocation9_spill] sm:$0xff] %v4058_v45 }
  0xb4   : > { %v329_v30 = vpop.permute.xlu0 %328  ;;  %v4068_v50 = vpop.permute.xlu1 %1042 }
  0xb5   : > { %v331_v33 = vmul.f32 %v329_v30, %v4030_v31  ;;  %v334_v34 = vmul.f32 %v329_v30, %v4032_v32  ;;  %v332_v38 = vmul.f32 %v329_v30, %v4039_v36  ;;  %v333_v41 = vmul.f32 %v329_v30, %v4044_v39  ;;  %7028 = vst [vmem:[#allocation10_spill] sm:$0xff] %v4068_v50  ;;  %v4131_v30 = vld [vmem:[#allocation2 + $0x78] sm:$0xff] }
  0xb7   : > { %339 = vrot.lane.b32.xlu1 %v331_v33, %s3841_s18  ;;  %345 = vrot.lane.b32.xlu0 %v334_v34, %s3841_s18  ;;  %v491_v33 = vmul.f32 %v4015_v24, %v4044_v39 }
  0xb8   : > { %v4077_v53 = vpop.permute.xlu1 %1052  ;;  %v4110_v7 = vpop.permute.xlu0 %1107 }
  0xb9   : > { %7029 = vst [vmem:[#allocation11_spill] sm:$0xff] %v4077_v53  ;;  %7032 = vst [vmem:[#allocation14_spill] sm:$0xff] %v4110_v7  ;;  %v1138_v21 = vmul.f32 %v4110_v7, %v4112_v9  ;;  %v4257_v53 = vld [vmem:[#allocation2 + $0xf0] sm:$0xff] }
  0xbb   : > { %371 = vrot.lane.b32.xlu0 %v363_v35, %s3842_s19  ;;  %341 = vrot.lane.b32.xlu1 %v332_v38, %s3841_s18  ;;  %v493_v35 = vmul.f32 %v4015_v24, %v4106_v0  ;;  %v523_v24 = vmul.f32 %v4019_v26, %v4044_v39 }
  0xbc   : > { %v4088_v58 = vpop.permute.xlu1 %1062  ;;  %v4141_v38 = vpop.permute.xlu0 %1119 }
  0xbd   : > { %7030 = vst [vmem:[#allocation12_spill] sm:$0xff] %v4088_v58  ;;  %7035 = vst [vmem:[#allocation17_spill] sm:$0xff] %v4141_v38 }
  0xbf   : > { %375 = vrot.lane.b32.xlu0 %v365_v40, %s3842_s19  ;;  %343 = vrot.lane.b32.xlu1 %v333_v41, %s3841_s18  ;;  %v4143_v40 = vld [vmem:[#allocation2 + $0xa0] sm:$0xff] }
  0xc0   : > { %v1150_v41 = vmul.f32 %v4141_v38, %v4143_v40 }
  0xc1   : > { %v4100_v62 = vpop.permute.xlu1 %1103 }
  0xc2   : > { %7031 = vst [vmem:[#allocation13_spill] sm:$0xff] %v4100_v62  ;;  %v1134_v63 = vmul.f32 %v4100_v62, %v4030_v31 }
  0xc3   : > { %407 = vrot.lane.b32.xlu0 %v397_v44, %s3843_s20  ;;  %373 = vrot.lane.b32.xlu1 %v364_v43, %s3842_s19  ;;  %v522_v43 = vmul.f32 %v4019_v26, %v4039_v36  ;;  %v525_v44 = vmul.f32 %v4019_v26, %v4106_v0  ;;  %v4171_v26 = vld [vmem:[%s6797_s5 + $0x28] sm:$0xff] }
  0xc5   : > { %v4114_v11 = vpop.permute.xlu1 %1111 }
  0xc6   : > { %7033 = vst [vmem:[#allocation15_spill] sm:$0xff] %v4114_v11  ;;  %v1142_v23 = vmul.f32 %v4114_v11, %v4118_v14 }
  0xc7   : > { %437 = vrot.lane.b32.xlu0 %v429_v46, %s6855_s21  ;;  %377 = vrot.lane.b32.xlu1 %v366_v47, %s3842_s19  ;;  %v554_v46 = vmul.f32 %v4023_v28, %v4039_v36  ;;  %v555_v47 = vmul.f32 %v4023_v28, %v4044_v39 }
  0xc9   : > { %v4129_v25 = vpop.permute.xlu1 %1115 }
  0xca   : > { %7034 = vst [vmem:[#allocation16_spill] sm:$0xff] %v4129_v25  ;;  %v1146_v34 = vmul.f32 %v4129_v25, %v4131_v30  ;;  %v4263_v25 = vld [vmem:[#allocation2 + $0x118] sm:$0xff] }
  0xcb   : > { %466 = vrot.lane.b32.xlu0 %v458_v48, %s3845_s22  ;;  %403 = vrot.lane.b32.xlu1 %v395_v49, %s3843_s20  ;;  %v557_v48 = vmul.f32 %v4023_v28, %v4106_v0  ;;  %v4177_v49 = vld [vmem:[%s6797_s5 + $0x38] sm:$0xff] }
  0xcf   : > { %470 = vrot.lane.b32.xlu0 %v460_v51, %s3845_s22  ;;  %405 = vrot.lane.b32.xlu1 %v396_v52, %s3843_s20 }
  0xd3   : > { %502 = vrot.lane.b32.xlu0 %v492_v54, %s3846_s23  ;;  %409 = vrot.lane.b32.xlu1 %v398_v55, %s3843_s20 }
  0xd7   : > { %534 = vrot.lane.b32.xlu0 %v524_v56, %s3847_s24  ;;  %433 = vrot.lane.b32.xlu1 %v427_v57, %s6855_s21 }
  0xdb   : > { %566 = vrot.lane.b32.xlu0 %v556_v59, %s3848_s25  ;;  %435 = vrot.lane.b32.xlu1 %v428_v60, %s6855_s21  ;;  %s7104_s21 = smov 109  }
  0xdf   : > { %1127 = vperm.xlu0 %3628, %v3998_v18   ;;  %468 = vrot.lane.b32.xlu1 %v459_v61, %s3845_s22 }
  0xe3   : > { %1198 = vrot.lane.b32.xlu0 %v1134_v63, %s3841_s18  ;;  %472 = vrot.lane.b32.xlu1 %v461_v6, %s3845_s22 }
  0xe4   : > { %3631 = vset.pattern.permute.xlu0 %v3833_v2 }
  0xe7   : > { %1206 = vrot.lane.b32.xlu0 %v1138_v21, %s3841_s18  ;;  %498 = vrot.lane.b32.xlu1 %v490_v22, %s3846_s23 }
  0xeb   : > { %1214 = vrot.lane.b32.xlu0 %v1142_v23, %s3841_s18  ;;  %500 = vrot.lane.b32.xlu1 %v491_v33, %s3846_s23 }
  0xef   : > { %1222 = vrot.lane.b32.xlu0 %v1146_v34, %s3841_s18  ;;  %504 = vrot.lane.b32.xlu1 %v493_v35, %s3846_s23 }
  0xf3   : > { %1230 = vrot.lane.b32.xlu0 %v1150_v41, %s3841_s18  ;;  %530 = vrot.lane.b32.xlu1 %v522_v43, %s3847_s24 }
  0xf7   : > { %532 = vrot.lane.b32.xlu1 %v523_v24, %s3847_s24 }
  0xfb   : > { %536 = vrot.lane.b32.xlu1 %v525_v44, %s3847_s24 }
  0xff   : > { %562 = vrot.lane.b32.xlu1 %v554_v46, %s3848_s25 }
 0x103   : > { %564 = vrot.lane.b32.xlu1 %v555_v47, %s3848_s25 }
 0x107   : > { %568 = vrot.lane.b32.xlu1 %v557_v48, %s3848_s25 }
 0x10b   : > { %1123 = vperm.xlu1 %3630, %v4171_v26  }
 0x10f   : > { %1131 = vperm.xlu1 %3630, %v4177_v49  }
 0x113   : > { %3632 = vset.pattern.permute.xlu1 %v3833_v2 }
 0x114   : > { %1355 = vperm.xlu1 %3632, %v3985_v16  }
 0x118   : > { %1359 = vperm.xlu1 %3632, %v3980_v15  }
 0x11c   : > { %1367 = vperm.xlu1 %3632, %v3992_v17  }
 0x120   : > { %1375 = vperm.xlu1 %3632, %v3998_v18  }
 0x124   : > { %3633 = vset.pattern.permute.xlu1 %v6813_v3 }
 0x129   : > { %v4186_v28 = vpop.permute.xlu1 %339  ;;  %v4208_v63 = vpop.permute.xlu0 %345 }
 0x12d   : > { %v4188_v51 = vpop.permute.xlu1 %341  ;;  %v4212_v21 = vpop.permute.xlu0 %371 }
 0x131   : > { %v4190_v52 = vpop.permute.xlu1 %343  ;;  %v4218_v33 = vpop.permute.xlu0 %375 }
 0x135   : > { %v4192_v54 = vpop.permute.xlu1 %373  ;;  %v4222_v35 = vpop.permute.xlu0 %407 }
 0x139   : > { %v4194_v55 = vpop.permute.xlu1 %377  ;;  %v4226_v43 = vpop.permute.xlu0 %437 }
 0x13d   : > { %v4196_v2 = vpop.permute.xlu1 %403  ;;  %v4230_v44 = vpop.permute.xlu0 %466 }
 0x141   : > { %v4198_v56 = vpop.permute.xlu1 %405  ;;  %v4234_v47 = vpop.permute.xlu0 %470 }
 0x145   : > { %v4200_v57 = vpop.permute.xlu1 %409  ;;  %v4238_v1 = vpop.permute.xlu0 %502 }
 0x149   : > { %v4202_v59 = vpop.permute.xlu1 %433  ;;  %v4242_v10 = vpop.permute.xlu0 %534 }
 0x14d   : > { %v4204_v60 = vpop.permute.xlu1 %435  ;;  %v4246_v4 = vpop.permute.xlu0 %566 }
 0x151   : > { %v4206_v61 = vpop.permute.xlu1 %468 }
 0x155   : > { %v4210_v6 = vpop.permute.xlu1 %472 }
 0x159   : > { %v4214_v22 = vpop.permute.xlu1 %498 }
 0x15d   : > { %v4216_v23 = vpop.permute.xlu1 %500 }
 0x15e   : > { %v4254_v50 = vpop.permute.xlu0 %1127 }
 0x15f   : > { %7037 = vst [vmem:[#allocation19_spill] sm:$0xff] %v4254_v50  ;;  %v1158_v45 = vmul.f32 %v4254_v50, %v4257_v53 }
 0x161   : > { %v4220_v34 = vpop.permute.xlu1 %504 }
 0x165   : > { %v4224_v41 = vpop.permute.xlu1 %530 }
 0x169   : > { %v4228_v24 = vpop.permute.xlu1 %532 }
 0x16d   : > { %v4232_v46 = vpop.permute.xlu1 %536 }
 0x171   : > { %v4236_v48 = vpop.permute.xlu1 %562 }
 0x175   : > { %v4240_v12 = vpop.permute.xlu1 %564 }
 0x179   : > { %v4244_v8 = vpop.permute.xlu1 %568 }
 0x18a   : > { %v4250_v3 = vpop.permute.xlu1 %1123 }
 0x18b   : > { %7036 = vst [vmem:[#allocation18_spill] sm:$0xff] %v4250_v3  ;;  %v1154_v58 = vmul.f32 %v4250_v3, %v4248_v5  ;;  %v4278_v3 = vpop.permute.xlu0 %1198 }
 0x18c   : > { %7041 = vst [vmem:[#allocation21_spill] sm:$0xff] %v4278_v3 }
 0x18d   : > { %1238 = vrot.lane.b32.xlu0 %v1154_v58, %s3841_s18  ;;  %v7039_v58 = vmov 3  }
 0x18e   : > { %v4261_v38 = vpop.permute.xlu1 %1131 }
 0x18f   : > { %7038 = vst [vmem:[#allocation20_spill] sm:$0xff] %v4261_v38  ;;  %v1162_v11 = vmul.f32 %v4261_v38, %v4263_v25 }
 0x191   : > { %1246 = vrot.lane.b32.xlu0 %v1158_v45, %s3841_s18  ;;  %v7040_v45 = vmov 4  }
 0x193   : > { %v4298_v3 = vpop.permute.xlu1 %1355 }
 0x194   : > { %7050 = vst [vmem:[#allocation30_spill] sm:$0xff] %v4298_v3 }
 0x195   : > { %1254 = vrot.lane.b32.xlu0 %v1162_v11, %s3841_s18  ;;  %v4280_v11 = vpop.permute.xlu0 %1206 }
 0x196   : > { %7042 = vst [vmem:[#allocation22_spill] sm:$0xff] %v4280_v11 }
 0x199   : > { %1351 = vperm.xlu0 %3631, %v3974_v13   ;;  %v4282_v38 = vpop.permute.xlu0 %1214 }
 0x19a   : > { %7043 = vst [vmem:[#allocation23_spill] sm:$0xff] %v4282_v38 }
 0x19d   : > { %1363 = vperm.xlu0 %3631, %v4007_v19   ;;  %v4284_v7 = vpop.permute.xlu0 %1222 }
 0x19e   : > { %7044 = vst [vmem:[#allocation24_spill] sm:$0xff] %v4284_v7  ;;  %v1386_v7 = vmul.f32 %v4298_v3, %v4112_v9  ;;  %v325_v3 = vmul.f32 %v4010_v20, %v4044_v39 }
 0x1a1   : > { %1371 = vperm.xlu0 %3631, %v4171_v26   ;;  %v4286_v37 = vpop.permute.xlu0 %1230 }
 0x1a2   : > { %7045 = vst [vmem:[#allocation25_spill] sm:$0xff] %v4286_v37  ;;  %v4304_v37 = vpop.permute.xlu1 %1359 }
 0x1a3   : > { %7051 = vst [vmem:[#allocation31_spill] sm:$0xff] %v4304_v37 }
 0x1a5   : > { %1379 = vperm.xlu0 %3631, %v4177_v49  }
 0x1a9   : > { %3634 = vset.pattern.permute.xlu0 %v7039_v58 }
 0x1aa   : > { %1603 = vperm.xlu0 %3634, %v3985_v16  }
 0x1ae   : > { %1615 = vperm.xlu0 %3634, %v3992_v17  }
 0x1b2   : > { %1623 = vperm.xlu0 %3634, %v3998_v18  }
 0x1b6   : > { %3635 = vset.pattern.permute.xlu0 %v7040_v45 }
 0x1ff   : > { %v4288_v50 = vpop.permute.xlu0 %1238 }
 0x200   : > { %7046 = vst [vmem:[#allocation26_spill] sm:$0xff] %v4288_v50 }
 0x203   : > { %v4290_v58 = vpop.permute.xlu0 %1246 }
 0x204   : > { %7047 = vst [vmem:[#allocation27_spill] sm:$0xff] %v4290_v58  ;;  %v1390_v58 = vmul.f32 %v4304_v37, %v4118_v14 }
 0x207   : > { %v4292_v29 = vpop.permute.xlu0 %1254 }
 0x208   : > { %7048 = vst [vmem:[#allocation28_spill] sm:$0xff] %v4292_v29 }
 0x218   : > { %v4294_v62 = vpop.permute.xlu0 %1351 }
 0x219   : > { %7049 = vst [vmem:[#allocation29_spill] sm:$0xff] %v4294_v62  ;;  %v1382_v27 = vmul.f32 %v4294_v62, %v4030_v31  ;;  %v7059_v62 = vmov 7  }
 0x21b   : > { %1446 = vrot.lane.b32.xlu1 %v1382_v27, %s3842_s19  ;;  %v4314_v27 = vpop.permute.xlu1 %1367 }
 0x21c   : > { %v4308_v29 = vpop.permute.xlu0 %1363  ;;  %7053 = vst [vmem:[#allocation33_spill] sm:$0xff] %v4314_v27  ;;  %v1398_v38 = vmul.f32 %v4314_v27, %v4143_v40 }
 0x21d   : > { %7052 = vst [vmem:[#allocation32_spill] sm:$0xff] %v4308_v29  ;;  %v1394_v50 = vmul.f32 %v4308_v29, %v4131_v30  ;;  %v412_v29 = vsel %vm411_vm2, %v4196_v2, %v4198_v56 }
 0x21f   : > { %1454 = vrot.lane.b32.xlu1 %v1386_v7, %s3842_s19  ;;  %v4323_v37 = vpop.permute.xlu1 %1375 }
 0x220   : > { %v4318_v7 = vpop.permute.xlu0 %1371  ;;  %7055 = vst [vmem:[#allocation35_spill] sm:$0xff] %v4323_v37 }
 0x221   : > { %7054 = vst [vmem:[#allocation34_spill] sm:$0xff] %v4318_v7  ;;  %v1402_v11 = vmul.f32 %v4318_v7, %v4248_v5 }
 0x223   : > { %1462 = vrot.lane.b32.xlu1 %v1390_v58, %s3842_s19  ;;  %v1406_v58 = vmul.f32 %v4323_v37, %v4257_v53 }
 0x227   : > { %1470 = vrot.lane.b32.xlu1 %v1394_v50, %s3842_s19  ;;  %v4328_v50 = vpop.permute.xlu0 %1379 }
 0x228   : > { %7056 = vst [vmem:[#allocation36_spill] sm:$0xff] %v4328_v50  ;;  %v1410_v27 = vmul.f32 %v4328_v50, %v4263_v25 }
 0x22b   : > { %1478 = vrot.lane.b32.xlu1 %v1398_v38, %s3842_s19  ;;  %v7057_v38 = vmov 5  }
 0x22f   : > { %1486 = vrot.lane.b32.xlu1 %v1402_v11, %s3842_s19  ;;  %v323_v11 = vmul.f32 %v4010_v20, %v4030_v31 }
 0x233   : > { %1494 = vrot.lane.b32.xlu1 %v1406_v58, %s3842_s19  ;;  %v7058_v58 = vmov 6  }
 0x237   : > { %1502 = vrot.lane.b32.xlu1 %v1410_v27, %s3842_s19  ;;  %v380_v27 = vsel %vm379_vm1, %v4212_v21, %v4192_v54  ;;  %v382_v21 = vsel %vm379_vm1, %v4218_v33, %v4194_v55 }
 0x23b   : > { %1599 = vperm.xlu1 %3633, %v3974_v13  }
 0x23f   : > { %1607 = vperm.xlu1 %3633, %v3980_v15  }
 0x243   : > { %1611 = vperm.xlu1 %3633, %v4007_v19  }
 0x247   : > { %1619 = vperm.xlu1 %3633, %v4171_v26  }
 0x24b   : > { %1627 = vperm.xlu1 %3633, %v4177_v49  }
 0x24f   : > { %3636 = vset.pattern.permute.xlu1 %v7040_v45  ;;  %v348_v45 = vsel %vm347_vm0, %v4186_v28, %v4188_v51  ;;  %v350_v28 = vsel %vm347_vm0, %v4190_v52, %v4208_v63 }
 0x250   : > { %1851 = vperm.xlu1 %3636, %v3985_v16   ;;  %v355_v7 = vadd.f32 %v348_v45, %v323_v11  ;;  %v357_v45 = vadd.f32 %v350_v28, %v325_v3  ;;  %v476_v3 = vsel %vm474_vm4, %v4206_v61, %v4234_v47  ;;  %v508_v28 = vsel %vm506_vm5, %v4216_v23, %v4238_v1 }
 0x252   : > { %v387_v50 = vadd.f32 %v380_v27, %v355_v7  ;;  %v414_v7 = vsel %vm411_vm2, %v4222_v35, %v4200_v57  ;;  %v389_v11 = vadd.f32 %v382_v21, %v357_v45 }
 0x254   : > { %1855 = vperm.xlu1 %3636, %v3980_v15   ;;  %v419_v37 = vadd.f32 %v412_v29, %v387_v50  ;;  %v441_v29 = vsel %vm439_vm3, %v4204_v60, %v4226_v43  ;;  %v421_v39 = vadd.f32 %v414_v7, %v389_v11 }
 0x256   : > { %v446_v2 = vadd.f32 %v4202_v59, %v419_v37  ;;  %v448_v37 = vadd.f32 %v441_v29, %v421_v39  ;;  %v572_v29 = vsel %vm570_vm7, %v4240_v12, %v4246_v4 }
 0x258   : > { %1863 = vperm.xlu1 %3636, %v3992_v17   ;;  %v482_v50 = vadd.f32 %v4230_v44, %v446_v2  ;;  %v484_v21 = vadd.f32 %v476_v3, %v448_v37  ;;  %v540_v2 = vsel %vm538_vm6, %v4228_v24, %v4242_v10 }
 0x25a   : > { %v514_v27 = vadd.f32 %v4214_v22, %v482_v50  ;;  %v516_v7 = vadd.f32 %v508_v28, %v484_v21  ;;  %v7060_v50 = vmov 8  }
 0x25c   : > { %1871 = vperm.xlu1 %3636, %v3998_v18   ;;  %v546_v45 = vadd.f32 %v4224_v41, %v514_v27  ;;  %v548_v39 = vadd.f32 %v540_v2, %v516_v7 }
 0x25e   : > { %v578_v11 = vadd.f32 %v4236_v48, %v546_v45  ;;  %v580_v3 = vadd.f32 %v572_v29, %v548_v39 }
 0x260   : > { %3637 = vset.pattern.permute.xlu1 %v7057_v38 }
 0x261   : > { %2087 = vperm.xlu1 %3637, %v3974_v13  }
 0x265   : > { %2095 = vperm.xlu1 %3637, %v3980_v15  }
 0x269   : > { %2099 = vperm.xlu1 %3637, %v4007_v19  }
 0x26d   : > { %2107 = vperm.xlu1 %3637, %v4171_v26  }
 0x271   : > { %3639 = vset.pattern.permute.xlu1 %v7058_v58 }
 0x272   : > { %2335 = vperm.xlu1 %3639, %v3974_v13  }
 0x276   : > { %3641 = vset.pattern.permute.xlu1 %v7059_v62 }
 0x277   : > { %2583 = vperm.xlu1 %3641, %v3974_v13  }
 0x27b   : > { %2587 = vperm.xlu1 %3641, %v3985_v16  }
 0x27f   : > { %3642 = vset.pattern.permute.xlu1 %v7058_v58 }
 0x280   : > { %2347 = vperm.xlu1 %3642, %v4007_v19  }
 0x284   : > { %642 = vrot.lane.b32.xlu1 %v578_v11, %s6853_s17 }
 0x285   : > { %3643 = vset.pattern.permute.xlu1 %v7060_v50 }
 0x288   : > { %646 = vrot.lane.b32.xlu1 %v580_v3, %s6853_s17  ;;  %v4439_v3 = vpop.permute.xlu0 %1603 }
 0x28c   : > { %2835 = vperm.xlu1 %3643, %v3985_v16  }
 0x28d   : > { %v4402_v37 = vpop.permute.xlu1 %1446 }
 0x28e   : > { %7061 = vst [vmem:[#allocation37_spill] sm:$0xff] %v4402_v37 }
 0x290   : > { %3644 = vset.pattern.permute.xlu1 %v7059_v62 }
 0x291   : > { %2591 = vperm.xlu1 %3644, %v3980_v15   ;;  %v4406_v27 = vpop.permute.xlu1 %1454 }
 0x292   : > { %7062 = vst [vmem:[#allocation38_spill] sm:$0xff] %v4406_v27 }
 0x295   : > { %3645 = vset.pattern.permute.xlu1 %v7058_v58  ;;  %v4410_v28 = vpop.permute.xlu1 %1462 }
 0x296   : > { %2351 = vperm.xlu1 %3645, %v3992_v17   ;;  %7063 = vst [vmem:[#allocation39_spill] sm:$0xff] %v4410_v28 }
 0x299   : > { %v4413_v21 = vpop.permute.xlu1 %1470 }
 0x29a   : > { %2355 = vperm.xlu1 %3645, %v4171_v26   ;;  %7064 = vst [vmem:[#allocation40_spill] sm:$0xff] %v4413_v21 }
 0x29d   : > { %v4418_v45 = vpop.permute.xlu1 %1478 }
 0x29e   : > { %3646 = vset.pattern.permute.xlu1 %v7060_v50  ;;  %7065 = vst [vmem:[#allocation41_spill] sm:$0xff] %v4418_v45 }
 0x29f   : > { %2843 = vperm.xlu1 %3646, %v4007_v19  }
 0x2a1   : > { %v4423_v2 = vpop.permute.xlu1 %1486 }
 0x2a2   : > { %7066 = vst [vmem:[#allocation42_spill] sm:$0xff] %v4423_v2 }
 0x2a3   : > { %3647 = vset.pattern.permute.xlu1 %v7057_v38 }
 0x2a4   : > { %2115 = vperm.xlu1 %3647, %v4177_v49  }
 0x2a5   : > { %v4427_v7 = vpop.permute.xlu1 %1494 }
 0x2a6   : > { %7067 = vst [vmem:[#allocation43_spill] sm:$0xff] %v4427_v7  ;;  %v1634_v7 = vmul.f32 %v4439_v3, %v4112_v9  ;;  %v4458_v9 = vpop.permute.xlu0 %1615 }
 0x2a7   : > { %7069 = vst [vmem:[#allocation45_spill] sm:$0xff] %v4458_v9  ;;  %v1646_v45 = vmul.f32 %v4458_v9, %v4143_v40 }
 0x2a8   : > { %3648 = vset.pattern.permute.xlu1 %v7059_v62 }
 0x2a9   : > { %2603 = vperm.xlu1 %3648, %v4171_v26   ;;  %v4431_v11 = vpop.permute.xlu1 %1502 }
 0x2aa   : > { %7068 = vst [vmem:[#allocation44_spill] sm:$0xff] %v4431_v11  ;;  %v4467_v21 = vpop.permute.xlu0 %1623 }
 0x2ab   : > { %7071 = vst [vmem:[#allocation47_spill] sm:$0xff] %v4467_v21 }
 0x2ad   : > { %3649 = vset.pattern.permute.xlu1 %v7058_v58 }
 0x2ae   : > { %2359 = vperm.xlu1 %3649, %v3998_v18  }
 0x2b2   : > { %3651 = vset.pattern.permute.xlu1 %v7060_v50 }
 0x2b3   : > { %2847 = vperm.xlu1 %3651, %v3992_v17  }
 0x2b7   : > { %2851 = vperm.xlu1 %3651, %v4171_v26  }
 0x2ba   : > { %v4434_v29 = vpop.permute.xlu1 %1599 }
 0x2bb   : > { %v1630_v39 = vmul.f32 %v4434_v29, %v4030_v31  ;;  %3653 = vset.pattern.permute.xlu1 %v7059_v62 }
 0x2bc   : > { %2611 = vperm.xlu1 %3653, %v4177_v49  }
 0x2bd   : > { %1694 = vrot.lane.b32.xlu0 %v1630_v39, %s3843_s20 }
 0x2be   : > { %v4445_v2 = vpop.permute.xlu1 %1607 }
 0x2bf   : > { %v1638_v31 = vmul.f32 %v4445_v2, %v4118_v14 }
 0x2c0   : > { %3654 = vset.pattern.permute.xlu1 %v7060_v50 }
 0x2c1   : > { %1702 = vrot.lane.b32.xlu0 %v1634_v7, %s3843_s20  ;;  %2855 = vperm.xlu1 %3654, %v3998_v18  }
 0x2c2   : > { %v4452_v11 = vpop.permute.xlu1 %1611 }
 0x2c3   : > { %v1642_v39 = vmul.f32 %v4452_v11, %v4131_v30  ;;  %v1654_v30 = vmul.f32 %v4467_v21, %v4257_v53 }
 0x2c5   : > { %1710 = vrot.lane.b32.xlu0 %v1638_v31, %s3843_s20 }
 0x2c6   : > { %v4462_v7 = vpop.permute.xlu1 %1619 }
 0x2c7   : > { %7070 = vst [vmem:[#allocation46_spill] sm:$0xff] %v4462_v7  ;;  %v1650_v14 = vmul.f32 %v4462_v7, %v4248_v5  ;;  %v326_v5 = vmul.f32 %v4010_v20, %v4032_v32  ;;  %v7101_v7 = vld [vmem:[#allocation8_spill] sm:$0xff] }
 0x2c9   : > { %1718 = vrot.lane.b32.xlu0 %v1642_v39, %s3843_s20  ;;  %v358_v53 = vadd.f32 %v4208_v63, %v326_v5  ;;  %v324_v39 = vmul.f32 %v4010_v20, %v4039_v36  ;;  %v440_v36 = vsel %vm439_vm3, %v4202_v59, %v4204_v60  ;;  %v573_v60 = vsel %vm570_vm7, %v4246_v4, %v4244_v8 }
 0x2ca   : > { %v4472_v31 = vpop.permute.xlu1 %1627  ;;  %v6857_v4 = vmov 0.0  }
 0x2cb   : > { %7072 = vst [vmem:[#allocation48_spill] sm:$0xff] %v4472_v31  ;;  %v1658_v40 = vmul.f32 %v4472_v31, %v4263_v25  ;;  %v390_v25 = vadd.f32 %v4194_v55, %v358_v53  ;;  %v413_v55 = vsel %vm411_vm2, %v4198_v56, %v4222_v35  ;;  %v475_v56 = vsel %vm474_vm4, %v4230_v44, %v4206_v61 }
 0x2cc   : > { %v539_v61 = vsel %vm538_vm6, %v4224_v41, %v4228_v24  ;;  %v571_v44 = vsel %vm570_vm7, %v4236_v48, %v4240_v12  ;;  %746 = vmatprep.mubr.f32.mxu0 %v6857_v4  ;;  %782 = vmatprep.mubr.f32.mxu1 %v6857_v4 }
 0x2cd   : > { %1726 = vrot.lane.b32.xlu0 %v1646_v45, %s3843_s20  ;;  %v349_v45 = vsel %vm347_vm0, %v4188_v51, %v4190_v52  ;;  %v477_v51 = vsel %vm474_vm4, %v4234_v47, %v4210_v6  ;;  %v541_v6 = vsel %vm538_vm6, %v4242_v10, %v4232_v46  ;;  %v597_v47 = vld [vmem:[%s6796_s4 + $0x38] sm:$0xff] }
 0x2ce   : > { %v356_v32 = vadd.f32 %v349_v45, %v324_v39 }
 0x2cf   : > { %v4542_v8 = vpop.permute.xlu1 %1851 }
 0x2d1   : > { %1734 = vrot.lane.b32.xlu0 %v1650_v14, %s3843_s20  ;;  %v381_v14 = vsel %vm379_vm1, %v4192_v54, %v4218_v33  ;;  %v509_v54 = vsel %vm506_vm5, %v4238_v1, %v4220_v34  ;;  %v507_v1 = vsel %vm506_vm5, %v4214_v22, %v4216_v23 }
 0x2d2   : > { %v388_v52 = vadd.f32 %v381_v14, %v356_v32 }
 0x2d3   : > { %v4546_v12 = vpop.permute.xlu1 %1855 }
 0x2d5   : > { %1742 = vrot.lane.b32.xlu0 %v1654_v30, %s3843_s20 }
 0x2d7   : > { %v4549_v23 = vpop.permute.xlu1 %1863 }
 0x2d8   : > { %7073 = vst [vmem:[#allocation49_spill] sm:$0xff] %v4549_v23 }
 0x2d9   : > { %1750 = vrot.lane.b32.xlu0 %v1658_v40, %s3843_s20 }
 0x2dd   : > { %1847 = vperm.xlu0 %3635, %v3974_v13  }
 0x2e1   : > { %1859 = vperm.xlu0 %3635, %v4007_v19  }
 0x2e5   : > { %1867 = vperm.xlu0 %3635, %v4171_v26  }
 0x2e9   : > { %1875 = vperm.xlu0 %3635, %v4177_v49  }
 0x2ed   : > { %3638 = vset.pattern.permute.xlu0 %v7057_v38  ;;  %v422_v38 = vadd.f32 %v4200_v57, %v390_v25  ;;  %v420_v57 = vadd.f32 %v413_v55, %v388_v52 }
 0x2ee   : > { %2091 = vperm.xlu0 %3638, %v3985_v16  }
 0x2ef   : > { %v449_v20 = vadd.f32 %v4226_v43, %v422_v38  ;;  %v447_v33 = vadd.f32 %v440_v36, %v420_v57  ;;  %v2061_v36 = vld [vmem:[#allocation2 + $0x48] sm:$0xff] }
 0x2f1   : > { %v485_v63 = vadd.f32 %v477_v51, %v449_v20  ;;  %v483_v34 = vadd.f32 %v475_v56, %v447_v33 }
 0x2f2   : > { %2103 = vperm.xlu0 %3638, %v3992_v17  }
 0x2f3   : > { %v517_v59 = vadd.f32 %v509_v54, %v485_v63  ;;  %v515_v43 = vadd.f32 %v507_v1, %v483_v34  ;;  %v2069_v1 = vld [vmem:[#allocation2 + $0x98] sm:$0xff] }
 0x2f5   : > { %v549_v35 = vadd.f32 %v541_v6, %v517_v59  ;;  %v547_v46 = vadd.f32 %v539_v61, %v515_v43 }
 0x2f6   : > { %2111 = vperm.xlu0 %3638, %v3998_v18  }
 0x2f7   : > { %v581_v10 = vadd.f32 %v573_v60, %v549_v35  ;;  %v579_v22 = vadd.f32 %v571_v44, %v547_v46 }
 0x2fa   : > { %3640 = vset.pattern.permute.xlu0 %v7058_v58 }
 0x2fb   : > { %2339 = vperm.xlu0 %3640, %v3985_v16  }
 0x2ff   : > { %2343 = vperm.xlu0 %3640, %v3980_v15  }
 0x303   : > { %648 = vrot.lane.b32.xlu0 %v581_v10, %s6853_s17 }
 0x307   : > { %644 = vrot.lane.b32.xlu0 %v579_v22, %s6853_s17  ;;  %s3477_s17 = smul.u32 384, %s3920_s9 }
 0x30b   : > { %2363 = vperm.xlu0 %3640, %v4177_v49  }
 0x30f   : > { %3650 = vset.pattern.permute.xlu0 %v7059_v62  ;;  %v7074_v62 = vmov 0  }
 0x310   : > { %2595 = vperm.xlu0 %3650, %v4007_v19  }
 0x314   : > { %2599 = vperm.xlu0 %3650, %v3992_v17   ;;  %v590_v17 = vld [vmem:[%s6796_s4] sm:$0xff] }
 0x318   : > { %2607 = vperm.xlu0 %3650, %v3998_v18   ;;  %v4556_v18 = vpop.permute.xlu1 %1871 }
 0x319   : > { %7075 = vst [vmem:[#allocation50_spill] sm:$0xff] %v4556_v18 }
 0x31c   : > { %3652 = vset.pattern.permute.xlu0 %v7060_v50  ;;  %v4566_v24 = vpop.permute.xlu1 %2087 }
 0x31d   : > { %2831 = vperm.xlu0 %3652, %v3974_v13   ;;  %v593_v13 = vld [vmem:[%s6796_s4 + $0x18] sm:$0xff]  ;;  %v2121_v25 = vmul.f32 %v4566_v24, %v4106_v0 }
 0x320   : > { %v4573_v58 = vpop.permute.xlu1 %2095 }
 0x321   : > { %2839 = vperm.xlu0 %3652, %v3980_v15   ;;  %v595_v15 = vld [vmem:[%s6796_s4 + $0x28] sm:$0xff] }
 0x324   : > { %v4578_v30 = vpop.permute.xlu1 %2099 }
 0x325   : > { %2859 = vperm.xlu0 %3652, %v4177_v49   ;;  %v2133_v34 = vmul.f32 %v4578_v30, %v2069_v1 }
 0x328   : > { %v4584_v5 = vpop.permute.xlu1 %2107 }
 0x329   : > { %3655 = vset.pattern.permute.xlu0 %v7074_v62  ;;  %7080 = vst [vmem:[#allocation55_spill] sm:$0xff] %v4584_v5 }
 0x32a   : > { %600 = vperm.xlu0 %3655, %v590_v17  }
 0x32c   : > { %v4591_v45 = vpop.permute.xlu1 %2335 }
 0x32e   : > { %615 = vperm.xlu0 %3655, %v593_v13  }
 0x32f   : > { %v4561_v41 = vpop.permute.xlu0 %1694 }
 0x330   : > { %7076 = vst [vmem:[#allocation51_spill] sm:$0xff] %v4561_v41  ;;  %v4600_v38 = vpop.permute.xlu1 %2583  ;;  %v7098_v41 = vld [vmem:[#allocation7_spill] sm:$0xff] }
 0x331   : > { %v2617_v14 = vmul.f32 %v4600_v38, %v4106_v0 }
 0x332   : > { %625 = vperm.xlu0 %3655, %v595_v15   ;;  %v582_v15 = vld [vmem:[%s6795_s3] sm:$0xff] }
 0x333   : > { %v4571_v48 = vpop.permute.xlu0 %1702 }
 0x334   : > { %7077 = vst [vmem:[#allocation52_spill] sm:$0xff] %v4571_v48  ;;  %v4624_v63 = vpop.permute.xlu1 %2587 }
 0x335   : > { %v2621_v10 = vmul.f32 %v4624_v63, %v2061_v36 }
 0x336   : > { %635 = vperm.xlu0 %3655, %v597_v47   ;;  %v588_v47 = vld [vmem:[%s6795_s3 + $0x30] sm:$0xff] }
 0x337   : > { %v4575_v50 = vpop.permute.xlu0 %1710 }
 0x338   : > { %7078 = vst [vmem:[#allocation53_spill] sm:$0xff] %v4575_v50  ;;  %v4628_v6 = vpop.permute.xlu1 %2347  ;;  %v7095_v50 = vld [vmem:[#allocation6_spill] sm:$0xff] }
 0x339   : > { %v2381_v17 = vmul.f32 %v4628_v6, %v2069_v1 }
 0x33a   : > { %1037 = vperm.xlu0 %3655, %v3985_v16   ;;  %v2369_v16 = vmul.f32 %v4591_v45, %v4106_v0 }
 0x33b   : > { %v4581_v40 = vpop.permute.xlu0 %1718 }
 0x33c   : > { %7079 = vst [vmem:[#allocation54_spill] sm:$0xff] %v4581_v40  ;;  %v643_v61 = vpop.permute.xlu1 %642 }
 0x33e   : > { %1047 = vperm.xlu0 %3655, %v4007_v19   ;;  %v2065_v19 = vld [vmem:[#allocation2 + $0x70] sm:$0xff] }
 0x33f   : > { %v4586_v53 = vpop.permute.xlu0 %1726 }
 0x340   : > { %7081 = vst [vmem:[#allocation56_spill] sm:$0xff] %v4586_v53  ;;  %v647_v44 = vpop.permute.xlu1 %646 }
 0x342   : > { %1057 = vperm.xlu0 %3655, %v4171_v26   ;;  %v2129_v26 = vmul.f32 %v4573_v58, %v2065_v19 }
 0x343   : > { %v4596_v39 = vpop.permute.xlu0 %1734 }
 0x344   : > { %7082 = vst [vmem:[#allocation57_spill] sm:$0xff] %v4596_v39 }
 0x346   : > { %1067 = vperm.xlu0 %3655, %v4177_v49  }
 0x347   : > { %v4602_v49 = vpop.permute.xlu0 %1742 }
 0x348   : > { %7083 = vst [vmem:[#allocation58_spill] sm:$0xff] %v4602_v49 }
 0x34a   : > { %2188 = vrot.lane.b32.xlu0 %v2121_v25, %s3845_s22 }
 0x34b   : > { %v4608_v32 = vpop.permute.xlu0 %1750 }
 0x34c   : > { %7084 = vst [vmem:[#allocation59_spill] sm:$0xff] %v4608_v32 }
 0x34e   : > { %2436 = vrot.lane.b32.xlu0 %v2369_v16, %s3846_s23  ;;  %v583_v16 = vld [vmem:[%s6795_s3 + $0x8] sm:$0xff] }
 0x352   : > { %2204 = vrot.lane.b32.xlu0 %v2129_v26, %s3845_s22  ;;  %v584_v26 = vld [vmem:[%s6795_s3 + $0x10] sm:$0xff] }
 0x356   : > { %2684 = vrot.lane.b32.xlu0 %v2617_v14, %s3847_s24  ;;  %v585_v14 = vld [vmem:[%s6795_s3 + $0x18] sm:$0xff] }
 0x35c   : > { %v4610_v55 = vpop.permute.xlu0 %1847 }
 0x360   : > { %v4612_v51 = vpop.permute.xlu0 %1859 }
 0x364   : > { %v4614_v52 = vpop.permute.xlu0 %1867 }
 0x365   : > { %7085 = vst [vmem:[#allocation60_spill] sm:$0xff] %v4614_v52 }
 0x368   : > { %v4616_v20 = vpop.permute.xlu0 %1875 }
 0x36d   : > { %v4618_v54 = vpop.permute.xlu0 %2091 }
 0x36e   : > { %v2125_v57 = vmul.f32 %v4618_v54, %v2061_v36 }
 0x370   : > { %2196 = vrot.lane.b32.xlu1 %v2125_v57, %s3845_s22  ;;  %v587_v57 = vld [vmem:[%s6795_s3 + $0x28] sm:$0xff] }
 0x371   : > { %v4622_v0 = vpop.permute.xlu0 %2103 }
 0x372   : > { %7086 = vst [vmem:[#allocation61_spill] sm:$0xff] %v4622_v0 }
 0x375   : > { %v4626_v56 = vpop.permute.xlu0 %2111 }
 0x376   : > { %7087 = vst [vmem:[#allocation62_spill] sm:$0xff] %v4626_v56  ;;  %v7100_v56 = vld [vmem:[#allocation19_spill] sm:$0xff] }
 0x37a   : > { %v4630_v33 = vpop.permute.xlu0 %2339 }
 0x37b   : > { %v2373_v59 = vmul.f32 %v4630_v33, %v2061_v36  ;;  %v586_v36 = vld [vmem:[%s6795_s3 + $0x20] sm:$0xff] }
 0x37d   : > { %2444 = vrot.lane.b32.xlu1 %v2373_v59, %s3846_s23 }
 0x37e   : > { %v4634_v60 = vpop.permute.xlu0 %2343 }
 0x37f   : > { %v2377_v35 = vmul.f32 %v4634_v60, %v2065_v19  ;;  %v589_v19 = vld [vmem:[%s6795_s3 + $0x38] sm:$0xff] }
 0x381   : > { %2212 = vrot.lane.b32.xlu1 %v2133_v34, %s3845_s22  ;;  %2452 = vrot.lane.b32.xlu0 %v2377_v35, %s3846_s23 }
 0x382   : > { %v649_v43 = vpop.permute.xlu0 %648 }
 0x383   : > { %v653_v25 = vsel %vm650_vm8, %v647_v44, %v649_v43 }
 0x385   : > { %2692 = vrot.lane.b32.xlu1 %v2621_v10, %s3847_s24 }
 0x386   : > { %v645_v46 = vpop.permute.xlu0 %644 }
 0x387   : > { %v652_v22 = vsel %vm650_vm8, %v645_v46, %v647_v44  ;;  %v651_v13 = vsel %vm650_vm8, %v643_v61, %v645_v46  ;;  %v927_v44 = vlaneseq }
 0x388   : > { %682 = vmatprep.subr.mxu0 %v652_v22  ;;  %3557 = vmatprep.subr.mxu1 %v652_v22  ;;  %v924_v22 = vld [vmem:[%s6793_s1] sm:$0x7] }
 0x389   : > { %2460 = vrot.lane.b32.xlu1 %v2381_v17, %s3846_s23  ;;  %683 = vmatpush1.msra.mxu0 %v651_v13  ;;  %v928_v17 = vshrl.u32 %v927_v44, 7  ;;  %vm925_vm10 = vcmp.gt.f32.partialorder %v924_v22, 0.5 }
 0x38a   : > { %3558 = vmatpush1.msra.mxu1 %v651_v13  ;;  %3456 = vmatmul.mubr.msk.f32.vlgmr.msra.gmra.mrb[0].mxu0 %vm657_vm9, %v582_v15  ;;  %v4694_v59 = vpop.permute.xlu0 %2363 }
 0x38b   : > { %3462 = vmatmul.mubr.msk.f32.vlgmr.msra.gmra.mrb[0].mxu1 %vm657_vm9, %v588_v47  ;;  %3496 = vmatprep.subr.mxu1 %v653_v25  ;;  %7088 = vst [vmem:[#allocation63_spill] sm:$0xff] %v4694_v59 }
 0x38c   : > { %3497 = vmatpush3.msra.mxu1 %v653_v25  ;;  %752 = vmatprep.mubr.f32.mxu0 %v6857_v4  ;;  %v926_v25 = vsel %vm925_vm10, 1, %v7074_v62 }
 0x38d   : > { %788 = vmatprep.mubr.f32.mxu1 %v6857_v4 }
 0x38e   : > { %3457 = vmatmul.mubr.msk.f32.gmra.mrb[2].mxu0 %vm657_vm9, %v583_v16 }
 0x38f   : > { %3463 = vmatmul.mubr.msk.f32.gmra.mrb[2].mxu1 %vm657_vm9, %v589_v19  ;;  %758 = vmatprep.mubr.f32.mxu0 %v6857_v4  ;;  %v4696_v1 = vpop.permute.xlu0 %2595 }
 0x390   : > { %3498 = vmatprep.mubr.msk.f32.mxu1 %vm657_vm9, %v582_v15  ;;  %7089 = vst [vmem:[#allocation64_spill] sm:$0xff] %v4696_v1  ;;  %v929_v15 = vsub.s32 0, %v928_v17 }
 0x392   : > { %3458 = vmatmul.mubr.msk.f32.gmra.mrb[4].mxu0 %vm657_vm9, %v584_v26 }
 0x393   : > { %3499 = vmatmul.mubr.msk.f32.vlgmr.msra.gmra.mrb[4].mxu1 %vm657_vm9, %v583_v16  ;;  %764 = vmatprep.mubr.f32.mxu0 %v6857_v4  ;;  %v4698_v34 = vpop.permute.xlu0 %2599  ;;  %v4716_v16 = vrot.slane %v926_v25, %v929_v15 }
 0x394   : > { %3501 = vmatprep.mubr.msk.f32.mxu1 %vm657_vm9, %v584_v26  ;;  %7090 = vst [vmem:[#allocation65_spill] sm:$0xff] %v4698_v34 }
 0x395   : > { %vm939_vm11 = vcmp.eq.s32.totalorder %v4716_v16, 1 }
 0x396   : > { %3459 = vmatmul.mubr.msk.f32.gmra.mrb[6].mxu0 %vm657_vm9, %v585_v14 }
 0x397   : > { %3502 = vmatmul.mubr.msk.f32.gmra.mrb[6].mxu1 %vm657_vm9, %v585_v14  ;;  %770 = vmatprep.mubr.f32.mxu0 %v6857_v4  ;;  %v4700_v35 = vpop.permute.xlu0 %2607 }
 0x398   : > { %3504 = vmatprep.mubr.msk.f32.mxu1 %vm657_vm9, %v586_v36  ;;  %7091 = vst [vmem:[#allocation66_spill] sm:$0xff] %v4700_v35 }
 0x39a   : > { %3460 = vmatmul.mubr.msk.f32.gmra.mrb[8].mxu0 %vm657_vm9, %v586_v36  ;;  %v937_v36 = vsub.s32 2, %v928_v17 }
 0x39b   : > { %3505 = vmatmul.mubr.msk.f32.gmra.mrb[8].mxu1 %vm657_vm9, %v587_v57  ;;  %776 = vmatprep.mubr.f32.mxu0 %v6857_v4 }
 0x39c   : > { %3507 = vmatprep.mubr.msk.f32.mxu1 %vm657_vm9, %v588_v47  ;;  %v4702_v61 = vpop.permute.xlu0 %2831  ;;  %v933_v47 = vsub.s32 1, %v928_v17 }
 0x39d   : > { %7092 = vst [vmem:[#allocation67_spill] sm:$0xff] %v4702_v61 }
 0x39e   : > { %3461 = vmatmul.mubr.msk.f32.gmra.mrb[10].mxu0 %vm657_vm9, %v587_v57  ;;  %v4720_v26 = vrot.slane %v926_v25, %v933_v47 }
 0x39f   : > { %3508 = vmatmul.mubr.msk.f32.gmra.mrb[10].mxu1 %vm657_vm9, %v589_v19 }
 0x3a0   : > { %3297 = vmatprep.mubr.f32.mxu1 %v6857_v4  ;;  %v4704_v43 = vpop.permute.xlu0 %2839  ;;  %vm940_vm12 = vcmp.eq.s32.totalorder %v4720_v26, 1 }
 0x3a1   : > { %7093 = vst [vmem:[#allocation68_spill] sm:$0xff] %v4704_v43 }
 0x3a4   : > { %v4706_v10 = vpop.permute.xlu0 %2859 }
 0x3a5   : > { %7094 = vst [vmem:[#allocation69_spill] sm:$0xff] %v4706_v10 }
 0x3a9   : > { %v4708_v46 = vpop.permute.xlu0 %600 }
 0x3ad   : > { %v4713_v13 = vpop.permute.xlu0 %615 }
 0x3b1   : > { %v4718_v19 = vpop.permute.xlu0 %625 }
 0x3b5   : > { %v4728_v47 = vpop.permute.xlu0 %635 }
 0x45d   : > { %v748_v14 = vpop.f32.mrb[0].mxu0 }
 0x45e   : > { %v749_v57 = vadd.f32 %v748_v14, %v4708_v46  ;;  %v784_v4 = vpop.f32.mrb[0].mxu1  ;;  %v750_v49 = vpop.f32.mrb[1].mxu0  ;;  %v4730_v14 = vrot.slane %v926_v25, %v937_v36 }
 0x45f   : > { %v785_v44 = vadd.f32 %v784_v4, %v4050_v42  ;;  %v751_v22 = vadd.f32 %v750_v49, %v4708_v46  ;;  %v786_v32 = vpop.f32.mrb[1].mxu1 }
 0x460   : > { %v900_v62 = vmax.f32 %v749_v57, 0.0  ;;  %v787_v15 = vadd.f32 %v786_v32, %v4050_v42  ;;  %vm941_vm13 = vcmp.eq.s32.totalorder %v4730_v14, 1 }
 0x461   : > { %v918_v39 = vmax.f32 %v785_v44, 0.0  ;;  %v901_v17 = vmax.f32 %v751_v22, 0.0  ;;  %v754_v53 = vpop.f32.mrb[2].mxu0 }
 0x462   : > { %v4734_v40 = vsel %vm939_vm11, %v900_v62, 0.0  ;;  %v919_v4 = vmax.f32 %v787_v15, 0.0  ;;  %v755_v49 = vadd.f32 %v754_v53, %v7095_v50  ;;  %v790_v28 = vpop.f32.mrb[2].mxu1  ;;  %v756_v10 = vpop.f32.mrb[3].mxu0 }
 0x463   : > { %v4739_v57 = vsel %vm939_vm11, %v918_v39, 0.0  ;;  %v4743_v32 = vsel %vm940_vm12, %v901_v17, 0.0  ;;  %v791_v25 = vadd.f32 %v790_v28, %v4728_v47  ;;  %v757_v36 = vadd.f32 %v756_v10, %v7095_v50  ;;  %v792_v44 = vpop.f32.mrb[3].mxu1  ;;  %v7096_v39 = vld [vmem:[#allocation29_spill] sm:$0xff] }
 0x464   : > { %984 = vst [vmem:[#allocation2 + $0xf8] sm:$0xff] %v4739_v57  ;;  %v4750_v53 = vsel %vm940_vm12, %v919_v4, 0.0  ;;  %v903_v22 = vmax.f32 %v755_v49, 0.0  ;;  %v793_v62 = vadd.f32 %v792_v44, %v4728_v47  ;;  %v1383_v15 = vmul.f32 %v7096_v39, %v4734_v40  ;;  %v7097_v10 = vld [vmem:[#allocation13_spill] sm:$0xff] }
 0x465   : > { %985 = vst [vmem:[#allocation2 + $0x100] sm:$0xff] %v4750_v53  ;;  %v921_v17 = vmax.f32 %v791_v25, 0.0  ;;  %v904_v48 = vmax.f32 %v757_v36, 0.0  ;;  %v760_v28 = vpop.f32.mrb[4].mxu0  ;;  %v1135_v27 = vmul.f32 %v7097_v10, %v4734_v40  ;;  %v1896_v26 = vmul.f32 %v4556_v18, %v4739_v57 }
 0x466   : > { %v4761_v4 = vsel %vm939_vm11, %v903_v22, 0.0  ;;  %v922_v49 = vmax.f32 %v793_v62, 0.0  ;;  %v761_v44 = vadd.f32 %v760_v28, %v7098_v41  ;;  %v3500_v37 = vpop.f32.mrb[4].mxu1  ;;  %v762_v35 = vpop.f32.mrb[5].mxu0  ;;  %1448 = vrot.lane.b32.xlu0 %v1383_v15, %s3842_s19  ;;  %v7099_v28 = vld [vmem:[#allocation35_spill] sm:$0xff]  ;;  %v2118_v14 = vmul.f32 %v4566_v24, %v4734_v40 }
 0x467   : > { %v4767_v25 = vsel %vm939_vm11, %v921_v17, 0.0  ;;  %v4771_v36 = vsel %vm940_vm12, %v904_v48, 0.0  ;;  %v867_v59 = vadd.f32 %v3500_v37, %v7095_v50  ;;  %v763_v22 = vadd.f32 %v762_v35, %v7098_v41  ;;  %v861_v34 = vpop.f32.mrb[5].mxu1  ;;  %1200 = vrot.lane.b32.xlu1 %v1135_v27, %s3841_s18 }
 0x468   : > { %987 = vst [vmem:[#allocation2 + $0x120] sm:$0xff] %v4767_v25  ;;  %v4779_v62 = vsel %vm940_vm12, %v922_v49, 0.0  ;;  %v906_v15 = vmax.f32 %v761_v44, 0.0  ;;  %v862_v17 = vadd.f32 %v861_v34, %v4708_v46  ;;  %v1407_v48 = vmul.f32 %v7099_v28, %v4739_v57 }
 0x469   : > { %988 = vst [vmem:[#allocation2 + $0x128] sm:$0xff] %v4779_v62  ;;  %v905_v37 = vmax.f32 %v867_v59, 0.0  ;;  %v907_v50 = vmax.f32 %v763_v22, 0.0  ;;  %v766_v35 = vpop.f32.mrb[6].mxu0  ;;  %v1159_v27 = vmul.f32 %v7100_v56, %v4739_v57 }
 0x46a   : > { %v4789_v43 = vsel %vm939_vm11, %v906_v15, 0.0  ;;  %v902_v49 = vmax.f32 %v862_v17, 0.0  ;;  %v767_v44 = vadd.f32 %v766_v35, %v4713_v13  ;;  %v3503_v1 = vpop.f32.mrb[6].mxu1  ;;  %v768_v34 = vpop.f32.mrb[7].mxu0  ;;  %1496 = vrot.lane.b32.xlu0 %v1407_v48, %s3842_s19 }
 0x46b   : > { %972 = vst [vmem:[#allocation2 + $0x58] sm:$0xff] %v4789_v43  ;;  %v4796_v59 = vsel %vm941_vm13, %v905_v37, 0.0  ;;  %v4800_v46 = vsel %vm940_vm12, %v907_v50, 0.0  ;;  %v877_v22 = vadd.f32 %v3503_v1, %v4713_v13  ;;  %v769_v15 = vadd.f32 %v768_v34, %v4713_v13  ;;  %v871_v17 = vpop.f32.mrb[7].mxu1  ;;  %1248 = vrot.lane.b32.xlu1 %v1159_v27, %s3841_s18 }
 0x46c   : > { %971 = vst [vmem:[#allocation2 + $0x40] sm:$0xff] %v4796_v59  ;;  %973 = vst [vmem:[#allocation2 + $0x60] sm:$0xff] %v4800_v46  ;;  %v4809_v48 = vsel %vm941_vm13, %v902_v49, 0.0  ;;  %v909_v37 = vmax.f32 %v767_v44, 0.0  ;;  %v872_v35 = vadd.f32 %v871_v17, %v7098_v41  ;;  %v2366_v50 = vmul.f32 %v4591_v45, %v4734_v40 }
 0x46d   : > { %968 = vst [vmem:[#allocation2 + $0x18] sm:$0xff] %v4809_v48  ;;  %v911_v1 = vmax.f32 %v877_v22, 0.0  ;;  %v910_v13 = vmax.f32 %v769_v15, 0.0  ;;  %v772_v34 = vpop.f32.mrb[8].mxu0  ;;  %v1631_v27 = vmul.f32 %v4434_v29, %v4734_v40 }
 0x46e   : > { %v4819_v5 = vsel %vm939_vm11, %v909_v37, 0.0  ;;  %v908_v49 = vmax.f32 %v872_v35, 0.0  ;;  %v773_v44 = vadd.f32 %v772_v34, %v7101_v7  ;;  %v3506_v23 = vpop.f32.mrb[8].mxu1  ;;  %v774_v41 = vpop.f32.mrb[9].mxu0  ;;  %2430 = vrot.lane.b32.xlu0 %v2366_v50, %s3846_s23 }
 0x46f   : > { %975 = vst [vmem:[#allocation2 + $0x80] sm:$0xff] %v4819_v5  ;;  %v4826_v22 = vsel %vm941_vm13, %v911_v1, 0.0  ;;  %v4830_v15 = vsel %vm940_vm12, %v910_v13, 0.0  ;;  %v887_v17 = vadd.f32 %v3506_v23, %v4718_v19  ;;  %v775_v37 = vadd.f32 %v774_v41, %v7101_v7  ;;  %v881_v35 = vpop.f32.mrb[9].mxu1  ;;  %1696 = vrot.lane.b32.xlu1 %v1631_v27, %s3843_s20 }
 0x470   : > { %7102 = vst [vmem:[#allocation6_spill] sm:$0xff] %v4830_v15  ;;  %977 = vst [vmem:[#allocation2 + $0x90] sm:$0xff] %v4826_v22  ;;  %v4839_v50 = vsel %vm941_vm13, %v908_v49, 0.0  ;;  %v912_v1 = vmax.f32 %v773_v44, 0.0  ;;  %v882_v34 = vadd.f32 %v881_v35, %v7101_v7  ;;  %v2614_v13 = vmul.f32 %v4600_v38, %v4734_v40 }
 0x471   : > { %976 = vst [vmem:[#allocation2 + $0x88] sm:$0xff] %v4830_v15  ;;  %974 = vst [vmem:[#allocation2 + $0x68] sm:$0xff] %v4839_v50  ;;  %v917_v23 = vmax.f32 %v887_v17, 0.0  ;;  %v913_v41 = vmax.f32 %v775_v37, 0.0  ;;  %v778_v9 = vpop.f32.mrb[10].mxu0  ;;  %v1655_v27 = vmul.f32 %v4467_v21, %v4739_v57  ;;  %v1384_v57 = vmul.f32 %v7096_v39, %v4743_v32 }
 0x472   : > { %v4849_v0 = vsel %vm939_vm11, %v912_v1, 0.0  ;;  %v914_v49 = vmax.f32 %v882_v34, 0.0  ;;  %v779_v44 = vadd.f32 %v778_v9, %v4718_v19  ;;  %v3509_v52 = vpop.f32.mrb[10].mxu1  ;;  %v780_v7 = vpop.f32.mrb[11].mxu0  ;;  %2678 = vrot.lane.b32.xlu0 %v2614_v13, %s3847_s24 }
 0x473   : > { %978 = vst [vmem:[#allocation2 + $0xa8] sm:$0xff] %v4849_v0  ;;  %v4856_v17 = vsel %vm941_vm13, %v917_v23, 0.0  ;;  %v4860_v37 = vsel %vm940_vm12, %v913_v41, 0.0  ;;  %v897_v35 = vadd.f32 %v3509_v52, %v4728_v47  ;;  %v781_v1 = vadd.f32 %v780_v7, %v4718_v19  ;;  %v891_v34 = vpop.f32.mrb[11].mxu1  ;;  %1744 = vrot.lane.b32.xlu1 %v1655_v27, %s3843_s20 }
 0x474   : > { %983 = vst [vmem:[#allocation2 + $0xe0] sm:$0xff] %v4856_v17  ;;  %979 = vst [vmem:[#allocation2 + $0xb0] sm:$0xff] %v4860_v37  ;;  %v4869_v9 = vsel %vm941_vm13, %v914_v49, 0.0  ;;  %v915_v13 = vmax.f32 %v779_v44, 0.0  ;;  %v892_v23 = vadd.f32 %v891_v34, %v4050_v42  ;;  %v2862_v41 = vmul.f32 %v4702_v61, %v4734_v40  ;;  %v4882_v49 = vpop.permute.xlu1 %2835 }
 0x475   : > { %980 = vst [vmem:[#allocation2 + $0xb8] sm:$0xff] %v4869_v9  ;;  %v923_v52 = vmax.f32 %v897_v35, 0.0  ;;  %v916_v19 = vmax.f32 %v781_v1, 0.0  ;;  %v1878_v47 = vmul.f32 %v4610_v55, %v4734_v40  ;;  %7103 = vst [vmem:[#allocation29_spill] sm:$0xff] %v4882_v49  ;;  %v1136_v35 = vmul.f32 %v7097_v10, %v4743_v32 }
 0x476   : > { %v4879_v27 = vsel %vm939_vm11, %v915_v13, 0.0  ;;  %v920_v7 = vmax.f32 %v892_v23, 0.0  ;;  %2926 = vrot.lane.b32.xlu0 %v2862_v41, %s3848_s25  ;;  %v1160_v1 = vmul.f32 %v7100_v56, %v4750_v53  ;;  %v1632_v13 = vmul.f32 %v4434_v29, %v4743_v32 }
 0x477   : > { %981 = vst [vmem:[#allocation2 + $0xd0] sm:$0xff] %v4879_v27  ;;  %v4887_v42 = vsel %vm941_vm13, %v923_v52, 0.0  ;;  %v4891_v44 = vsel %vm940_vm12, %v916_v19, 0.0  ;;  %1926 = vrot.lane.b32.xlu1 %v1878_v47, %s7104_s21  ;;  %v1656_v41 = vmul.f32 %v4467_v21, %v4750_v53  ;;  %v1408_v52 = vmul.f32 %v7099_v28, %v4750_v53 }
 0x478   : > { %989 = vst [vmem:[#allocation2 + $0x130] sm:$0xff] %v4887_v42  ;;  %982 = vst [vmem:[#allocation2 + $0xd8] sm:$0xff] %v4891_v44  ;;  %v4898_v16 = vsel %vm941_vm13, %v920_v7, 0.0  ;;  %v4909_v34 = vpop.permute.xlu1 %2591  ;;  %v1879_v19 = vmul.f32 %v4610_v55, %v4743_v32  ;;  %v2119_v7 = vmul.f32 %v4566_v24, %v4743_v32 }
 0x479   : > { %986 = vst [vmem:[#allocation2 + $0x108] sm:$0xff] %v4898_v16 }
 0x47a   : > { %1202 = vrot.lane.b32.xlu0 %v1136_v35, %s3841_s18  ;;  %v1897_v35 = vmul.f32 %v4556_v18, %v4750_v53  ;;  %v7109_v53 = vld [vmem:[#allocation36_spill] sm:$0xff] }
 0x47b   : > { %1962 = vrot.lane.b32.xlu1 %v1896_v26, %s7104_s21  ;;  %v2367_v26 = vmul.f32 %v4591_v45, %v4743_v32 }
 0x47c   : > { %v4920_v23 = vpop.permute.xlu1 %2351 }
 0x47d   : > { %7105 = vst [vmem:[#allocation13_spill] sm:$0xff] %v4920_v23 }
 0x47e   : > { %1250 = vrot.lane.b32.xlu0 %v1160_v1, %s3841_s18 }
 0x47f   : > { %2182 = vrot.lane.b32.xlu1 %v2118_v14, %s3845_s22  ;;  %v7108_v14 = vld [vmem:[#allocation30_spill] sm:$0xff] }
 0x480   : > { %v4931_v47 = vpop.permute.xlu1 %2355 }
 0x481   : > { %7106 = vst [vmem:[#allocation7_spill] sm:$0xff] %v4931_v47 }
 0x482   : > { %1698 = vrot.lane.b32.xlu0 %v1632_v13, %s3843_s20  ;;  %v1387_v13 = vmul.f32 %v7108_v14, %v4761_v4 }
 0x483   : > { %1450 = vrot.lane.b32.xlu1 %v1384_v57, %s3842_s19  ;;  %v2615_v57 = vmul.f32 %v4600_v38, %v4743_v32 }
 0x484   : > { %v4942_v1 = vpop.permute.xlu1 %2843 }
 0x485   : > { %7107 = vst [vmem:[#allocation35_spill] sm:$0xff] %v4942_v1 }
 0x486   : > { %1746 = vrot.lane.b32.xlu0 %v1656_v41, %s3843_s20  ;;  %v1411_v41 = vmul.f32 %v7109_v53, %v4767_v25 }
 0x487   : > { %1498 = vrot.lane.b32.xlu1 %v1408_v52, %s3842_s19 }
 0x488   : > { %v4953_v52 = vpop.permute.xlu1 %2115 }
 0x489   : > { %7110 = vst [vmem:[#allocation8_spill] sm:$0xff] %v4953_v52  ;;  %v7113_v52 = vld [vmem:[#allocation20_spill] sm:$0xff] }
 0x48a   : > { %1928 = vrot.lane.b32.xlu0 %v1879_v19, %s7104_s21  ;;  %v2863_v19 = vmul.f32 %v4702_v61, %v4743_v32 }
 0x48b   : > { %2184 = vrot.lane.b32.xlu1 %v2119_v7, %s3845_s22  ;;  %v1881_v7 = vmul.f32 %v4542_v8, %v4761_v4 }
 0x48e   : > { %1964 = vrot.lane.b32.xlu0 %v1897_v35, %s7104_s21  ;;  %v7111_v35 = vld [vmem:[#allocation14_spill] sm:$0xff] }
 0x48f   : > { %2432 = vrot.lane.b32.xlu1 %v2367_v26, %s3846_s23  ;;  %v1139_v26 = vmul.f32 %v7111_v35, %v4761_v4 }
 0x492   : > { %1456 = vrot.lane.b32.xlu0 %v1387_v13, %s3842_s19  ;;  %v4964_v13 = vpop.permute.xlu1 %2603 }
 0x493   : > { %2680 = vrot.lane.b32.xlu1 %v2615_v57, %s3847_s24  ;;  %7112 = vst [vmem:[#allocation30_spill] sm:$0xff] %v4964_v13  ;;  %v1899_v57 = vmul.f32 %v4616_v20, %v4767_v25  ;;  %v1636_v13 = vmul.f32 %v4439_v3, %v4771_v36 }
 0x496   : > { %1504 = vrot.lane.b32.xlu0 %v1411_v41, %s3842_s19  ;;  %v1163_v41 = vmul.f32 %v7113_v52, %v4767_v25  ;;  %v4975_v1 = vpop.permute.xlu1 %2359 }
 0x497   : > { %2928 = vrot.lane.b32.xlu1 %v2863_v19, %s3848_s25  ;;  %v1140_v19 = vmul.f32 %v7111_v35, %v4771_v36  ;;  %7114 = vst [vmem:[#allocation36_spill] sm:$0xff] %v4975_v1  ;;  %v4989_v1 = vpop.permute.xlu0 %1037 }
 0x49a   : > { %1932 = vrot.lane.b32.xlu0 %v1881_v7, %s7104_s21  ;;  %v1635_v7 = vmul.f32 %v4439_v3, %v4761_v4 }
 0x49b   : > { %1208 = vrot.lane.b32.xlu1 %v1139_v26, %s3841_s18  ;;  %v1164_v26 = vmul.f32 %v7113_v52, %v4779_v62 }
 0x49e   : > { %1968 = vrot.lane.b32.xlu0 %v1899_v57, %s7104_s21  ;;  %v1659_v57 = vmul.f32 %v4472_v31, %v4767_v25  ;;  %v1660_v25 = vmul.f32 %v4472_v31, %v4779_v62 }
 0x49f   : > { %1256 = vrot.lane.b32.xlu1 %v1163_v41, %s3841_s18  ;;  %v4986_v41 = vpop.permute.xlu1 %2847 }
 0x4a0   : > { %7115 = vst [vmem:[#allocation14_spill] sm:$0xff] %v4986_v41  ;;  %v2123_v41 = vmul.f32 %v4618_v54, %v4771_v36 }
 0x4a2   : > { %1210 = vrot.lane.b32.xlu0 %v1140_v19, %s3841_s18  ;;  %v2122_v19 = vmul.f32 %v4618_v54, %v4761_v4 }
 0x4a3   : > { %1704 = vrot.lane.b32.xlu1 %v1635_v7, %s3843_s20  ;;  %v4999_v7 = vpop.permute.xlu1 %2851 }
 0x4a4   : > { %7116 = vst [vmem:[#allocation70_spill] sm:$0xff] %v4999_v7 }
 0x4a6   : > { %1258 = vrot.lane.b32.xlu0 %v1164_v26, %s3841_s18  ;;  %v2370_v26 = vmul.f32 %v4630_v33, %v4761_v4 }
 0x4a7   : > { %1752 = vrot.lane.b32.xlu1 %v1659_v57, %s3843_s20  ;;  %v5003_v57 = vpop.permute.xlu0 %1047 }
 0x4a8   : > { %7117 = vst [vmem:[#allocation71_spill] sm:$0xff] %v5003_v57  ;;  %v2371_v57 = vmul.f32 %v4630_v33, %v4771_v36 }
 0x4aa   : > { %1706 = vrot.lane.b32.xlu0 %v1636_v13, %s3843_s20  ;;  %v2618_v13 = vmul.f32 %v4624_v63, %v4761_v4 }
 0x4ab   : > { %2190 = vrot.lane.b32.xlu1 %v2122_v19, %s3845_s22  ;;  %v5012_v19 = vpop.permute.xlu1 %2611  ;;  %v5015_v7 = vpop.permute.xlu0 %1057 }
 0x4ac   : > { %7118 = vst [vmem:[#allocation72_spill] sm:$0xff] %v5012_v19  ;;  %7119 = vst [vmem:[#allocation73_spill] sm:$0xff] %v5015_v7  ;;  %v2867_v7 = vmul.f32 %v4882_v49, %v4771_v36 }
 0x4ae   : > { %1754 = vrot.lane.b32.xlu0 %v1660_v25, %s3843_s20  ;;  %v2866_v25 = vmul.f32 %v4882_v49, %v4761_v4 }
 0x4af   : > { %2438 = vrot.lane.b32.xlu1 %v2370_v26, %s3846_s23  ;;  %v2619_v26 = vmul.f32 %v4624_v63, %v4771_v36  ;;  %v5029_v19 = vpop.permute.xlu0 %1067 }
 0x4b0   : > { %7121 = vst [vmem:[#allocation75_spill] sm:$0xff] %v5029_v19  ;;  %v1389_v19 = vmul.f32 %v7108_v14, %v4796_v59 }
 0x4b2   : > { %2192 = vrot.lane.b32.xlu0 %v2123_v41, %s3845_s22  ;;  %v5025_v41 = vpop.permute.xlu1 %2855 }
 0x4b3   : > { %2686 = vrot.lane.b32.xlu1 %v2618_v13, %s3847_s24  ;;  %7120 = vst [vmem:[#allocation74_spill] sm:$0xff] %v5025_v41  ;;  %v1388_v13 = vmul.f32 %v7108_v14, %v4771_v36  ;;  %v5041_v41 = vpop.permute.xlu0 %2188  ;;  %v1883_v14 = vmul.f32 %v4542_v8, %v4796_v59 }
 0x4b4   : > { %7123 = vst [vmem:[#allocation77_spill] sm:$0xff] %v5041_v41 }
 0x4b6   : > { %2440 = vrot.lane.b32.xlu0 %v2371_v57, %s3846_s23  ;;  %v1412_v57 = vmul.f32 %v7109_v53, %v4779_v62 }
 0x4b7   : > { %2934 = vrot.lane.b32.xlu1 %v2866_v25, %s3848_s25  ;;  %v5038_v25 = vpop.permute.xlu1 %2196 }
 0x4b8   : > { %7122 = vst [vmem:[#allocation76_spill] sm:$0xff] %v5038_v25  ;;  %v5055_v25 = vpop.permute.xlu0 %2436 }
 0x4ba   : > { %2688 = vrot.lane.b32.xlu0 %v2619_v26, %s3847_s24  ;;  %v1882_v26 = vmul.f32 %v4542_v8, %v4771_v36 }
 0x4bb   : > { %1458 = vrot.lane.b32.xlu1 %v1388_v13, %s3842_s19  ;;  %v5048_v13 = vpop.permute.xlu1 %2444 }
 0x4bc   : > { %7124 = vst [vmem:[#allocation78_spill] sm:$0xff] %v5048_v13  ;;  %v5067_v13 = vpop.permute.xlu0 %2204 }
 0x4bd   : > { %7128 = vst [vmem:[#allocation80_spill] sm:$0xff] %v5067_v13 }
 0x4be   : > { %2936 = vrot.lane.b32.xlu0 %v2867_v7, %s3848_s25  ;;  %v7125_v7 = vld [vmem:[#allocation31_spill] sm:$0xff] }
 0x4bf   : > { %1506 = vrot.lane.b32.xlu1 %v1412_v57, %s3842_s19  ;;  %v1391_v18 = vmul.f32 %v7125_v7, %v4789_v43  ;;  %v1900_v57 = vmul.f32 %v4616_v20, %v4779_v62  ;;  %7126 = vst [vmem:[#allocation31_spill] sm:$0xff] %v5055_v25  ;;  %v2126_v62 = vmul.f32 %v4573_v58, %v4789_v43 }
 0x4c0   : > { %v2124_v25 = vmul.f32 %v4618_v54, %v4796_v59  ;;  %v2120_v54 = vmul.f32 %v4566_v24, %v4809_v48 }
 0x4c2   : > { %1460 = vrot.lane.b32.xlu0 %v1389_v19, %s3842_s19  ;;  %v5061_v19 = vpop.permute.xlu1 %2212 }
 0x4c3   : > { %1934 = vrot.lane.b32.xlu1 %v1882_v26, %s7104_s21  ;;  %7127 = vst [vmem:[#allocation79_spill] sm:$0xff] %v5061_v19  ;;  %v1141_v26 = vmul.f32 %v7111_v35, %v4796_v59  ;;  %v5077_v19 = vpop.permute.xlu0 %2684  ;;  %v2374_v35 = vmul.f32 %v4634_v60, %v4789_v43 }
 0x4c4   : > { %7131 = vst [vmem:[#allocation81_spill] sm:$0xff] %v5077_v19 }
 0x4c6   : > { %1464 = vrot.lane.b32.xlu0 %v1391_v18, %s3842_s19  ;;  %v7129_v18 = vld [vmem:[#allocation15_spill] sm:$0xff]  ;;  %v5074_v8 = vpop.permute.xlu1 %2692 }
 0x4c7   : > { %1970 = vrot.lane.b32.xlu1 %v1900_v57, %s7104_s21  ;;  %v1143_v57 = vmul.f32 %v7129_v18, %v4789_v43  ;;  %7130 = vst [vmem:[#allocation15_spill] sm:$0xff] %v5074_v8 }
 0x4ca   : > { %1936 = vrot.lane.b32.xlu0 %v1883_v14, %s7104_s21  ;;  %v1637_v14 = vmul.f32 %v4439_v3, %v4796_v59  ;;  %v5089_v8 = vpop.permute.xlu1 %2460  ;;  %v1385_v3 = vmul.f32 %v7096_v39, %v4809_v48 }
 0x4cb   : > { %1212 = vrot.lane.b32.xlu1 %v1141_v26, %s3841_s18  ;;  %v5085_v26 = vpop.permute.xlu0 %2452  ;;  %7133 = vst [vmem:[#allocation83_spill] sm:$0xff] %v5089_v8 }
 0x4cc   : > { %7132 = vst [vmem:[#allocation82_spill] sm:$0xff] %v5085_v26  ;;  %v1880_v26 = vmul.f32 %v4610_v55, %v4809_v48  ;;  %v1889_v55 = vmul.f32 %v4612_v51, %v4826_v22 }
 0x4ce   : > { %2198 = vrot.lane.b32.xlu0 %v2126_v62, %s3845_s22  ;;  %v1144_v62 = vmul.f32 %v7129_v18, %v4800_v46 }
 0x4cf   : > { %1216 = vrot.lane.b32.xlu1 %v1143_v57, %s3841_s18  ;;  %v1639_v57 = vmul.f32 %v4445_v2, %v4789_v43 }
 0x4d2   : > { %2446 = vrot.lane.b32.xlu0 %v2374_v35, %s3846_s23 }
 0x4d3   : > { %1708 = vrot.lane.b32.xlu1 %v1637_v14, %s3843_s20  ;;  %v1884_v14 = vmul.f32 %v4546_v12, %v4789_v43 }
 0x4d6   : > { %1218 = vrot.lane.b32.xlu0 %v1144_v62, %s3841_s18  ;;  %v1640_v62 = vmul.f32 %v4445_v2, %v4800_v46 }
 0x4d7   : > { %1712 = vrot.lane.b32.xlu1 %v1639_v57, %s3843_s20 }
 0x4d8   : > { %v5095_v19 = vpop.permute.xlu0 %1448 }
 0x4d9   : > { %v5099_v35 = vpop.permute.xlu1 %1200 }
 0x4da   : > { %1452 = vrot.lane.b32.xlu0 %v1385_v3, %s3842_s19  ;;  %v1885_v3 = vmul.f32 %v4546_v12, %v4800_v46 }
 0x4db   : > { %1938 = vrot.lane.b32.xlu1 %v1884_v14, %s7104_s21 }
 0x4dc   : > { %v5105_v8 = vpop.permute.xlu0 %1496 }
 0x4dd   : > { %7134 = vst [vmem:[#allocation84_spill] sm:$0xff] %v5105_v8  ;;  %v5109_v57 = vpop.permute.xlu1 %1248  ;;  %v2372_v8 = vmul.f32 %v4630_v33, %v4796_v59  ;;  %v2368_v33 = vmul.f32 %v4591_v45, %v4809_v48 }
 0x4de   : > { %7135 = vst [vmem:[#allocation85_spill] sm:$0xff] %v5109_v57  ;;  %1714 = vrot.lane.b32.xlu0 %v1640_v62, %s3843_s20  ;;  %v2620_v62 = vmul.f32 %v4624_v63, %v4796_v59  ;;  %v2616_v63 = vmul.f32 %v4600_v38, %v4809_v48 }
 0x4df   : > { %2194 = vrot.lane.b32.xlu1 %v2124_v25, %s3845_s22 }
 0x4e0   : > { %v5115_v39 = vpop.permute.xlu0 %2430 }
 0x4e1   : > { %7136 = vst [vmem:[#allocation86_spill] sm:$0xff] %v5115_v39  ;;  %v5119_v14 = vpop.permute.xlu1 %1696 }
 0x4e2   : > { %1940 = vrot.lane.b32.xlu0 %v1885_v3, %s7104_s21  ;;  %v2868_v3 = vmul.f32 %v4882_v49, %v4796_v59  ;;  %v2864_v59 = vmul.f32 %v4702_v61, %v4809_v48 }
 0x4e3   : > { %2442 = vrot.lane.b32.xlu1 %v2372_v8, %s3846_s23 }
 0x4e4   : > { %v5125_v57 = vpop.permute.xlu0 %2678 }
 0x4e5   : > { %7137 = vst [vmem:[#allocation87_spill] sm:$0xff] %v5125_v57  ;;  %v5129_v25 = vpop.permute.xlu1 %1744  ;;  %v1886_v57 = vmul.f32 %v4546_v12, %v4839_v50  ;;  %v7170_v12 = vld [vmem:[#allocation45_spill] sm:$0xff] }
 0x4e6   : > { %7138 = vst [vmem:[#allocation88_spill] sm:$0xff] %v5129_v25  ;;  %2186 = vrot.lane.b32.xlu0 %v2120_v54, %s3845_s22 }
 0x4e7   : > { %2690 = vrot.lane.b32.xlu1 %v2620_v62, %s3847_s24  ;;  %v1137_v62 = vmul.f32 %v7097_v10, %v4809_v48  ;;  %v7143_v10 = vld [vmem:[#allocation32_spill] sm:$0xff] }
 0x4e8   : > { %v5135_v41 = vpop.permute.xlu0 %2926 }
 0x4e9   : > { %7139 = vst [vmem:[#allocation89_spill] sm:$0xff] %v5135_v41  ;;  %v5139_v8 = vpop.permute.xlu1 %1926  ;;  %v1641_v41 = vmul.f32 %v4445_v2, %v4839_v50 }
 0x4ea   : > { %2434 = vrot.lane.b32.xlu0 %v2368_v33, %s3846_s23 }
 0x4eb   : > { %2938 = vrot.lane.b32.xlu1 %v2868_v3, %s3848_s25  ;;  %v1392_v3 = vmul.f32 %v7125_v7, %v4800_v46 }
 0x4ec   : > { %v5145_v24 = vpop.permute.xlu0 %1202 }
 0x4ed   : > { %v5149_v54 = vpop.permute.xlu1 %1962 }
 0x4ee   : > { %7140 = vst [vmem:[#allocation90_spill] sm:$0xff] %v5149_v54  ;;  %2682 = vrot.lane.b32.xlu0 %v2616_v63, %s3847_s24  ;;  %v1395_v63 = vmul.f32 %v7143_v10, %v4819_v5  ;;  %v1633_v54 = vmul.f32 %v4434_v29, %v4809_v48  ;;  %v1887_v29 = vmul.f32 %v4612_v51, %v4819_v5 }
 0x4ef   : > { %1204 = vrot.lane.b32.xlu1 %v1137_v62, %s3841_s18 }
 0x4f0   : > { %v5155_v45 = vpop.permute.xlu0 %1250 }
 0x4f1   : > { %7141 = vst [vmem:[#allocation91_spill] sm:$0xff] %v5155_v45  ;;  %v5159_v33 = vpop.permute.xlu1 %2182 }
 0x4f2   : > { %7142 = vst [vmem:[#allocation92_spill] sm:$0xff] %v5159_v33  ;;  %2930 = vrot.lane.b32.xlu0 %v2864_v59, %s3848_s25  ;;  %v1397_v59 = vmul.f32 %v7143_v10, %v4826_v22 }
 0x4f3   : > { %1466 = vrot.lane.b32.xlu1 %v1392_v3, %s3842_s19 }
 0x4f4   : > { %v5165_v38 = vpop.permute.xlu0 %1698 }
 0x4f5   : > { %v5169_v62 = vpop.permute.xlu1 %1450 }
 0x4f6   : > { %1472 = vrot.lane.b32.xlu0 %v1395_v63, %s3842_s19  ;;  %v2127_v63 = vmul.f32 %v4573_v58, %v4800_v46 }
 0x4f7   : > { %1700 = vrot.lane.b32.xlu1 %v1633_v54, %s3843_s20 }
 0x4f8   : > { %v5175_v25 = vpop.permute.xlu0 %1746 }
 0x4f9   : > { %7144 = vst [vmem:[#allocation32_spill] sm:$0xff] %v5175_v25  ;;  %v5179_v3 = vpop.permute.xlu1 %1498 }
 0x4fa   : > { %7145 = vst [vmem:[#allocation93_spill] sm:$0xff] %v5179_v3  ;;  %1476 = vrot.lane.b32.xlu0 %v1397_v59, %s3842_s19 }
 0x4fb   : > { %1930 = vrot.lane.b32.xlu1 %v1880_v26, %s7104_s21  ;;  %v2375_v26 = vmul.f32 %v4634_v60, %v4800_v46  ;;  %v1393_v46 = vmul.f32 %v7125_v7, %v4839_v50 }
 0x4fc   : > { %v5185_v13 = vpop.permute.xlu0 %1928 }
 0x4fd   : > { %v5189_v54 = vpop.permute.xlu1 %2184 }
 0x4fe   : > { %7146 = vst [vmem:[#allocation94_spill] sm:$0xff] %v5189_v54  ;;  %1944 = vrot.lane.b32.xlu0 %v1887_v29, %s7104_s21  ;;  %v7150_v29 = vld [vmem:[#allocation16_spill] sm:$0xff]  ;;  %v7180_v54 = vld [vmem:[#allocation46_spill] sm:$0xff] }
 0x4ff   : > { %2200 = vrot.lane.b32.xlu1 %v2127_v63, %s3845_s22  ;;  %v1148_v3 = vmul.f32 %v7150_v29, %v4830_v15 }
 0x500   : > { %v5195_v25 = vpop.permute.xlu0 %1964 }
 0x501   : > { %7147 = vst [vmem:[#allocation95_spill] sm:$0xff] %v5195_v25  ;;  %v5199_v48 = vpop.permute.xlu1 %2432  ;;  %v1147_v25 = vmul.f32 %v7150_v29, %v4819_v5 }
 0x502   : > { %7148 = vst [vmem:[#allocation96_spill] sm:$0xff] %v5199_v48  ;;  %1948 = vrot.lane.b32.xlu0 %v1889_v55, %s7104_s21  ;;  %v1647_v48 = vmul.f32 %v7170_v12, %v4849_v0 }
 0x503   : > { %2448 = vrot.lane.b32.xlu1 %v2375_v26, %s3846_s23  ;;  %v1149_v26 = vmul.f32 %v7150_v29, %v4826_v22  ;;  %v2128_v29 = vmul.f32 %v4573_v58, %v4839_v50 }
 0x504   : > { %v5205_v59 = vpop.permute.xlu0 %1456 }
 0x505   : > { %7149 = vst [vmem:[#allocation97_spill] sm:$0xff] %v5205_v59  ;;  %v5209_v63 = vpop.permute.xlu1 %2680 }
 0x506   : > { %7151 = vst [vmem:[#allocation16_spill] sm:$0xff] %v5209_v63  ;;  %1226 = vrot.lane.b32.xlu0 %v1148_v3, %s3841_s18  ;;  %v1644_v3 = vmul.f32 %v4452_v11, %v4830_v15 }
 0x507   : > { %1224 = vrot.lane.b32.xlu1 %v1147_v25, %s3841_s18 }
 0x508   : > { %v5215_v45 = vpop.permute.xlu0 %1504 }
 0x509   : > { %7152 = vst [vmem:[#allocation98_spill] sm:$0xff] %v5215_v45  ;;  %v5219_v55 = vpop.permute.xlu1 %2928  ;;  %v1643_v45 = vmul.f32 %v4452_v11, %v4819_v5 }
 0x50a   : > { %7153 = vst [vmem:[#allocation99_spill] sm:$0xff] %v5219_v55  ;;  %1468 = vrot.lane.b32.xlu0 %v1393_v46, %s3842_s19 }
 0x50b   : > { %1228 = vrot.lane.b32.xlu1 %v1149_v26, %s3841_s18  ;;  %v1645_v26 = vmul.f32 %v4452_v11, %v4826_v22  ;;  %v2376_v11 = vmul.f32 %v4634_v60, %v4839_v50 }
 0x50c   : > { %v5225_v49 = vpop.permute.xlu0 %1932 }
 0x50d   : > { %v5229_v25 = vpop.permute.xlu1 %1208 }
 0x50e   : > { %7154 = vst [vmem:[#allocation100_spill] sm:$0xff] %v5229_v25  ;;  %1722 = vrot.lane.b32.xlu0 %v1644_v3, %s3843_s20  ;;  %v2131_v3 = vmul.f32 %v4578_v30, %v4830_v15 }
 0x50f   : > { %1720 = vrot.lane.b32.xlu1 %v1643_v45, %s3843_s20 }
 0x510   : > { %v5235_v7 = vpop.permute.xlu0 %1968 }
 0x511   : > { %7155 = vst [vmem:[#allocation101_spill] sm:$0xff] %v5235_v7  ;;  %v5239_v46 = vpop.permute.xlu1 %1256  ;;  %v2130_v7 = vmul.f32 %v4578_v30, %v4819_v5 }
 0x512   : > { %7156 = vst [vmem:[#allocation102_spill] sm:$0xff] %v5239_v46  ;;  %2202 = vrot.lane.b32.xlu0 %v2128_v29, %s3845_s22 }
 0x513   : > { %1724 = vrot.lane.b32.xlu1 %v1645_v26, %s3843_s20  ;;  %v2132_v26 = vmul.f32 %v4578_v30, %v4826_v22  ;;  %v7160_v30 = vld [vmem:[#allocation33_spill] sm:$0xff] }
 0x514   : > { %v5245_v21 = vpop.permute.xlu0 %1210  ;;  %v1401_v2 = vmul.f32 %v7160_v30, %v4869_v9 }
 0x515   : > { %v5249_v45 = vpop.permute.xlu1 %1704 }
 0x516   : > { %2208 = vrot.lane.b32.xlu0 %v2131_v3, %s3845_s22  ;;  %v2379_v3 = vmul.f32 %v4628_v6, %v4830_v15 }
 0x517   : > { %2206 = vrot.lane.b32.xlu1 %v2130_v7, %s3845_s22 }
 0x518   : > { %v5255_v58 = vpop.permute.xlu0 %1258 }
 0x519   : > { %7157 = vst [vmem:[#allocation103_spill] sm:$0xff] %v5255_v58  ;;  %v5259_v29 = vpop.permute.xlu1 %1752  ;;  %v2378_v58 = vmul.f32 %v4628_v6, %v4819_v5  ;;  %v7161_v5 = vld [vmem:[#allocation34_spill] sm:$0xff] }
 0x51a   : > { %7158 = vst [vmem:[#allocation104_spill] sm:$0xff] %v5259_v29  ;;  %2450 = vrot.lane.b32.xlu0 %v2376_v11, %s3846_s23  ;;  %v1399_v11 = vmul.f32 %v7160_v30, %v4849_v0  ;;  %v2380_v29 = vmul.f32 %v4628_v6, %v4826_v22  ;;  %v7163_v6 = vld [vmem:[#allocation60_spill] sm:$0xff] }
 0x51b   : > { %2210 = vrot.lane.b32.xlu1 %v2132_v26, %s3845_s22  ;;  %v1895_v22 = vmul.f32 %v7163_v6, %v4856_v17 }
 0x51c   : > { %v5265_v46 = vpop.permute.xlu0 %1706 }
 0x51d   : > { %v5269_v7 = vpop.permute.xlu1 %2190 }
 0x51e   : > { %2456 = vrot.lane.b32.xlu0 %v2379_v3, %s3846_s23  ;;  %v1405_v3 = vmul.f32 %v7161_v5, %v4856_v17 }
 0x51f   : > { %2454 = vrot.lane.b32.xlu1 %v2378_v58, %s3846_s23 }
 0x520   : > { %v5275_v60 = vpop.permute.xlu0 %1754 }
 0x521   : > { %7159 = vst [vmem:[#allocation105_spill] sm:$0xff] %v5275_v60  ;;  %v5279_v26 = vpop.permute.xlu1 %2438  ;;  %v1145_v60 = vmul.f32 %v7129_v18, %v4839_v50  ;;  %v7165_v18 = vld [vmem:[#allocation61_spill] sm:$0xff] }
 0x522   : > { %1480 = vrot.lane.b32.xlu0 %v1399_v11, %s3842_s19  ;;  %v1396_v11 = vmul.f32 %v7143_v10, %v4830_v15  ;;  %v7166_v10 = vld [vmem:[#allocation17_spill] sm:$0xff] }
 0x523   : > { %2458 = vrot.lane.b32.xlu1 %v2380_v29, %s3846_s23  ;;  %v1151_v31 = vmul.f32 %v7166_v10, %v4849_v0 }
 0x524   : > { %v5285_v47 = vpop.permute.xlu0 %2192 }
 0x525   : > { %v5289_v58 = vpop.permute.xlu1 %2686 }
 0x526   : > { %7162 = vst [vmem:[#allocation33_spill] sm:$0xff] %v5289_v58  ;;  %1492 = vrot.lane.b32.xlu0 %v1405_v3, %s3842_s19  ;;  %v2134_v3 = vmul.f32 %v7165_v18, %v4849_v0 }
 0x527   : > { %1220 = vrot.lane.b32.xlu1 %v1145_v60, %s3841_s18 }
 0x528   : > { %v5295_v56 = vpop.permute.xlu0 %2440 }
 0x529   : > { %v5299_v29 = vpop.permute.xlu1 %2934 }
 0x52a   : > { %7164 = vst [vmem:[#allocation60_spill] sm:$0xff] %v5299_v29  ;;  %1960 = vrot.lane.b32.xlu0 %v1895_v22, %s7104_s21  ;;  %v1152_v22 = vmul.f32 %v7166_v10, %v4860_v37 }
 0x52b   : > { %1474 = vrot.lane.b32.xlu1 %v1396_v11, %s3842_s19 }
 0x52c   : > { %v5305_v23 = vpop.permute.xlu0 %2688 }
 0x52d   : > { %v5309_v60 = vpop.permute.xlu1 %1458 }
 0x52e   : > { %2214 = vrot.lane.b32.xlu0 %v2134_v3, %s3845_s22  ;;  %v1888_v3 = vmul.f32 %v4612_v51, %v4830_v15  ;;  %v7173_v51 = vld [vmem:[#allocation49_spill] sm:$0xff]  ;;  %v1653_v15 = vmul.f32 %v7180_v54, %v4856_v17 }
 0x52f   : > { %1716 = vrot.lane.b32.xlu1 %v1641_v41, %s3843_s20  ;;  %v1890_v52 = vmul.f32 %v7173_v51, %v4849_v0 }
 0x530   : > { %v5315_v55 = vpop.permute.xlu0 %2936 }
 0x531   : > { %v5319_v11 = vpop.permute.xlu1 %1506 }
 0x532   : > { %7167 = vst [vmem:[#allocation61_spill] sm:$0xff] %v5319_v11  ;;  %1234 = vrot.lane.b32.xlu0 %v1152_v22, %s3841_s18  ;;  %v1648_v22 = vmul.f32 %v7170_v12, %v4860_v37 }
 0x533   : > { %1942 = vrot.lane.b32.xlu1 %v1886_v57, %s7104_s21 }
 0x534   : > { %v5325_v63 = vpop.permute.xlu0 %1460 }
 0x535   : > { %7168 = vst [vmem:[#allocation17_spill] sm:$0xff] %v5325_v63  ;;  %v5329_v41 = vpop.permute.xlu1 %1934 }
 0x536   : > { %1484 = vrot.lane.b32.xlu0 %v1401_v2, %s3842_s19  ;;  %v1891_v2 = vmul.f32 %v7173_v51, %v4860_v37 }
 0x537   : > { %1946 = vrot.lane.b32.xlu1 %v1888_v3, %s7104_s21 }
 0x538   : > { %v5335_v11 = vpop.permute.xlu0 %1464 }
 0x539   : > { %7169 = vst [vmem:[#allocation106_spill] sm:$0xff] %v5335_v11  ;;  %v5339_v57 = vpop.permute.xlu1 %1970  ;;  %v7175_v11 = vld [vmem:[#allocation18_spill] sm:$0xff] }
 0x53a   : > { %7171 = vst [vmem:[#allocation45_spill] sm:$0xff] %v5339_v57  ;;  %1730 = vrot.lane.b32.xlu0 %v1648_v22, %s3843_s20  ;;  %v1157_v39 = vmul.f32 %v7175_v11, %v4856_v17  ;;  %v2136_v22 = vmul.f32 %v7165_v18, %v4869_v9 }
 0x53b   : > { %1232 = vrot.lane.b32.xlu1 %v1151_v31, %s3841_s18 }
 0x53c   : > { %v5345_v61 = vpop.permute.xlu0 %1936 }
 0x53d   : > { %7172 = vst [vmem:[#allocation107_spill] sm:$0xff] %v5345_v61  ;;  %v5349_v3 = vpop.permute.xlu1 %1212 }
 0x53e   : > { %7174 = vst [vmem:[#allocation49_spill] sm:$0xff] %v5349_v3  ;;  %1952 = vrot.lane.b32.xlu0 %v1891_v2, %s7104_s21  ;;  %v1266_v2 = vsel %vm347_vm0, %v5229_v25, %v5245_v21  ;;  %v1413_v25 = vmul.f32 %v7109_v53, %v4887_v42  ;;  %v1762_v53 = vsel %vm411_vm2, %v5249_v45, %v5265_v46 }
 0x53f   : > { %1244 = vrot.lane.b32.xlu1 %v1157_v39, %s3841_s18  ;;  %v1403_v39 = vmul.f32 %v7161_v5, %v4879_v27 }
 0x540   : > { %v5355_v57 = vpop.permute.xlu0 %2198 }
 0x541   : > { %7176 = vst [vmem:[#allocation18_spill] sm:$0xff] %v5355_v57  ;;  %v5359_v31 = vpop.permute.xlu1 %1216  ;;  %v1075_v57 = vmul.f32 %v4989_v1, %v4761_v4 }
 0x542   : > { %7177 = vst [vmem:[#allocation108_spill] sm:$0xff] %v5359_v31  ;;  %2218 = vrot.lane.b32.xlu0 %v2136_v22, %s3845_s22 }
 0x543   : > { %1728 = vrot.lane.b32.xlu1 %v1647_v48, %s3843_s20  ;;  %v1514_v48 = vsel %vm379_vm1, %v5205_v59, %v5309_v60  ;;  %v1323_v22 = vadd.f32 %v1266_v2, %v1075_v57  ;;  %v1267_v59 = vsel %vm347_vm0, %v5245_v21, %v5349_v3  ;;  %v1976_v57 = vsel %vm439_vm3, %v5225_v49, %v5329_v41 }
 0x544   : > { %v5368_v33 = vpop.permute.xlu0 %2446  ;;  %v1893_v21 = vmul.f32 %v7163_v6, %v4879_v27 }
 0x545   : > { %7178 = vst [vmem:[#allocation109_spill] sm:$0xff] %v5368_v33  ;;  %v5374_v31 = vpop.permute.xlu1 %1708  ;;  %v1571_v4 = vadd.f32 %v1514_v48, %v1323_v22 }
 0x546   : > { %7179 = vst [vmem:[#allocation110_spill] sm:$0xff] %v5374_v31  ;;  %1488 = vrot.lane.b32.xlu0 %v1403_v39, %s3842_s19 }
 0x547   : > { %1740 = vrot.lane.b32.xlu1 %v1653_v15, %s3843_s20  ;;  %v1076_v15 = vmul.f32 %v4989_v1, %v4771_v36  ;;  %v1819_v39 = vadd.f32 %v1762_v53, %v1571_v4  ;;  %v7185_v36 = vld [vmem:[#allocation55_spill] sm:$0xff]  ;;  %v1153_v53 = vmul.f32 %v7166_v10, %v4869_v9  ;;  %v1400_v10 = vmul.f32 %v7160_v30, %v4860_v37 }
 0x548   : > { %v5383_v33 = vpop.permute.xlu0 %1218 }
 0x549   : > { %7181 = vst [vmem:[#allocation46_spill] sm:$0xff] %v5383_v33  ;;  %v5387_v5 = vpop.permute.xlu1 %1712  ;;  %v2027_v22 = vadd.f32 %v1976_v57, %v1819_v39  ;;  %v1515_v33 = vsel %vm379_vm1, %v5309_v60, %v5325_v63  ;;  %v2249_v57 = vsel %vm474_vm4, %v5269_v7, %v5285_v47  ;;  %v2497_v39 = vsel %vm506_vm5, %v5279_v26, %v5295_v56  ;;  %v5828_v63 = vld [vmem:[#allocation2 + $0x120] sm:$0xff] }
 0x54a   : > { %7182 = vst [vmem:[#allocation111_spill] sm:$0xff] %v5387_v5  ;;  %1508 = vrot.lane.b32.xlu0 %v1413_v25, %s3842_s19  ;;  %v1324_v25 = vadd.f32 %v1267_v59, %v1076_v15  ;;  %v1763_v5 = vsel %vm411_vm2, %v5265_v46, %v5374_v31  ;;  %v1901_v59 = vmul.f32 %v4616_v20, %v4887_v42  ;;  %v5779_v31 = vld [vmem:[#allocation2 + $0x98] sm:$0xff]  ;;  %7272 = vst [vmem:[#allocation144_spill] sm:$0xff] %v5828_v63 }
 0x54b   : > { %1950 = vrot.lane.b32.xlu1 %v1890_v52, %s7104_s21  ;;  %v2140_v52 = vmul.f32 %v7185_v36, %v4856_v17  ;;  %v2307_v60 = vadd.f32 %v2249_v57, %v2027_v22  ;;  %v1156_v20 = vmul.f32 %v7175_v11, %v4891_v44 }
 0x54c   : > { %v5404_v2 = vpop.permute.xlu0 %1452  ;;  %v1572_v15 = vadd.f32 %v1515_v33, %v1324_v25 }
 0x54d   : > { %7183 = vst [vmem:[#allocation112_spill] sm:$0xff] %v5404_v2  ;;  %v5408_v48 = vpop.permute.xlu1 %1938 }
 0x54e   : > { %7184 = vst [vmem:[#allocation113_spill] sm:$0xff] %v5408_v48  ;;  %1956 = vrot.lane.b32.xlu0 %v1893_v21, %s7104_s21  ;;  %v1820_v21 = vadd.f32 %v1763_v5, %v1572_v15  ;;  %v1977_v5 = vsel %vm439_vm3, %v5329_v41, %v5345_v61 }
 0x54f   : > { %2226 = vrot.lane.b32.xlu1 %v2140_v52, %s3845_s22  ;;  %v2555_v52 = vadd.f32 %v2497_v39, %v2307_v60 }
 0x550   : > { %v5420_v4 = vpop.permute.xlu0 %1714  ;;  %v2028_v22 = vadd.f32 %v1977_v5, %v1820_v21  ;;  %v1652_v21 = vmul.f32 %v7180_v54, %v4891_v44  ;;  %v5486_v5 = vld [vmem:[#allocation2 + $0xb0] sm:$0xff] }
 0x551   : > { %7186 = vst [vmem:[#allocation55_spill] sm:$0xff] %v5420_v4  ;;  %v5424_v17 = vpop.permute.xlu1 %2194  ;;  %v3743_v4 = vld [vmem:[#allocation2 + $0x48] sm:$0xff] }
 0x552   : > { %7187 = vst [vmem:[#allocation114_spill] sm:$0xff] %v5424_v17  ;;  %1972 = vrot.lane.b32.xlu0 %v1901_v59, %s7104_s21  ;;  %v2250_v25 = vsel %vm474_vm4, %v5285_v47, %v5424_v17  ;;  %v1409_v59 = vmul.f32 %v7099_v28, %v4898_v16  ;;  %v1649_v47 = vmul.f32 %v7170_v12, %v4869_v9  ;;  %v7262_v17 = vld [vmem:[#allocation30_spill] sm:$0xff] }
 0x553   : > { %1236 = vrot.lane.b32.xlu1 %v1153_v53, %s3841_s18  ;;  %v2308_v41 = vadd.f32 %v2250_v25, %v2028_v22  ;;  %v2745_v53 = vsel %vm538_vm6, %v5289_v58, %v5305_v23  ;;  %v7289_v58 = vld [vmem:[#allocation11_spill] sm:$0xff] }
 0x554   : > { %v5433_v46 = vpop.permute.xlu0 %1940  ;;  %v2803_v28 = vadd.f32 %v2745_v53, %v2555_v52  ;;  %v2135_v53 = vmul.f32 %v7165_v18, %v5486_v5 }
 0x555   : > { %7188 = vst [vmem:[#allocation115_spill] sm:$0xff] %v5433_v46  ;;  %v5437_v33 = vpop.permute.xlu1 %2442 }
 0x556   : > { %7189 = vst [vmem:[#allocation116_spill] sm:$0xff] %v5437_v33  ;;  %1242 = vrot.lane.b32.xlu0 %v1156_v20, %s3841_s18  ;;  %v2498_v37 = vsel %vm506_vm5, %v5295_v56, %v5437_v33 }
 0x557   : > { %1482 = vrot.lane.b32.xlu1 %v1400_v10, %s3842_s19  ;;  %v2556_v56 = vadd.f32 %v2498_v37, %v2308_v41  ;;  %v1892_v10 = vmul.f32 %v7173_v51, %v4869_v9  ;;  %v1263_v51 = vsel %vm347_vm0, %v5099_v35, %v5145_v24  ;;  %v2139_v37 = vmul.f32 %v7185_v36, %v4891_v44 }
 0x558   : > { %v5455_v30 = vpop.permute.xlu0 %2186 }
 0x559   : > { %7190 = vst [vmem:[#allocation117_spill] sm:$0xff] %v5455_v30  ;;  %v5459_v15 = vpop.permute.xlu1 %2690 }
 0x55a   : > { %7191 = vst [vmem:[#allocation118_spill] sm:$0xff] %v5459_v15  ;;  %v2746_v57 = vsel %vm538_vm6, %v5305_v23, %v5459_v15  ;;  %1500 = vrot.lane.b32.xlu0 %v1409_v59, %s3842_s19  ;;  %v2993_v23 = vsel %vm570_vm7, %v5299_v29, %v5315_v55 }
 0x55b   : > { %1732 = vrot.lane.b32.xlu1 %v1649_v47, %s3843_s20  ;;  %v2804_v12 = vadd.f32 %v2746_v57, %v2556_v56  ;;  %v5488_v25 = vadd.f32 %v2993_v23, %v2803_v28  ;;  %v1511_v57 = vsel %vm379_vm1, %v5095_v19, %v5169_v62 }
 0x55c   : > { %v5471_v60 = vpop.permute.xlu0 %2434 }
 0x55d   : > { %7192 = vst [vmem:[#allocation119_spill] sm:$0xff] %v5471_v60  ;;  %v5475_v20 = vpop.permute.xlu1 %2938  ;;  %7194 = vst [vmem:[#allocation121_spill] sm:$0xff] %v5488_v25 }
 0x55e   : > { %7193 = vst [vmem:[#allocation120_spill] sm:$0xff] %v5475_v20  ;;  %v2994_v39 = vsel %vm570_vm7, %v5315_v55, %v5475_v20  ;;  %1738 = vrot.lane.b32.xlu0 %v1652_v21, %s3843_s20  ;;  %v7197_v55 = vld [vmem:[#allocation9_spill] sm:$0xff]  ;;  %v2622_v21 = vmul.f32 %v4909_v34, %v4789_v43  ;;  %v1974_v43 = vsel %vm439_vm3, %v5139_v8, %v5185_v13 }
 0x55f   : > { %v5490_v52 = vadd.f32 %v2994_v39, %v2804_v12  ;;  %1954 = vrot.lane.b32.xlu1 %v1892_v10, %s7104_s21  ;;  %v1071_v59 = vmul.f32 %v7197_v55, %v4734_v40  ;;  %v1072_v10 = vmul.f32 %v7197_v55, %v4743_v32  ;;  %v1155_v39 = vmul.f32 %v7175_v11, %v4879_v27 }
 0x560   : > { %v5496_v22 = vpop.permute.xlu0 %2682  ;;  %v2624_v32 = vmul.f32 %v4909_v34, %v4839_v50 }
 0x561   : > { %7195 = vst [vmem:[#allocation122_spill] sm:$0xff] %v5490_v52  ;;  %7196 = vst [vmem:[#allocation123_spill] sm:$0xff] %v5496_v22  ;;  %v5504_v47 = vpop.permute.xlu1 %1204  ;;  %v1319_v56 = vadd.f32 %v1263_v51, %v1071_v59  ;;  %v7207_v52 = vld [vmem:[#allocation94_spill] sm:$0xff] }
 0x562   : > { %2224 = vrot.lane.b32.xlu0 %v2139_v37, %s3845_s22  ;;  %v1264_v40 = vsel %vm347_vm0, %v5145_v24, %v5504_v47  ;;  %v1759_v24 = vsel %vm411_vm2, %v5119_v14, %v5165_v38 }
 0x563   : > { %2216 = vrot.lane.b32.xlu1 %v2135_v53, %s3845_s22  ;;  %v1567_v12 = vadd.f32 %v1511_v57, %v1319_v56  ;;  %v1320_v51 = vadd.f32 %v1264_v40, %v1072_v10  ;;  %v7202_v53 = vld [vmem:[#allocation20_spill] sm:$0xff]  ;;  %v1512_v56 = vsel %vm379_vm1, %v5169_v62, %v5404_v2  ;;  %v1651_v62 = vmul.f32 %v7180_v54, %v4879_v27 }
 0x564   : > { %v5516_v28 = vpop.permute.xlu0 %2930  ;;  %v1165_v57 = vmul.f32 %v7202_v53, %v4887_v42  ;;  %v2247_v27 = vsel %vm474_vm4, %v7207_v52, %v5455_v30 }
 0x565   : > { %7198 = vst [vmem:[#allocation9_spill] sm:$0xff] %v5516_v28  ;;  %v5522_v23 = vpop.permute.xlu1 %1466  ;;  %v1815_v59 = vadd.f32 %v1759_v24, %v1567_v12  ;;  %v1568_v10 = vadd.f32 %v1512_v56, %v1320_v51  ;;  %v7205_v24 = vld [vmem:[#allocation64_spill] sm:$0xff] }
 0x566   : > { %7199 = vst [vmem:[#allocation124_spill] sm:$0xff] %v5522_v23  ;;  %2694 = vrot.lane.b32.xlu0 %v2622_v21, %s3847_s24 }
 0x567   : > { %1240 = vrot.lane.b32.xlu1 %v1155_v39, %s3841_s18  ;;  %v2023_v21 = vadd.f32 %v1974_v43, %v1815_v59  ;;  %v7204_v39 = vld [vmem:[#allocation6_spill] sm:$0xff]  ;;  %v7209_v59 = vld [vmem:[#allocation96_spill] sm:$0xff] }
 0x568   : > { %v5534_v37 = vpop.permute.xlu0 %1472  ;;  %v2627_v41 = vmul.f32 %v7205_v24, %v7204_v39 }
 0x569   : > { %7200 = vst [vmem:[#allocation125_spill] sm:$0xff] %v5534_v37  ;;  %v5538_v11 = vpop.permute.xlu1 %1700  ;;  %v7208_v37 = vld [vmem:[#allocation92_spill] sm:$0xff] }
 0x56a   : > { %7201 = vst [vmem:[#allocation126_spill] sm:$0xff] %v5538_v11  ;;  %v1760_v40 = vsel %vm411_vm2, %v5165_v38, %v5538_v11  ;;  %2698 = vrot.lane.b32.xlu0 %v2624_v32, %s3847_s24  ;;  %v2246_v38 = vsel %vm474_vm4, %v7208_v37, %v7207_v52  ;;  %v2495_v52 = vsel %vm506_vm5, %v7209_v59, %v5471_v60 }
 0x56b   : > { %1260 = vrot.lane.b32.xlu1 %v1165_v57, %s3841_s18  ;;  %v1816_v53 = vadd.f32 %v1760_v40, %v1568_v10  ;;  %v2303_v43 = vadd.f32 %v2246_v38, %v2023_v21  ;;  %v7210_v57 = vld [vmem:[#allocation86_spill] sm:$0xff]  ;;  %v3736_v40 = vld [vmem:[#allocation2 + $0x20] sm:$0xff]  ;;  %v7212_v10 = vld [vmem:[#allocation67_spill] sm:$0xff] }
 0x56c   : > { %v5550_v12 = vpop.permute.xlu0 %1476  ;;  %v2494_v56 = vsel %vm506_vm5, %v7210_v57, %v7209_v59  ;;  %v2865_v39 = vmul.f32 %v3736_v40, %v7212_v10  ;;  %v7216_v38 = vld [vmem:[#allocation87_spill] sm:$0xff] }
 0x56d   : > { %7203 = vst [vmem:[#allocation20_spill] sm:$0xff] %v5550_v12  ;;  %v5554_v25 = vpop.permute.xlu1 %1930  ;;  %v7217_v40 = vld [vmem:[#allocation99_spill] sm:$0xff] }
 0x56e   : > { %7206 = vst [vmem:[#allocation6_spill] sm:$0xff] %v5554_v25  ;;  %v1975_v51 = vsel %vm439_vm3, %v5185_v13, %v5554_v25  ;;  %2704 = vrot.lane.b32.xlu0 %v2627_v41, %s3847_s24  ;;  %v7214_v41 = vld [vmem:[#allocation48_spill] sm:$0xff] }
 0x56f   : > { %v2024_v32 = vadd.f32 %v1975_v51, %v1816_v53  ;;  %1736 = vrot.lane.b32.xlu1 %v1651_v62, %s3843_s20  ;;  %v1661_v21 = vmul.f32 %v7214_v41, %v4887_v42  ;;  %v5579_v53 = vld [vmem:[#allocation2 + $0xc0] sm:$0xff]  ;;  %v7218_v42 = vld [vmem:[#allocation89_spill] sm:$0xff] }
 0x570   : > { %v5572_v54 = vpop.permute.xlu0 %1944  ;;  %v7215_v62 = vld [vmem:[#allocation16_spill] sm:$0xff]  ;;  %v2990_v10 = vsel %vm570_vm7, %v7218_v42, %v7217_v40  ;;  %v2137_v59 = vmul.f32 %v7165_v18, %v5579_v53 }
 0x571   : > { %7211 = vst [vmem:[#allocation64_spill] sm:$0xff] %v5572_v54  ;;  %v2304_v13 = vadd.f32 %v2247_v27, %v2024_v32  ;;  %v5575_v12 = vpop.permute.xlu1 %2200  ;;  %v2742_v51 = vsel %vm538_vm6, %v7216_v38, %v7215_v62  ;;  %v5588_v54 = vld [vmem:[#allocation2 + $0xd0] sm:$0xff]  ;;  %v2551_v32 = vadd.f32 %v2494_v56, %v2303_v43  ;;  %v2743_v41 = vsel %vm538_vm6, %v7215_v62, %v5496_v22  ;;  %v7224_v62 = vld [vmem:[#allocation13_spill] sm:$0xff] }
 0x572   : > { %7213 = vst [vmem:[#allocation94_spill] sm:$0xff] %v5575_v12  ;;  %2932 = vrot.lane.b32.xlu0 %v2865_v39, %s3848_s25  ;;  %v2138_v43 = vmul.f32 %v7185_v36, %v5588_v54  ;;  %v2991_v56 = vsel %vm570_vm7, %v7217_v40, %v5516_v28  ;;  %v1894_v40 = vmul.f32 %v7163_v6, %v4891_v44  ;;  %v5719_v28 = vld [vmem:[#allocation2 + $0x128] sm:$0xff] }
 0x573   : > { %v2552_v27 = vadd.f32 %v2495_v52, %v2304_v13  ;;  %1756 = vrot.lane.b32.xlu1 %v1661_v21, %s3843_s20  ;;  %v2799_v39 = vadd.f32 %v2742_v51, %v2551_v32  ;;  %v2382_v51 = vmul.f32 %v7224_v62, %v4849_v0  ;;  %v7226_v32 = vld [vmem:[#allocation19_spill] sm:$0xff]  ;;  %v7228_v0 = vld [vmem:[#allocation34_spill] sm:$0xff]  ;;  %v5722_v22 = vld [vmem:[#allocation2 + $0xe8] sm:$0xff] }
 0x574   : > { %v5597_v12 = vpop.permute.xlu0 %1948 }
 0x575   : > { %7219 = vst [vmem:[#allocation92_spill] sm:$0xff] %v5597_v12  ;;  %v2800_v46 = vadd.f32 %v2743_v41, %v2552_v27  ;;  %v5601_v20 = vpop.permute.xlu1 %2448  ;;  %v5609_v13 = vadd.f32 %v2990_v10, %v2799_v39  ;;  %v1161_v27 = vmul.f32 %v7226_v32, %v4898_v16  ;;  %v7232_v32 = vld [vmem:[#allocation47_spill] sm:$0xff]  ;;  %v7238_v12 = vld [vmem:[#allocation50_spill] sm:$0xff] }
 0x576   : > { %7220 = vst [vmem:[#allocation96_spill] sm:$0xff] %v5601_v20  ;;  %2220 = vrot.lane.b32.xlu0 %v2137_v59, %s3845_s22  ;;  %v1404_v59 = vmul.f32 %v7228_v0, %v4891_v44  ;;  %v5648_v0 = vld [vmem:[#allocation2 + $0x70] sm:$0xff] }
 0x577   : > { %7221 = vst [vmem:[#allocation86_spill] sm:$0xff] %v5609_v13  ;;  %2222 = vrot.lane.b32.xlu1 %v2138_v43, %s3845_s22  ;;  %v5612_v21 = vadd.f32 %v2991_v56, %v2800_v46  ;;  %v2384_v46 = vmul.f32 %v7224_v62, %v4869_v9  ;;  %v7230_v43 = vld [vmem:[#allocation7_spill] sm:$0xff] }
 0x578   : > { %v5614_v18 = vpop.permute.xlu0 %1226  ;;  %v2387_v56 = vmul.f32 %v7230_v43, %v4891_v44  ;;  %v2386_v60 = vmul.f32 %v7230_v43, %v5588_v54 }
 0x579   : > { %7222 = vst [vmem:[#allocation67_spill] sm:$0xff] %v5612_v21  ;;  %7223 = vst [vmem:[#allocation48_spill] sm:$0xff] %v5614_v18  ;;  %v5618_v52 = vpop.permute.xlu1 %1224  ;;  %v5704_v18 = vld [vmem:[#allocation2 + $0x90] sm:$0xff] }
 0x57a   : > { %7225 = vst [vmem:[#allocation16_spill] sm:$0xff] %v5618_v52  ;;  %2462 = vrot.lane.b32.xlu0 %v2382_v51, %s3846_s23  ;;  %7249 = vst [vmem:[#allocation131_spill] sm:$0xff] %v5704_v18 }
 0x57b   : > { %1252 = vrot.lane.b32.xlu1 %v1161_v27, %s3841_s18  ;;  %v1657_v27 = vmul.f32 %v7232_v32, %v4898_v16  ;;  %s7334_s18 = smov 19  }
 0x57c   : > { %v5626_v10 = vpop.permute.xlu0 %1468 }
 0x57d   : > { %v5630_v41 = vpop.permute.xlu1 %1228 }
 0x57e   : > { %7227 = vst [vmem:[#allocation87_spill] sm:$0xff] %v5630_v41  ;;  %2466 = vrot.lane.b32.xlu0 %v2384_v46, %s3846_s23  ;;  %v2625_v46 = vmul.f32 %v5648_v0, %v4909_v34  ;;  %v5708_v41 = vld [vmem:[#allocation2 + $0x108] sm:$0xff] }
 0x57f   : > { %1490 = vrot.lane.b32.xlu1 %v1404_v59, %s3842_s19  ;;  %s3853_s19 = smov [#allocation3]  }
 0x580   : > { %v5636_v39 = vpop.permute.xlu0 %1722 }
 0x581   : > { %7229 = vst [vmem:[#allocation99_spill] sm:$0xff] %v5636_v39  ;;  %v5640_v51 = vpop.permute.xlu1 %1720 }
 0x582   : > { %7231 = vst [vmem:[#allocation13_spill] sm:$0xff] %v5640_v51  ;;  %2472 = vrot.lane.b32.xlu0 %v2387_v56, %s3846_s23  ;;  %v5660_v56 = vld [vmem:[#allocation2 + $0x58] sm:$0xff]  ;;  %v1898_v51 = vmul.f32 %v7238_v12, %v4898_v16 }
 0x583   : > { %1748 = vrot.lane.b32.xlu1 %v1657_v27, %s3843_s20  ;;  %7235 = vst [vmem:[#allocation7_spill] sm:$0xff] %v5660_v56  ;;  %v7236_v27 = vld [vmem:[#allocation68_spill] sm:$0xff]  ;;  %v7243_v12 = vld [vmem:[#allocation35_spill] sm:$0xff]  ;;  %s3772_s20 = sshll.u32 %s3853_s19, 4  ;;  %s3773_s20 = int_to_ptr.vmem [resolvable:$false] %s3772_s20 }
 0x584   : > { %v5646_v9 = vpop.permute.xlu0 %2202  ;;  %v2870_v20 = vmul.f32 %v5660_v56, %v7236_v27  ;;  %v2872_v6 = vmul.f32 %v7236_v27, %v4839_v50  ;;  %v5690_v50 = vld [vmem:[#allocation2 + $0x80] sm:$0xff] }
 0x585   : > { %v5652_v59 = vpop.permute.xlu1 %1724  ;;  %7245 = vst [vmem:[#allocation129_spill] sm:$0xff] %v5690_v50 }
 0x586   : > { %7233 = vst [vmem:[#allocation19_spill] sm:$0xff] %v5652_v59  ;;  %2700 = vrot.lane.b32.xlu0 %v2625_v46, %s3847_s24  ;;  %v5676_v46 = vld [vmem:[#allocation2 + $0x60] sm:$0xff]  ;;  %v5694_v59 = vld [vmem:[#allocation2 + $0xf8] sm:$0xff] }
 0x587   : > { %1958 = vrot.lane.b32.xlu1 %v1894_v40, %s7104_s21  ;;  %7240 = vst [vmem:[#allocation50_spill] sm:$0xff] %v5676_v46  ;;  %v2871_v25 = vmul.f32 %v5676_v46, %v7236_v27 }
 0x588   : > { %v5658_v32 = vpop.permute.xlu0 %2208 }
 0x589   : > { %7234 = vst [vmem:[#allocation34_spill] sm:$0xff] %v5658_v32  ;;  %v5664_v39 = vpop.permute.xlu1 %2206  ;;  %v2623_v32 = vmul.f32 %v5676_v46, %v4909_v34  ;;  %v2876_v46 = vmul.f32 %v5704_v18, %v7243_v12 }
 0x58a   : > { %7237 = vst [vmem:[#allocation47_spill] sm:$0xff] %v5664_v39  ;;  %2942 = vrot.lane.b32.xlu0 %v2870_v20, %s3848_s25  ;;  %v5684_v20 = vld [vmem:[#allocation2 + $0x88] sm:$0xff] }
 0x58b   : > { %1966 = vrot.lane.b32.xlu1 %v1898_v51, %s7104_s21  ;;  %7242 = vst [vmem:[#allocation128_spill] sm:$0xff] %v5684_v20  ;;  %v2875_v51 = vmul.f32 %v5684_v20, %v7243_v12  ;;  %s6750_s21 = scalar_lea.hbm %s6800_s8, %s3477_s17 }
 0x58c   : > { %v5670_v44 = vpop.permute.xlu0 %2450 }
 0x58d   : > { %v5674_v40 = vpop.permute.xlu1 %2210 }
 0x58e   : > { %7239 = vst [vmem:[#allocation68_spill] sm:$0xff] %v5674_v40  ;;  %2946 = vrot.lane.b32.xlu0 %v2872_v6, %s3848_s25  ;;  %v2626_v40 = vmul.f32 %v5690_v50, %v7205_v24 }
 0x58f   : > { %2696 = vrot.lane.b32.xlu1 %v2623_v32, %s3847_s24  ;;  %v7247_v32 = vld [vmem:[#allocation62_spill] sm:$0xff] }
 0x590   : > { %v5682_v16 = vpop.permute.xlu0 %2456  ;;  %v2142_v6 = vmul.f32 %v7247_v32, %v5694_v59 }
 0x591   : > { %7241 = vst [vmem:[#allocation127_spill] sm:$0xff] %v5682_v16  ;;  %v5688_v39 = vpop.permute.xlu1 %2454 }
 0x592   : > { %7244 = vst [vmem:[#allocation35_spill] sm:$0xff] %v5688_v39  ;;  %2952 = vrot.lane.b32.xlu0 %v2875_v51, %s3848_s25  ;;  %v2628_v39 = vmul.f32 %v5704_v18, %v7205_v24 }
 0x593   : > { %2702 = vrot.lane.b32.xlu1 %v2626_v40, %s3847_s24  ;;  %v2144_v40 = vmul.f32 %v7247_v32, %v5708_v41 }
 0x594   : > { %v5698_v34 = vpop.permute.xlu0 %1480 }
 0x595   : > { %7246 = vst [vmem:[#allocation130_spill] sm:$0xff] %v5698_v34  ;;  %v5702_v16 = vpop.permute.xlu1 %2458  ;;  %v2141_v34 = vmul.f32 %v7185_v36, %v5722_v22  ;;  %v5747_v36 = vld [vmem:[#allocation2 + $0xa8] sm:$0xff] }
 0x596   : > { %7248 = vst [vmem:[#allocation62_spill] sm:$0xff] %v5702_v16  ;;  %2230 = vrot.lane.b32.xlu0 %v2142_v6, %s3845_s22  ;;  %v7250_v16 = vld [vmem:[#allocation29_spill] sm:$0xff]  ;;  %7256 = vst [vmem:[#allocation134_spill] sm:$0xff] %v5747_v36 }
 0x597   : > { %2706 = vrot.lane.b32.xlu1 %v2628_v39, %s3847_s24  ;;  %v2869_v23 = vmul.f32 %v3743_v4, %v7250_v16  ;;  %v7252_v39 = vld [vmem:[#allocation8_spill] sm:$0xff]  ;;  %v2385_v16 = vmul.f32 %v7224_v62, %v5579_v53 }
 0x598   : > { %v5712_v51 = vpop.permute.xlu0 %1492  ;;  %v2147_v48 = vmul.f32 %v7252_v39, %v5719_v28  ;;  %v2146_v11 = vmul.f32 %v7252_v39, %v5828_v63 }
 0x599   : > { %v5716_v52 = vpop.permute.xlu1 %1220 }
 0x59a   : > { %2234 = vrot.lane.b32.xlu0 %v2144_v40, %s3845_s22  ;;  %v2383_v40 = vmul.f32 %v7224_v62, %v5486_v5 }
 0x59b   : > { %2940 = vrot.lane.b32.xlu1 %v2869_v23, %s3848_s25 }
 0x59c   : > { %v5725_v6 = vpop.permute.xlu0 %1960 }
 0x59d   : > { %7251 = vst [vmem:[#allocation29_spill] sm:$0xff] %v5725_v6  ;;  %v5729_v15 = vpop.permute.xlu1 %1474 }
 0x59e   : > { %7253 = vst [vmem:[#allocation8_spill] sm:$0xff] %v5729_v15  ;;  %2240 = vrot.lane.b32.xlu0 %v2147_v48, %s3845_s22  ;;  %v7257_v48 = vld [vmem:[#allocation65_spill] sm:$0xff] }
 0x59f   : > { %2228 = vrot.lane.b32.xlu1 %v2141_v34, %s3845_s22  ;;  %v2630_v34 = vmul.f32 %v5747_v36, %v7257_v48 }
 0x5a0   : > { %v5735_v4 = vpop.permute.xlu0 %2214 }
 0x5a1   : > { %7254 = vst [vmem:[#allocation132_spill] sm:$0xff] %v5735_v4  ;;  %v5739_v23 = vpop.permute.xlu1 %1716 }
 0x5a2   : > { %2468 = vrot.lane.b32.xlu0 %v2385_v16, %s3846_s23  ;;  %v5759_v16 = vld [vmem:[#allocation2 + $0xb8] sm:$0xff] }
 0x5a3   : > { %2464 = vrot.lane.b32.xlu1 %v2383_v40, %s3846_s23  ;;  %v2632_v40 = vmul.f32 %v5759_v16, %v7257_v48 }
 0x5a4   : > { %v5745_v15 = vpop.permute.xlu0 %1234 }
 0x5a5   : > { %7255 = vst [vmem:[#allocation133_spill] sm:$0xff] %v5745_v15  ;;  %v5751_v4 = vpop.permute.xlu1 %1942  ;;  %v5765_v15 = vld [vmem:[#allocation2 + $0xe0] sm:$0xff] }
 0x5a6   : > { %2710 = vrot.lane.b32.xlu0 %v2630_v34, %s3847_s24  ;;  %7260 = vst [vmem:[#allocation136_spill] sm:$0xff] %v5765_v15  ;;  %v2388_v61 = vmul.f32 %v5765_v15, %v7230_v43 }
 0x5a7   : > { %2470 = vrot.lane.b32.xlu1 %v2386_v60, %s3846_s23  ;;  %v5773_v60 = vld [vmem:[#allocation2 + $0xd8] sm:$0xff] }
 0x5a8   : > { %v5757_v62 = vpop.permute.xlu0 %1484  ;;  %v2635_v30 = vmul.f32 %v5773_v60, %v7262_v17 }
 0x5a9   : > { %7258 = vst [vmem:[#allocation65_spill] sm:$0xff] %v5757_v62  ;;  %v5763_v33 = vpop.permute.xlu1 %1946 }
 0x5aa   : > { %7259 = vst [vmem:[#allocation135_spill] sm:$0xff] %v5763_v33  ;;  %2714 = vrot.lane.b32.xlu0 %v2632_v40, %s3847_s24  ;;  %v2629_v33 = vmul.f32 %v5779_v31, %v7205_v24 }
 0x5ab   : > { %2474 = vrot.lane.b32.xlu1 %v2388_v61, %s3846_s23  ;;  %v2873_v61 = vmul.f32 %v5648_v0, %v7236_v27  ;;  %v2874_v0 = vmul.f32 %v5690_v50, %v7243_v12 }
 0x5ac   : > { %v5771_v34 = vpop.permute.xlu0 %1730 }
 0x5ad   : > { %7261 = vst [vmem:[#allocation137_spill] sm:$0xff] %v5771_v34  ;;  %v5777_v20 = vpop.permute.xlu1 %1232 }
 0x5ae   : > { %7263 = vst [vmem:[#allocation30_spill] sm:$0xff] %v5777_v20  ;;  %2720 = vrot.lane.b32.xlu0 %v2635_v30, %s3847_s24  ;;  %v5793_v20 = vld [vmem:[#allocation2 + $0x110] sm:$0xff] }
 0x5af   : > { %2708 = vrot.lane.b32.xlu1 %v2629_v33, %s3847_s24  ;;  %v2145_v33 = vmul.f32 %v7247_v32, %v5793_v20 }
 0x5b0   : > { %v5785_v40 = vpop.permute.xlu0 %1952 }
 0x5b1   : > { %7264 = vst [vmem:[#allocation138_spill] sm:$0xff] %v5785_v40  ;;  %v5789_v34 = vpop.permute.xlu1 %1244 }
 0x5b2   : > { %2948 = vrot.lane.b32.xlu0 %v2873_v61, %s3848_s25  ;;  %v7268_v61 = vld [vmem:[#allocation36_spill] sm:$0xff] }
 0x5b3   : > { %2944 = vrot.lane.b32.xlu1 %v2871_v25, %s3848_s25  ;;  %v2390_v40 = vmul.f32 %v7268_v61, %v5694_v59 }
 0x5b4   : > { %v5797_v24 = vpop.permute.xlu0 %2218 }
 0x5b5   : > { %7265 = vst [vmem:[#allocation139_spill] sm:$0xff] %v5797_v24  ;;  %v5801_v30 = vpop.permute.xlu1 %1728 }
 0x5b6   : > { %7266 = vst [vmem:[#allocation140_spill] sm:$0xff] %v5801_v30  ;;  %2236 = vrot.lane.b32.xlu0 %v2145_v33, %s3845_s22  ;;  %v5816_v30 = vld [vmem:[#allocation2 + $0x100] sm:$0xff]  ;;  %v2392_v33 = vmul.f32 %v7268_v61, %v5708_v41 }
 0x5b7   : > { %2950 = vrot.lane.b32.xlu1 %v2874_v0, %s3848_s25  ;;  %7269 = vst [vmem:[#allocation36_spill] sm:$0xff] %v5816_v30  ;;  %v2143_v56 = vmul.f32 %v7247_v32, %v5816_v30 }
 0x5b8   : > { %v5807_v27 = vpop.permute.xlu0 %1488 }
 0x5b9   : > { %7267 = vst [vmem:[#allocation141_spill] sm:$0xff] %v5807_v27  ;;  %v5811_v25 = vpop.permute.xlu1 %1740 }
 0x5ba   : > { %2478 = vrot.lane.b32.xlu0 %v2390_v40, %s3846_s23 }
 0x5bb   : > { %2954 = vrot.lane.b32.xlu1 %v2876_v46, %s3848_s25  ;;  %v7274_v46 = vld [vmem:[#allocation63_spill] sm:$0xff] }
 0x5bc   : > { %v5819_v50 = vpop.permute.xlu0 %1508  ;;  %v2395_v18 = vmul.f32 %v7274_v46, %v5719_v28 }
 0x5bd   : > { %7270 = vst [vmem:[#allocation142_spill] sm:$0xff] %v5819_v50  ;;  %v5823_v0 = vpop.permute.xlu1 %1950 }
 0x5be   : > { %7271 = vst [vmem:[#allocation143_spill] sm:$0xff] %v5823_v0  ;;  %2482 = vrot.lane.b32.xlu0 %v2392_v33, %s3846_s23  ;;  %v5840_v0 = vld [vmem:[#allocation2 + $0x130] sm:$0xff] }
 0x5bf   : > { %2232 = vrot.lane.b32.xlu1 %v2143_v56, %s3845_s22  ;;  %v2633_v56 = vmul.f32 %v7257_v48, %v5579_v53  ;;  %v2148_v13 = vmul.f32 %v7252_v39, %v5840_v0 }
 0x5c0   : > { %v5831_v40 = vpop.permute.xlu0 %1956 }
 0x5c1   : > { %7273 = vst [vmem:[#allocation145_spill] sm:$0xff] %v5831_v40  ;;  %v5835_v50 = vpop.permute.xlu1 %2226  ;;  %v5905_v40 = vld [vmem:[#allocation2 + $0x138] sm:$0xff] }
 0x5c2   : > { %7275 = vst [vmem:[#allocation63_spill] sm:$0xff] %v5835_v50  ;;  %2488 = vrot.lane.b32.xlu0 %v2395_v18, %s3846_s23  ;;  %v7278_v18 = vld [vmem:[#allocation14_spill] sm:$0xff]  ;;  %v2631_v50 = vmul.f32 %v7257_v48, %v5486_v5  ;;  %v2393_v48 = vmul.f32 %v7268_v61, %v5793_v20  ;;  %7287 = vst [vmem:[#allocation151_spill] sm:$0xff] %v5905_v40 }
 0x5c3   : > { %2238 = vrot.lane.b32.xlu1 %v2146_v11, %s3845_s22  ;;  %v2878_v42 = vmul.f32 %v5747_v36, %v7278_v18  ;;  %v2634_v36 = vmul.f32 %v7262_v17, %v5588_v54 }
 0x5c4   : > { %v5843_v32 = vpop.permute.xlu0 %1972 }
 0x5c5   : > { %7276 = vst [vmem:[#allocation146_spill] sm:$0xff] %v5843_v32  ;;  %v5847_v33 = vpop.permute.xlu1 %1236  ;;  %v2389_v32 = vmul.f32 %v7230_v43, %v5722_v22  ;;  %v7280_v43 = vld [vmem:[#allocation70_spill] sm:$0xff] }
 0x5c6   : > { %7277 = vst [vmem:[#allocation147_spill] sm:$0xff] %v5847_v33  ;;  %2716 = vrot.lane.b32.xlu0 %v2633_v56, %s3847_s24  ;;  %v2880_v56 = vmul.f32 %v5759_v16, %v7278_v18 }
 0x5c7   : > { %2242 = vrot.lane.b32.xlu1 %v2148_v13, %s3845_s22 }
 0x5c8   : > { %v5853_v21 = vpop.permute.xlu0 %1242 }
 0x5c9   : > { %v5857_v11 = vpop.permute.xlu1 %1482 }
 0x5ca   : > { %7279 = vst [vmem:[#allocation14_spill] sm:$0xff] %v5857_v11  ;;  %2958 = vrot.lane.b32.xlu0 %v2878_v42, %s3848_s25  ;;  %v2883_v42 = vmul.f32 %v5773_v60, %v7280_v43 }
 0x5cb   : > { %2476 = vrot.lane.b32.xlu1 %v2389_v32, %s3846_s23 }
 0x5cc   : > { %v5863_v2 = vpop.permute.xlu0 %1500 }
 0x5cd   : > { %v5867_v13 = vpop.permute.xlu1 %1732 }
 0x5ce   : > { %2962 = vrot.lane.b32.xlu0 %v2880_v56, %s3848_s25  ;;  %v2636_v56 = vmul.f32 %v5765_v15, %v7262_v17  ;;  %v1089_v15 = vmul.f32 %v5759_v16, %v7289_v58 }
 0x5cf   : > { %2712 = vrot.lane.b32.xlu1 %v2631_v50, %s3847_s24 }
 0x5d0   : > { %v5873_v11 = vpop.permute.xlu0 %1738 }
 0x5d1   : > { %v5877_v32 = vpop.permute.xlu1 %1954 }
 0x5d2   : > { %2968 = vrot.lane.b32.xlu0 %v2883_v42, %s3848_s25  ;;  %v7284_v42 = vld [vmem:[#allocation66_spill] sm:$0xff] }
 0x5d3   : > { %2718 = vrot.lane.b32.xlu1 %v2634_v36, %s3847_s24  ;;  %v2638_v6 = vmul.f32 %v7284_v42, %v5694_v59 }
 0x5d4   : > { %v5883_v3 = vpop.permute.xlu0 %2224 }
 0x5d5   : > { %7281 = vst [vmem:[#allocation70_spill] sm:$0xff] %v5883_v3  ;;  %v5887_v50 = vpop.permute.xlu1 %2216  ;;  %v2877_v3 = vmul.f32 %v5779_v31, %v7243_v12  ;;  %v7291_v12 = vld [vmem:[#allocation72_spill] sm:$0xff] }
 0x5d6   : > { %7282 = vst [vmem:[#allocation148_spill] sm:$0xff] %v5887_v50  ;;  %2484 = vrot.lane.b32.xlu0 %v2393_v48, %s3846_s23  ;;  %v2640_v48 = vmul.f32 %v7284_v42, %v5708_v41 }
 0x5d7   : > { %2722 = vrot.lane.b32.xlu1 %v2636_v56, %s3847_s24 }
 0x5d8   : > { %v5893_v29 = vpop.permute.xlu0 %2694 }
 0x5d9   : > { %7283 = vst [vmem:[#allocation149_spill] sm:$0xff] %v5893_v29  ;;  %v5897_v36 = vpop.permute.xlu1 %1240  ;;  %v2149_v29 = vmul.f32 %v7252_v39, %v5905_v40  ;;  %v7293_v39 = vld [vmem:[#allocation21_spill] sm:$0xff] }
 0x5da   : > { %7285 = vst [vmem:[#allocation66_spill] sm:$0xff] %v5897_v36  ;;  %2726 = vrot.lane.b32.xlu0 %v2638_v6, %s3847_s24  ;;  %v2643_v6 = vmul.f32 %v7291_v12, %v5719_v28  ;;  %v3750_v12 = vld [vmem:[#allocation2 + $0x68] sm:$0xff] }
 0x5db   : > { %2956 = vrot.lane.b32.xlu1 %v2877_v3, %s3848_s25  ;;  %v1337_v3 = vadd.f32 %v5847_v33, %v1089_v15 }
 0x5dc   : > { %v5903_v50 = vpop.permute.xlu0 %2698 }
 0x5dd   : > { %7286 = vst [vmem:[#allocation150_spill] sm:$0xff] %v5903_v50  ;;  %v5909_v56 = vpop.permute.xlu1 %1260  ;;  %v1585_v15 = vadd.f32 %v5757_v62, %v1337_v3 }
 0x5de   : > { %7288 = vst [vmem:[#allocation152_spill] sm:$0xff] %v5909_v56  ;;  %2730 = vrot.lane.b32.xlu0 %v2640_v48, %s3847_s24  ;;  %v2391_v56 = vmul.f32 %v7268_v61, %v5816_v30  ;;  %v2881_v48 = vmul.f32 %v7278_v18, %v5579_v53  ;;  %v7295_v61 = vld [vmem:[#allocation10_spill] sm:$0xff]  ;;  %v7297_v30 = vld [vmem:[#allocation100_spill] sm:$0xff] }
 0x5df   : > { %2244 = vrot.lane.b32.xlu1 %v2149_v29, %s3845_s22  ;;  %v1262_v29 = vsel %vm347_vm0, %v7293_v39, %v5099_v35  ;;  %v1081_v58 = vmul.f32 %v3750_v12, %v7295_v61  ;;  %v7298_v35 = vld [vmem:[#allocation22_spill] sm:$0xff]  ;;  %v1833_v39 = vadd.f32 %v5867_v13, %v1585_v15  ;;  %s3774_s22 = scalar_lea.vmem %s3773_s20, 768 }
 0x5e0   : > { %v5918_v31 = vpop.permute.xlu0 %2704  ;;  %v1265_v3 = vsel %vm347_vm0, %v7298_v35, %v7297_v30 }
 0x5e1   : > { %7290 = vst [vmem:[#allocation153_spill] sm:$0xff] %v5918_v31  ;;  %v5922_v50 = vpop.permute.xlu1 %1736  ;;  %v3749_v31 = vld [vmem:[#allocation2] sm:$0xff]  ;;  %v1329_v62 = vadd.f32 %v5716_v52, %v1081_v58  ;;  %v2041_v12 = vadd.f32 %v5877_v32, %v1833_v39  ;;  %v7303_v39 = vld [vmem:[#allocation73_spill] sm:$0xff] }
 0x5e2   : > { %7292 = vst [vmem:[#allocation154_spill] sm:$0xff] %v5922_v50  ;;  %2736 = vrot.lane.b32.xlu0 %v2643_v6, %s3847_s24  ;;  %v1070_v33 = vmul.f32 %v3749_v31, %v7197_v55 }
 0x5e3   : > { %2480 = vrot.lane.b32.xlu1 %v2391_v56, %s3846_s23  ;;  %v2394_v56 = vmul.f32 %v7274_v46, %v5828_v63  ;;  %v2641_v63 = vmul.f32 %v7284_v42, %v5793_v20 }
 0x5e4   : > { %v5932_v16 = vpop.permute.xlu0 %2932  ;;  %v1318_v53 = vadd.f32 %v1262_v29, %v1070_v33  ;;  %v2396_v33 = vmul.f32 %v7274_v46, %v5840_v0  ;;  %v7300_v29 = vld [vmem:[#allocation37_spill] sm:$0xff] }
 0x5e5   : > { %7294 = vst [vmem:[#allocation21_spill] sm:$0xff] %v5932_v16  ;;  %v5938_v6 = vpop.permute.xlu1 %1756  ;;  %v3751_v16 = vld [vmem:[#allocation2 + $0x28] sm:$0xff]  ;;  %v1510_v58 = vsel %vm379_vm1, %v7300_v29, %v5095_v19  ;;  %v7306_v29 = vld [vmem:[#allocation52_spill] sm:$0xff] }
 0x5e6   : > { %7296 = vst [vmem:[#allocation10_spill] sm:$0xff] %v5938_v6  ;;  %2964 = vrot.lane.b32.xlu0 %v2881_v48, %s3848_s25  ;;  %v1074_v31 = vmul.f32 %v3751_v16, %v4989_v1  ;;  %v7301_v16 = vld [vmem:[#allocation51_spill] sm:$0xff]  ;;  %v1566_v35 = vadd.f32 %v1510_v58, %v1318_v53 }
 0x5e7   : > { %2486 = vrot.lane.b32.xlu1 %v2394_v56, %s3846_s23  ;;  %v1758_v48 = vsel %vm411_vm2, %v7301_v16, %v5119_v14  ;;  %v1761_v14 = vsel %vm411_vm2, %v7306_v29, %v5249_v45  ;;  %v1279_v45 = vsel %vm347_vm0, %v5853_v21, %v5789_v34  ;;  %v3753_v29 = vld [vmem:[#allocation2 + $0x108] sm:$0xff] }
 0x5e8   : > { %v2221_v6 = vpop.permute.xlu0 %2220  ;;  %v1322_v40 = vadd.f32 %v1265_v3, %v1074_v31  ;;  %v1577_v3 = vadd.f32 %v5626_v10, %v1329_v62  ;;  %v7304_v31 = vld [vmem:[#allocation97_spill] sm:$0xff]  ;;  %v7308_v62 = vld [vmem:[#allocation74_spill] sm:$0xff]  ;;  %v1814_v58 = vadd.f32 %v1758_v48, %v1566_v35 }
 0x5e9   : > { %v5953_v30 = vpop.permute.xlu1 %2222  ;;  %v2260_v15 = vsel %vm474_vm4, %v5797_v24, %v2221_v6  ;;  %v1092_v6 = vmul.f32 %v5773_v60, %v7303_v39  ;;  %v7305_v24 = vld [vmem:[#allocation38_spill] sm:$0xff]  ;;  %v2886_v53 = vmul.f32 %v7308_v62, %v5694_v59  ;;  %v7310_v59 = vld [vmem:[#allocation91_spill] sm:$0xff] }
 0x5ea   : > { %7299 = vst [vmem:[#allocation100_spill] sm:$0xff] %v5953_v30  ;;  %v5965_v56 = vadd.f32 %v2260_v15, %v2041_v12  ;;  %2732 = vrot.lane.b32.xlu0 %v2641_v63, %s3847_s24  ;;  %v1513_v19 = vsel %vm379_vm1, %v7305_v24, %v7304_v31  ;;  %v3752_v12 = vld [vmem:[#allocation2 + $0xd0] sm:$0xff]  ;;  %v2637_v24 = vmul.f32 %v7262_v17, %v5722_v22 }
 0x5eb   : > { %2490 = vrot.lane.b32.xlu1 %v2396_v33, %s3846_s23  ;;  %v1091_v15 = vmul.f32 %v3752_v12, %v7303_v39  ;;  %v1570_v60 = vadd.f32 %v1513_v19, %v1322_v40  ;;  %v1825_v33 = vadd.f32 %v5739_v23, %v1577_v3  ;;  %v1278_v31 = vsel %vm347_vm0, %v5897_v36, %v5853_v21  ;;  %v7309_v12 = vld [vmem:[#allocation12_spill] sm:$0xff] }
 0x5ec   : > { %7302 = vst [vmem:[#allocation22_spill] sm:$0xff] %v5965_v56  ;;  %v5979_v63 = vpop.permute.xlu0 %2462  ;;  %v1097_v56 = vmul.f32 %v3753_v29, %v7309_v12  ;;  %v2022_v48 = vadd.f32 %v5139_v8, %v1814_v58  ;;  %v3754_v3 = vld [vmem:[#allocation2 + $0x100] sm:$0xff]  ;;  %v2879_v29 = vmul.f32 %v7278_v18, %v5486_v5  ;;  %v2888_v36 = vmul.f32 %v7308_v62, %v5708_v41 }
 0x5ed   : > { %7307 = vst [vmem:[#allocation37_spill] sm:$0xff] %v5979_v63  ;;  %v1253_v16 = vpop.permute.xlu1 %1252  ;;  %v1818_v35 = vadd.f32 %v1761_v14, %v1570_v60  ;;  %v2033_v17 = vadd.f32 %v5751_v4, %v1825_v33  ;;  %v1096_v19 = vmul.f32 %v3754_v3, %v7309_v12  ;;  %v2882_v8 = vmul.f32 %v7280_v43, %v5588_v54  ;;  %v7311_v3 = vld [vmem:[#allocation80_spill] sm:$0xff]  ;;  %v7312_v54 = vld [vmem:[#allocation69_spill] sm:$0xff] }
 0x5ee   : > { %v1282_v40 = vsel %vm347_vm0, %v7310_v59, %v1253_v16  ;;  %2974 = vrot.lane.b32.xlu0 %v2886_v53, %s3848_s25  ;;  %v1345_v63 = vadd.f32 %v1253_v16, %v1097_v56  ;;  %v2302_v14 = vadd.f32 %v7208_v37, %v2022_v48  ;;  %v1340_v53 = vadd.f32 %v1279_v45, %v1092_v6 }
 0x5ef   : > { %2724 = vrot.lane.b32.xlu1 %v2637_v24, %s3847_s24  ;;  %v1339_v58 = vadd.f32 %v1278_v31, %v1091_v15  ;;  %v1344_v60 = vadd.f32 %v1282_v40, %v1096_v19  ;;  %v2254_v56 = vsel %vm474_vm4, %v5646_v9, %v7311_v3  ;;  %v2891_v41 = vmul.f32 %v7312_v54, %v5719_v28  ;;  %v7313_v24 = vld [vmem:[#allocation93_spill] sm:$0xff]  ;;  %v3755_v3 = vld [vmem:[#allocation2 + $0x18] sm:$0xff] }
 0x5f0   : > { %v6000_v21 = vpop.permute.xlu0 %2466  ;;  %v2026_v37 = vadd.f32 %v5225_v49, %v1818_v35  ;;  %v2313_v18 = vadd.f32 %v2254_v56, %v2033_v17  ;;  %v1530_v45 = vsel %vm379_vm1, %v7313_v24, %v5863_v2  ;;  %v1775_v31 = vsel %vm411_vm2, %v5873_v11, %v5811_v25 }
 0x5f1   : > { %v1491_v33 = vpop.permute.xlu1 %1490  ;;  %v1593_v28 = vadd.f32 %v5863_v2, %v1345_v63  ;;  %v2550_v40 = vadd.f32 %v7210_v57, %v2302_v14  ;;  %v1592_v35 = vadd.f32 %v1530_v45, %v1344_v60  ;;  %v7315_v2 = vld [vmem:[#allocation82_spill] sm:$0xff]  ;;  %v3756_v60 = vld [vmem:[#allocation2 + $0x40] sm:$0xff] }
 0x5f2   : > { %v1526_v16 = vsel %vm379_vm1, %v5807_v27, %v1491_v33  ;;  %v1527_v5 = vsel %vm379_vm1, %v1491_v33, %v5712_v51  ;;  %2978 = vrot.lane.b32.xlu0 %v2888_v36, %s3848_s25  ;;  %v1774_v36 = vsel %vm411_vm2, %v5922_v50, %v5873_v11  ;;  %v1073_v11 = vmul.f32 %v3755_v3, %v7197_v55  ;;  %v7347_v50 = vld [vmem:[#allocation36_spill] sm:$0xff] }
 0x5f3   : > { %v1587_v6 = vadd.f32 %v1526_v16, %v1339_v58  ;;  %v1588_v15 = vadd.f32 %v1527_v5, %v1340_v53  ;;  %2960 = vrot.lane.b32.xlu1 %v2879_v29, %s3848_s25  ;;  %v2306_v29 = vadd.f32 %v5269_v7, %v2026_v37  ;;  %v7314_v53 = vld [vmem:[#allocation32_spill] sm:$0xff]  ;;  %v2502_v63 = vsel %vm506_vm5, %v5670_v44, %v7315_v2  ;;  %v7325_v2 = vld [vmem:[#allocation70_spill] sm:$0xff] }
 0x5f4   : > { %v6031_v49 = vpop.permute.xlu0 %2472  ;;  %v1077_v7 = vmul.f32 %v3756_v60, %v4989_v1  ;;  %v2561_v56 = vadd.f32 %v2502_v63, %v2313_v18  ;;  %v2889_v5 = vmul.f32 %v7308_v62, %v5793_v20  ;;  %v1321_v55 = vadd.f32 %v5504_v47, %v1073_v11  ;;  %v7320_v18 = vld [vmem:[#allocation29_spill] sm:$0xff]  ;;  %v3757_v47 = vld [vmem:[#allocation2 + $0x50] sm:$0xff]  ;;  %v7324_v11 = vld [vmem:[#allocation63_spill] sm:$0xff] }
 0x5f5   : > { %v1749_v48 = vpop.permute.xlu1 %1748  ;;  %v1835_v17 = vadd.f32 %v1774_v36, %v1587_v6  ;;  %v1836_v19 = vadd.f32 %v1775_v31, %v1588_v15  ;;  %v2554_v14 = vadd.f32 %v5279_v26, %v2306_v29  ;;  %v7316_v6 = vld [vmem:[#allocation150_spill] sm:$0xff]  ;;  %v7318_v26 = vld [vmem:[#allocation33_spill] sm:$0xff]  ;;  %v2262_v63 = vsel %vm474_vm4, %v7325_v2, %v7324_v11 }
 0x5f6   : > { %v1778_v58 = vsel %vm411_vm2, %v7314_v53, %v1749_v48  ;;  %v1841_v33 = vadd.f32 %v1749_v48, %v1593_v28  ;;  %2984 = vrot.lane.b32.xlu0 %v2891_v41, %s3848_s25  ;;  %v2798_v41 = vadd.f32 %v7216_v38, %v2550_v40  ;;  %v7319_v36 = vld [vmem:[#allocation145_spill] sm:$0xff]  ;;  %v1078_v38 = vmul.f32 %v3757_v47, %v7295_v61 }
 0x5f7   : > { %v1840_v57 = vadd.f32 %v1778_v58, %v1592_v35  ;;  %2966 = vrot.lane.b32.xlu1 %v2882_v8, %s3848_s25  ;;  %v7317_v8 = vld [vmem:[#allocation136_spill] sm:$0xff]  ;;  %v2802_v31 = vadd.f32 %v7318_v26, %v2554_v14  ;;  %v7323_v58 = vld [vmem:[#allocation49_spill] sm:$0xff]  ;;  %v2261_v14 = vsel %vm474_vm4, %v5953_v30, %v7325_v2 }
 0x5f8   : > { %v2701_v16 = vpop.permute.xlu0 %2700  ;;  %v2884_v45 = vmul.f32 %v7317_v8, %v7280_v43  ;;  %v7322_v35 = vld [vmem:[#allocation60_spill] sm:$0xff]  ;;  %v1325_v3 = vadd.f32 %v7323_v58, %v1077_v7  ;;  %v7329_v7 = vld [vmem:[#allocation89_spill] sm:$0xff]  ;;  %v7336_v58 = vld [vmem:[#allocation86_spill] sm:$0xff] }
 0x5f9   : > { %v1959_v37 = vpop.permute.xlu1 %1958  ;;  %v2750_v15 = vsel %vm538_vm6, %v7316_v6, %v2701_v16  ;;  %v3050_v29 = vadd.f32 %v7322_v35, %v2802_v31  ;;  %v7330_v26 = vld [vmem:[#allocation108_spill] sm:$0xff]  ;;  %v7331_v31 = vld [vmem:[#allocation23_spill] sm:$0xff] }
 0x5fa   : > { %v1984_v1 = vsel %vm439_vm3, %v7319_v36, %v1959_v37  ;;  %v1985_v28 = vsel %vm439_vm3, %v1959_v37, %v7320_v18  ;;  %v6058_v20 = vadd.f32 %v2750_v15, %v2561_v56  ;;  %2980 = vrot.lane.b32.xlu0 %v2889_v5, %s3848_s25  ;;  %v7327_v56 = vld [vmem:[#allocation112_spill] sm:$0xff] }
 0x5fb   : > { %v2043_v40 = vadd.f32 %v1984_v1, %v1835_v17  ;;  %v2044_v48 = vadd.f32 %v1985_v28, %v1836_v19  ;;  %2970 = vrot.lane.b32.xlu1 %v2884_v45, %s3848_s25  ;;  %v1569_v16 = vadd.f32 %v7327_v56, %v1321_v55  ;;  %v7328_v19 = vld [vmem:[#allocation151_spill] sm:$0xff]  ;;  %v3046_v45 = vadd.f32 %v7329_v7, %v2798_v41  ;;  %v3760_v7 = vld [vmem:[#allocation2 + $0x120] sm:$0xff] }
 0x5fc   : > { %7321 = vst [vmem:[#allocation51_spill] sm:$0xff] %v6058_v20  ;;  %v6071_v60 = vpop.permute.xlu0 %2942  ;;  %v2397_v5 = vmul.f32 %v7274_v46, %v7328_v19  ;;  %v1268_v1 = vsel %vm347_vm0, %v7331_v31, %v7330_v26  ;;  %v7332_v28 = vld [vmem:[#allocation95_spill] sm:$0xff]  ;;  %v7338_v46 = vld [vmem:[#allocation126_spill] sm:$0xff]  ;;  %v6101_v56 = vmul.f32 %v7312_v54, %v7328_v19  ;;  %v7358_v20 = vld [vmem:[#allocation53_spill] sm:$0xff] }
 0x5fd   : > { %7326 = vst [vmem:[#allocation97_spill] sm:$0xff] %v6071_v60  ;;  %v1967_v17 = vpop.permute.xlu1 %1966  ;;  %v6076_v37 = vadd.f32 %v2261_v14, %v2043_v40  ;;  %v6078_v15 = vadd.f32 %v2262_v63, %v2044_v48  ;;  %v7335_v55 = vld [vmem:[#allocation67_spill] sm:$0xff]  ;;  %v1817_v40 = vadd.f32 %v7338_v46, %v1569_v16  ;;  %v3666_v16 = vpack.i.bf16 %v3050_v29, %v3046_v45  ;;  %v7368_v60 = vld [vmem:[#allocation133_spill] sm:$0xff] }
 0x5fe   : > { %v1987_v47 = vsel %vm439_vm3, %v7332_v28, %v1967_v17  ;;  %v6086_v35 = vadd.f32 %v1967_v17, %v1841_v33  ;;  %v7337_v2 = vpack.i.bf16 %v7335_v55, %v7336_v58  ;;  %v3758_v48 = vld [vmem:[#allocation2 + $0x78] sm:$0xff]  ;;  %v7343_v58 = vld [vmem:[#allocation17_spill] sm:$0xff] }
 0x5ff   : > { %v7339_v63 = vld [vmem:[#allocation71_spill] sm:$0xff]  ;;  %v6096_v41 = vadd.f32 %v1987_v47, %v1840_v57  ;;  %2492 = vrot.lane.b32.xlu1 %v2397_v5, %s3846_s23  ;;  %v1326_v57 = vadd.f32 %v1268_v1, %v1078_v38 }
 0x600   : > { %7333 = vst [vmem:[#allocation38_spill] sm:$0xff] %v6086_v35  ;;  %3657 = vrot.lane.b32.xlu0 %v7337_v2, %s7334_s18  ;;  %v6094_v14 = vmul.f32 %v3758_v48, %v7339_v63  ;;  %v3759_v33 = vld [vmem:[#allocation2 + $0xf8] sm:$0xff]  ;;  %v1573_v2 = vadd.f32 %v7343_v58, %v1325_v3  ;;  %v6110_v46 = vpop.permute.xlu0 %2946  ;;  %v7346_v48 = vld [vmem:[#allocation6_spill] sm:$0xff]  ;;  %v7350_v3 = vld [vmem:[#allocation128_spill] sm:$0xff] }
 0x601   : > { %7340 = vst [vmem:[#allocation52_spill] sm:$0xff] %v6096_v41  ;;  %v6104_v17 = vmul.f32 %v3759_v33, %v7309_v12  ;;  %v7341_v31 = vld [vmem:[#allocation75_spill] sm:$0xff]  ;;  %7344 = vst [vmem:[#allocation91_spill] sm:$0xff] %v6110_v46  ;;  %v2025_v30 = vadd.f32 %v7346_v48, %v1817_v40  ;;  %v6115_v36 = vpop.permute.xlu1 %2696  ;;  %v2639_v33 = vmul.f32 %v7284_v42, %v7347_v50  ;;  %v7348_v12 = vld [vmem:[#allocation110_spill] sm:$0xff] }
 0x602   : > { %v6107_v55 = vmul.f32 %v3760_v7, %v7341_v31  ;;  %v7345_v5 = vld [vmem:[#allocation7_spill] sm:$0xff]  ;;  %v1821_v27 = vadd.f32 %v7348_v12, %v1573_v2  ;;  %v7349_v7 = vld [vmem:[#allocation129_spill] sm:$0xff]  ;;  %v6126_v45 = vmul.f32 %v7350_v3, %v7339_v63  ;;  %v7352_v40 = vld [vmem:[#allocation50_spill] sm:$0xff] }
 0x603   : > { %v1079_v47 = vmul.f32 %v7345_v5, %v7295_v61  ;;  %v6122_v29 = vmul.f32 %v7349_v7, %v7339_v63  ;;  %v7351_v38 = vld [vmem:[#allocation131_spill] sm:$0xff]  ;;  %v6135_v58 = vmul.f32 %v7352_v40, %v7295_v61  ;;  %v7354_v12 = vld [vmem:[#allocation134_spill] sm:$0xff]  ;;  %v1093_v5 = vmul.f32 %v7317_v8, %v7303_v39  ;;  %2728 = vrot.lane.b32.xlu1 %v2639_v33, %s3847_s24  ;;  %v7359_v40 = vld [vmem:[#allocation77_spill] sm:$0xff] }
 0x604   : > { %7342 = vst [vmem:[#allocation74_spill] sm:$0xff] %v6107_v55  ;;  %v6130_v1 = vmul.f32 %v7351_v38, %v7339_v63  ;;  %3667 = vrot.lane.b32.xlu0 %v3666_v16, %s7334_s18  ;;  %v7353_v42 = vld [vmem:[#allocation11_spill] sm:$0xff]  ;;  %v3761_v48 = vld [vmem:[#allocation2 + $0xb0] sm:$0xff]  ;;  %v7360_v41 = vld [vmem:[#allocation117_spill] sm:$0xff]  ;;  %v6152_v28 = vpop.permute.xlu0 %2952 }
 0x605   : > { %v1087_v2 = vmul.f32 %v7354_v12, %v7353_v42  ;;  %v1088_v7 = vmul.f32 %v3761_v48, %v7353_v42  ;;  %v7355_v3 = vld [vmem:[#allocation106_spill] sm:$0xff]  ;;  %v7356_v63 = vld [vmem:[#allocation39_spill] sm:$0xff]  ;;  %v2248_v12 = vsel %vm474_vm4, %v7360_v41, %v7359_v40  ;;  %7361 = vst [vmem:[#allocation80_spill] sm:$0xff] %v6152_v28  ;;  %v7362_v8 = vld [vmem:[#allocation144_spill] sm:$0xff]  ;;  %v2885_v28 = vmul.f32 %v7280_v43, %v5722_v22 }
 0x606   : > { %v1516_v38 = vsel %vm379_vm1, %v7356_v63, %v7355_v3  ;;  %v7357_v16 = vld [vmem:[#allocation111_spill] sm:$0xff]  ;;  %v7363_v39 = vld [vmem:[#allocation72_spill] sm:$0xff]  ;;  %v7365_v33 = vld [vmem:[#allocation114_spill] sm:$0xff]  ;;  %v2305_v31 = vadd.f32 %v2248_v12, %v2025_v30  ;;  %v6159_v63 = vpop.permute.xlu1 %2702 }
 0x607   : > { %v1764_v61 = vsel %vm411_vm2, %v7358_v20, %v7357_v16  ;;  %v2642_v55 = vmul.f32 %v7363_v39, %v7362_v8  ;;  %v1574_v48 = vadd.f32 %v1516_v38, %v1326_v57  ;;  %v7364_v42 = vld [vmem:[#allocation76_spill] sm:$0xff]  ;;  %7366 = vst [vmem:[#allocation69_spill] sm:$0xff] %v6159_v63  ;;  %v2644_v20 = vmul.f32 %v7363_v39, %v5840_v0  ;;  %v7367_v35 = vld [vmem:[#allocation107_spill] sm:$0xff]  ;;  %v7369_v41 = vld [vmem:[#allocation30_spill] sm:$0xff] }
 0x608   : > { %v2251_v53 = vsel %vm474_vm4, %v7365_v33, %v7364_v42  ;;  %v2029_v46 = vadd.f32 %v7367_v35, %v1821_v27  ;;  %v1275_v40 = vsel %vm347_vm0, %v7369_v41, %v7368_v60  ;;  %v2645_v57 = vmul.f32 %v7363_v39, %v7328_v19  ;;  %v7370_v42 = vld [vmem:[#allocation78_spill] sm:$0xff]  ;;  %v7371_v30 = vld [vmem:[#allocation116_spill] sm:$0xff]  ;;  %v7373_v41 = vld [vmem:[#allocation31_spill] sm:$0xff] }
 0x609   : > { %v1822_v38 = vadd.f32 %v1764_v61, %v1574_v48  ;;  %v2499_v12 = vsel %vm506_vm5, %v7371_v30, %v7370_v42  ;;  %v1341_v33 = vadd.f32 %v5789_v34, %v1093_v5  ;;  %2734 = vrot.lane.b32.xlu1 %v2642_v55, %s3847_s24  ;;  %v6178_v27 = vmul.f32 %v7308_v62, %v7347_v50  ;;  %v7372_v35 = vld [vmem:[#allocation46_spill] sm:$0xff]  ;;  %v7374_v39 = vld [vmem:[#allocation119_spill] sm:$0xff]  ;;  %v6189_v34 = vpop.permute.xlu0 %2230 }
 0x60a   : > { %v1269_v22 = vsel %vm347_vm0, %v7330_v26, %v7372_v35  ;;  %v2309_v43 = vadd.f32 %v2251_v53, %v2029_v46  ;;  %v2496_v19 = vsel %vm506_vm5, %v7374_v39, %v7373_v41  ;;  %v7375_v61 = vld [vmem:[#allocation14_spill] sm:$0xff]  ;;  %v7377_v55 = vld [vmem:[#allocation15_spill] sm:$0xff]  ;;  %v1335_v62 = vadd.f32 %v1275_v40, %v1087_v2  ;;  %v6194_v63 = vpop.permute.xlu1 %2706  ;;  %v7379_v26 = vld [vmem:[#allocation85_spill] sm:$0xff] }
 0x60b   : > { %v7376_v48 = vld [vmem:[#allocation130_spill] sm:$0xff]  ;;  %v2553_v30 = vadd.f32 %v2496_v19, %v2305_v31  ;;  %v6198_v53 = vmul.f32 %v7312_v54, %v7362_v8  ;;  %v6203_v46 = vsel %vm347_vm0, %v7379_v26, %v7310_v59  ;;  %v7380_v39 = vld [vmem:[#allocation147_spill] sm:$0xff]  ;;  %v6210_v2 = vmul.f32 %v7312_v54, %v5840_v0  ;;  %v7381_v40 = vld [vmem:[#allocation113_spill] sm:$0xff] }
 0x60c   : > { %v1523_v42 = vsel %vm379_vm1, %v7376_v48, %v7375_v61  ;;  %v7378_v5 = vld [vmem:[#allocation118_spill] sm:$0xff]  ;;  %v2557_v41 = vadd.f32 %v2499_v12, %v2309_v43  ;;  %v1276_v48 = vsel %vm347_vm0, %v7368_v60, %v7380_v39  ;;  %v1327_v31 = vadd.f32 %v1269_v22, %v1079_v47  ;;  %v7383_v12 = vld [vmem:[#allocation123_spill] sm:$0xff]  ;;  %v7384_v26 = vld [vmem:[#allocation65_spill] sm:$0xff] }
 0x60d   : > { %v2747_v50 = vsel %vm538_vm6, %v7378_v5, %v7377_v55  ;;  %v6213_v19 = vadd.f32 %v7381_v40, %v1822_v38  ;;  %v1589_v8 = vadd.f32 %v5712_v51, %v1341_v33  ;;  %v1583_v55 = vadd.f32 %v1523_v42, %v1335_v62  ;;  %2738 = vrot.lane.b32.xlu1 %v2644_v20, %s3847_s24  ;;  %v7382_v5 = vld [vmem:[#allocation81_spill] sm:$0xff]  ;;  %v6226_v38 = vpop.permute.xlu0 %2234  ;;  %v7387_v22 = vld [vmem:[#allocation124_spill] sm:$0xff]  ;;  %v7388_v62 = vld [vmem:[#allocation55_spill] sm:$0xff] }
 0x60e   : > { %v2805_v59 = vadd.f32 %v2747_v50, %v2557_v41  ;;  %v2744_v43 = vsel %vm538_vm6, %v7383_v12, %v7382_v5  ;;  %v1524_v60 = vsel %vm379_vm1, %v7375_v61, %v7384_v26  ;;  %v7385_v0 = vld [vmem:[#allocation21_spill] sm:$0xff]  ;;  %v1517_v51 = vsel %vm379_vm1, %v7355_v3, %v7387_v22  ;;  %v2941_v50 = vpop.permute.xlu1 %2940  ;;  %v7390_v26 = vld [vmem:[#allocation140_spill] sm:$0xff] }
 0x60f   : > { %v7386_v54 = vld [vmem:[#allocation9_spill] sm:$0xff]  ;;  %v1837_v20 = vadd.f32 %v5811_v25, %v1589_v8  ;;  %v1336_v33 = vadd.f32 %v1276_v48, %v1088_v7  ;;  %v2801_v42 = vadd.f32 %v2744_v43, %v2553_v30  ;;  %v1765_v41 = vsel %vm411_vm2, %v7357_v16, %v7388_v62  ;;  %v7391_v12 = vld [vmem:[#allocation120_spill] sm:$0xff] }
 0x610   : > { %v2992_v47 = vsel %vm570_vm7, %v7386_v54, %v7385_v0  ;;  %v7389_v61 = vld [vmem:[#allocation137_spill] sm:$0xff]  ;;  %v2995_v3 = vsel %vm570_vm7, %v7391_v12, %v2941_v50  ;;  %v1575_v16 = vadd.f32 %v1517_v51, %v1327_v31  ;;  %v7392_v30 = vld [vmem:[#allocation16_spill] sm:$0xff]  ;;  %v7394_v54 = vld [vmem:[#allocation138_spill] sm:$0xff] }
 0x611   : > { %v1771_v39 = vsel %vm411_vm2, %v7390_v26, %v7389_v61  ;;  %v1772_v5 = vsel %vm411_vm2, %v7389_v61, %v5867_v13  ;;  %v1584_v0 = vadd.f32 %v1524_v60, %v1336_v33  ;;  %v6243_v7 = vadd.f32 %v2992_v47, %v2801_v42  ;;  %2972 = vrot.lane.b32.xlu1 %v2885_v28, %s3848_s25  ;;  %v7393_v8 = vld [vmem:[#allocation24_spill] sm:$0xff]  ;;  %v7396_v42 = vld [vmem:[#allocation143_spill] sm:$0xff] }
 0x612   : > { %v1831_v25 = vadd.f32 %v1771_v39, %v1583_v55  ;;  %v6245_v48 = vadd.f32 %v2995_v3, %v2805_v59  ;;  %v1271_v43 = vsel %vm347_vm0, %v7393_v8, %v7392_v30  ;;  %v1270_v13 = vsel %vm347_vm0, %v7372_v35, %v5716_v52  ;;  %v6257_v55 = vpop.permute.xlu0 %2240  ;;  %v7395_v59 = vld [vmem:[#allocation87_spill] sm:$0xff]  ;;  %v2229_v31 = vpop.permute.xlu1 %2228  ;;  %v7397_v35 = vld [vmem:[#allocation148_spill] sm:$0xff] }
 0x613   : > { %v1983_v60 = vsel %vm439_vm3, %v7394_v54, %v5877_v32  ;;  %v1333_v47 = vadd.f32 %v7395_v59, %v6130_v1  ;;  %v1832_v33 = vadd.f32 %v1772_v5, %v1584_v0  ;;  %v2045_v51 = vadd.f32 %v7320_v18, %v1837_v20  ;;  %v7398_v50 = vld [vmem:[#allocation132_spill] sm:$0xff]  ;;  %v7399_v61 = vld [vmem:[#allocation139_spill] sm:$0xff] }
 0x614   : > { %v1982_v52 = vsel %vm439_vm3, %v7396_v42, %v7394_v54  ;;  %v2258_v32 = vsel %vm474_vm4, %v7398_v50, %v7397_v35  ;;  %v2259_v39 = vsel %vm474_vm4, %v7397_v35, %v7399_v61  ;;  %v2263_v1 = vsel %vm474_vm4, %v7324_v11, %v2229_v31  ;;  %v7400_v20 = vld [vmem:[#allocation115_spill] sm:$0xff]  ;;  %v7401_v28 = vld [vmem:[#allocation48_spill] sm:$0xff] }
 0x615   : > { %v1328_v5 = vadd.f32 %v1270_v13, %v6135_v58  ;;  %v2040_v12 = vadd.f32 %v1983_v60, %v1832_v33  ;;  %v2039_v3 = vadd.f32 %v1982_v52, %v1831_v25  ;;  %v6276_v18 = vadd.f32 %v2263_v1, %v2045_v51  ;;  %2740 = vrot.lane.b32.xlu1 %v2645_v57, %s3847_s24  ;;  %v7408_v1 = vld [vmem:[#allocation18_spill] sm:$0xff]  ;;  %s297_s24 = sand.u32 1, %s3822_s28  }
 0x616   : > { %v1978_v0 = vsel %vm439_vm3, %v7381_v40, %v7400_v20  ;;  %v1823_v8 = vadd.f32 %v1765_v41, %v1575_v16  ;;  %v1330_v54 = vadd.f32 %v1271_v43, %v6094_v14  ;;  %v1272_v35 = vsel %vm347_vm0, %v7392_v30, %v7401_v28  ;;  %v2469_v11 = vpop.permute.xlu0 %2468  ;;  %v2465_v60 = vpop.permute.xlu1 %2464  ;;  %v7402_v14 = vld [vmem:[#allocation37_spill] sm:$0xff]  ;;  %v7403_v30 = vld [vmem:[#allocation22_spill] sm:$0xff]  ;;  %s3378_s9 = scalar_lea.sflag [#allocation4], %s297_s24 }
 0x617   : > { %v1518_v58 = vsel %vm379_vm1, %v7387_v22, %v5626_v10  ;;  %v2319_v25 = vadd.f32 %v2258_v32, %v2039_v3  ;;  %v2320_v13 = vadd.f32 %v2259_v39, %v2040_v12  ;;  %v2508_v57 = vsel %vm506_vm5, %v6000_v21, %v2469_v11  ;;  %v7404_v10 = vld [vmem:[#allocation20_spill] sm:$0xff]  ;;  %v7407_v39 = vld [vmem:[#allocation94_spill] sm:$0xff] }
 0x618   : > { %v1766_v40 = vsel %vm411_vm2, %v7388_v62, %v5739_v23  ;;  %v2506_v41 = vsel %vm506_vm5, %v7402_v14, %v2465_v60  ;;  %v2507_v16 = vsel %vm506_vm5, %v2465_v60, %v6000_v21  ;;  %v6299_v43 = vadd.f32 %v2508_v57, %v7403_v30  ;;  %v7405_v23 = vld [vmem:[#allocation125_spill] sm:$0xff]  ;;  %v7406_v62 = vld [vmem:[#allocation40_spill] sm:$0xff] }
 0x619   : > { %v1581_v22 = vadd.f32 %v7404_v10, %v1333_v47  ;;  %v1576_v33 = vadd.f32 %v1518_v58, %v1328_v5  ;;  %v6302_v31 = vadd.f32 %v2506_v41, %v2319_v25  ;;  %v6304_v51 = vadd.f32 %v2507_v16, %v2320_v13  ;;  %2976 = vrot.lane.b32.xlu1 %v6178_v27, %s3848_s25  ;;  %v7409_v27 = vld [vmem:[#allocation19_spill] sm:$0xff]  ;;  %v7410_v3 = vld [vmem:[#allocation8_spill] sm:$0xff]  ;;  %v7412_v58 = vld [vmem:[#allocation54_spill] sm:$0xff] }
 0x61a   : > { %v1519_v52 = vsel %vm379_vm1, %v7406_v62, %v7405_v23  ;;  %v2031_v32 = vadd.f32 %v1978_v0, %v1823_v8  ;;  %v1273_v21 = vsel %vm347_vm0, %v7401_v28, %v7395_v59  ;;  %v1979_v47 = vsel %vm439_vm3, %v7400_v20, %v5751_v4  ;;  %v6317_v61 = vpop.permute.xlu0 %2710  ;;  %v6326_v11 = vpop.permute.xlu1 %2470  ;;  %v7411_v28 = vld [vmem:[#allocation13_spill] sm:$0xff]  ;;  %v7413_v41 = vld [vmem:[#allocation79_spill] sm:$0xff]  ;;  %v7414_v16 = vld [vmem:[#allocation68_spill] sm:$0xff] }
 0x61b   : > { %v2252_v5 = vsel %vm474_vm4, %v7408_v1, %v7407_v39  ;;  %v1829_v12 = vadd.f32 %v7409_v27, %v1581_v22  ;;  %v1520_v0 = vsel %vm379_vm1, %v7405_v23, %v7410_v3  ;;  %v1824_v8 = vadd.f32 %v1766_v40, %v1576_v33 }
 0x61c   : > { %v1331_v59 = vadd.f32 %v1272_v35, %v6122_v29  ;;  %v1767_v4 = vsel %vm411_vm2, %v7412_v58, %v7411_v28  ;;  %v1521_v20 = vsel %vm379_vm1, %v7410_v3, %v7404_v10  ;;  %v2509_v25 = vsel %vm506_vm5, %v6326_v11, %v6031_v49 }
 0x61d   : > { %v1332_v13 = vadd.f32 %v1273_v21, %v6126_v45  ;;  %v1578_v60 = vadd.f32 %v1519_v52, %v1330_v54  ;;  %v2032_v57 = vadd.f32 %v1979_v47, %v1824_v8  ;;  %v6340_v40 = vadd.f32 %v2509_v25, %v6076_v37  ;;  %2982 = vrot.lane.b32.xlu1 %v6198_v53, %s3848_s25  ;;  %v7415_v37 = vld [vmem:[#allocation92_spill] sm:$0xff]  ;;  %v7416_v53 = vld [vmem:[#allocation99_spill] sm:$0xff]  ;;  %v7418_v52 = vld [vmem:[#allocation62_spill] sm:$0xff] }
 0x61e   : > { %v1343_v29 = vadd.f32 %v6203_v46, %v6104_v17  ;;  %v2310_v35 = vadd.f32 %v7408_v1, %v6213_v19  ;;  %v2257_v30 = vsel %vm474_vm4, %v7414_v16, %v7413_v41  ;;  %v1579_v10 = vadd.f32 %v1520_v0, %v1331_v59  ;;  %v6351_v45 = vpop.permute.xlu0 %2714  ;;  %v6354_v62 = vpop.permute.xlu1 %2474  ;;  %v7417_v19 = vld [vmem:[#allocation83_spill] sm:$0xff] }
 0x61f   : > { %v2311_v54 = vadd.f32 %v2252_v5, %v2031_v32  ;;  %v1826_v22 = vadd.f32 %v1767_v4, %v1578_v60  ;;  %v2037_v33 = vadd.f32 %v7415_v37, %v1829_v12  ;;  %v1580_v23 = vadd.f32 %v1521_v20, %v1332_v13  ;;  %v7419_v5 = vld [vmem:[#allocation135_spill] sm:$0xff]  ;;  %v7420_v12 = vld [vmem:[#allocation64_spill] sm:$0xff]  ;;  %v7423_v60 = vld [vmem:[#allocation149_spill] sm:$0xff] }
 0x620   : > { %v1768_v17 = vsel %vm411_vm2, %v7411_v28, %v7416_v53  ;;  %v2253_v46 = vsel %vm474_vm4, %v7407_v39, %v5646_v9  ;;  %v2505_v21 = vsel %vm506_vm5, %v7418_v52, %v7417_v19  ;;  %v2510_v32 = vsel %vm506_vm5, %v6031_v49, %v6354_v62  ;;  %v7421_v9 = vld [vmem:[#allocation96_spill] sm:$0xff]  ;;  %v7422_v39 = vld [vmem:[#allocation109_spill] sm:$0xff] }
 0x621   : > { %v2317_v47 = vadd.f32 %v2257_v30, %v2037_v33  ;;  %v2312_v1 = vadd.f32 %v2253_v46, %v2032_v57  ;;  %v1980_v3 = vsel %vm439_vm3, %v7420_v12, %v7419_v5  ;;  %v6372_v0 = vadd.f32 %v2510_v32, %v6078_v15  ;;  %2986 = vrot.lane.b32.xlu1 %v6210_v2, %s3848_s25 }
 0x622   : > { %v2500_v8 = vsel %vm506_vm5, %v7422_v39, %v7421_v9  ;;  %v1769_v49 = vsel %vm411_vm2, %v7416_v53, %v7409_v27  ;;  %v1827_v59 = vadd.f32 %v1768_v17, %v1579_v10  ;;  %v1981_v28 = vsel %vm439_vm3, %v7419_v5, %v7415_v37  ;;  %v6385_v58 = vpop.permute.xlu0 %2720  ;;  %v2709_v25 = vpop.permute.xlu1 %2708 }
 0x623   : > { %v2034_v15 = vadd.f32 %v7420_v12, %v1826_v22  ;;  %v2501_v2 = vsel %vm506_vm5, %v7421_v9, %v5670_v44  ;;  %v2565_v4 = vadd.f32 %v2505_v21, %v2317_v47  ;;  %v1828_v20 = vadd.f32 %v1769_v49, %v1580_v23  ;;  %v7424_v44 = vld [vmem:[#allocation84_spill] sm:$0xff]  ;;  %v7425_v23 = vld [vmem:[#allocation47_spill] sm:$0xff]  ;;  %v7430_v49 = vld [vmem:[#allocation122_spill] sm:$0xff] }
 0x624   : > { %v2035_v13 = vadd.f32 %v1980_v3, %v1827_v59  ;;  %v2748_v27 = vsel %vm538_vm6, %v7423_v60, %v6115_v36  ;;  %v2749_v57 = vsel %vm538_vm6, %v6115_v36, %v7316_v6  ;;  %v2753_v41 = vsel %vm538_vm6, %v6194_v63, %v2709_v25  ;;  %v7426_v36 = vld [vmem:[#allocation34_spill] sm:$0xff]  ;;  %v7429_v12 = vld [vmem:[#allocation91_spill] sm:$0xff]  ;;  %v7431_v59 = vld [vmem:[#allocation121_spill] sm:$0xff] }
 0x625   : > { %v2559_v30 = vadd.f32 %v2500_v8, %v2311_v54  ;;  %v2036_v10 = vadd.f32 %v1981_v28, %v1828_v20  ;;  %v2560_v22 = vadd.f32 %v2501_v2, %v2312_v1  ;;  %v6399_v37 = vadd.f32 %v2753_v41, %v2565_v4  ;;  %2988 = vrot.lane.b32.xlu1 %v6101_v56, %s3848_s25  ;;  %v7433_v2 = vld [vmem:[#allocation103_spill] sm:$0xff]  ;;  %v7434_v4 = vld [vmem:[#allocation102_spill] sm:$0xff]  ;;  %s3559_s25 = smul.u32 24, %s297_s24 }
 0x626   : > { %v1529_v33 = vsel %vm379_vm1, %v7424_v44, %v7313_v24  ;;  %v2314_v53 = vadd.f32 %v7425_v23, %v2034_v15  ;;  %v2558_v17 = vadd.f32 %v7422_v39, %v2310_v35  ;;  %v6408_v6 = vpop.permute.xlu0 %2948  ;;  %v2255_v54 = vsel %vm474_vm4, %v7425_v23, %v7426_v36  ;;  %v2945_v21 = vpop.permute.xlu1 %2944  ;;  %v7427_v24 = vld [vmem:[#allocation35_spill] sm:$0xff]  ;;  %v7428_v35 = vld [vmem:[#allocation97_spill] sm:$0xff] }
 0x627   : > { %v2256_v46 = vsel %vm474_vm4, %v7426_v36, %v7414_v16  ;;  %v2807_v19 = vadd.f32 %v2748_v27, %v2559_v30  ;;  %v2808_v56 = vadd.f32 %v2749_v57, %v2560_v22  ;;  %v3851_v32 = vmov 0.0|0.0   ;;  %v7435_v25 = vld [vmem:[#allocation127_spill] sm:$0xff]  ;;  %v7436_v27 = vld [vmem:[#allocation69_spill] sm:$0xff]  ;;  %v7438_v36 = vld [vmem:[#allocation38_spill] sm:$0xff]  ;;  %s299_s12 = scalar_lea.vmem [#allocation3], %s3559_s25 }
 0x628   : > { %3545 = vmatprep.subr.bf16.mxu0 %v3851_v32  ;;  %v2562_v47 = vadd.f32 %v7427_v24, %v2314_v53  ;;  %v2315_v1 = vadd.f32 %v2255_v54, %v2035_v13  ;;  %v2996_v5 = vsel %vm570_vm7, %v7428_v35, %v2945_v21  ;;  %v2997_v3 = vsel %vm570_vm7, %v2945_v21, %v7429_v12  ;;  %s3392_s13 = sshll.u32 %s299_s12, 4  ;;  %s6752_s13 = int_to_ptr.vmem [resolvable:$true] %s3392_s13 }
 0x629   : > { %v2316_v9 = vadd.f32 %v2256_v46, %v2036_v10  ;;  %v2806_v39 = vadd.f32 %v7423_v60, %v2558_v17  ;;  %v3055_v8 = vadd.f32 %v2996_v5, %v2807_v19  ;;  %v3056_v16 = vadd.f32 %v2997_v3, %v2808_v56  ;;  %v7439_v46 = vld [vmem:[#allocation75_spill] sm:$0xff]  ;;  %v7443_v5 = vld [vmem:[#allocation152_spill] sm:$0xff]  ;;  %p3775_p0 = scmp.lt.s32.totalorder %s6752_s13, %s3773_s20 }
 0x62a   : > { %v7432_v28 = vpack.i.bf16 %v7430_v49, %v7431_v59  ;;  %v1591_v15 = vadd.f32 %v1529_v33, %v1343_v29  ;;  %v1284_v20 = vsel %vm347_vm0, %v7434_v4, %v7433_v2  ;;  %v2503_v13 = vsel %vm506_vm5, %v7427_v24, %v7435_v25  ;;  %v2237_v41 = vpop.permute.xlu0 %2236  ;;  %v2951_v22 = vpop.permute.xlu1 %2950  ;;  %v7437_v33 = vld [vmem:[#allocation153_spill] sm:$0xff]  ;;  %v7446_v49 = vld [vmem:[#allocation88_spill] sm:$0xff] }
 0x62b   : > { %v2810_v57 = vadd.f32 %v7436_v27, %v2562_v47  ;;  %v2504_v60 = vsel %vm506_vm5, %v7435_v25, %v7418_v52  ;;  %v3054_v30 = vadd.f32 %v7428_v35, %v2806_v39  ;;  %v3676_v10 = vpack.i.bf16 %v3056_v16, %v3055_v8  ;;  %v3762_v52 = vld [vmem:[#allocation2 + $0x128] sm:$0xff]  ;;  %v7442_v35 = vld [vmem:[#allocation98_spill] sm:$0xff]  ;;  %v7444_v8 = vld [vmem:[#allocation80_spill] sm:$0xff] }
 0x62c   : > { %3662 = vrot.lane.b32.xlu1 %v7432_v28, %s7334_s18  ;;  %v2266_v29 = vsel %vm474_vm4, %v6226_v38, %v2237_v41  ;;  %v2751_v23 = vsel %vm538_vm6, %v7436_v27, %v7437_v33  ;;  %v2752_v53 = vsel %vm538_vm6, %v7437_v33, %v6194_v63  ;;  %v1100_v19 = vmul.f32 %v3762_v52, %v7439_v46  ;;  %v7441_v47 = vld [vmem:[#allocation61_spill] sm:$0xff]  ;;  %v7445_v16 = vld [vmem:[#allocation32_spill] sm:$0xff]  ;;  %v7449_v41 = vld [vmem:[#allocation90_spill] sm:$0xff] }
 0x62d   : > { %v3058_v17 = vadd.f32 %v2951_v22, %v2810_v57  ;;  %v6447_v54 = vadd.f32 %v2266_v29, %v7438_v36  ;;  %v2563_v56 = vadd.f32 %v2503_v13, %v2315_v1  ;;  %v2564_v21 = vadd.f32 %v2504_v60, %v2316_v9  ;;  %3677 = vrot.lane.b32.xlu0 %v3676_v10, %s7334_s18  ;;  %v7448_v57 = vld [vmem:[#allocation95_spill] sm:$0xff]  ;;  %v7453_v36 = vld [vmem:[#allocation101_spill] sm:$0xff] }
 0x62e   : > { %v7440_v24 = vpack.i.bf16 %v6245_v48, %v6243_v7  ;;  %v1532_v63 = vsel %vm379_vm1, %v7442_v35, %v7441_v47  ;;  %v1285_v3 = vsel %vm347_vm0, %v7433_v2, %v7443_v5  ;;  %v2999_v1 = vsel %vm570_vm7, %v2951_v22, %v7444_v8  ;;  %v6463_v9 = vpop.permute.xlu0 %2478  ;;  %v7447_v48 = vld [vmem:[#allocation74_spill] sm:$0xff]  ;;  %v2955_v13 = vpop.permute.xlu1 %2954 }
 0x62f   : > { %v3686_v39 = vpack.i.bf16 %v3058_v17, %v3054_v30  ;;  %v1777_v7 = vsel %vm411_vm2, %v7446_v49, %v7445_v16  ;;  %v1347_v59 = vadd.f32 %v1284_v20, %v7447_v48  ;;  %v2811_v28 = vadd.f32 %v2751_v23, %v2563_v56  ;;  %v7450_v23 = vld [vmem:[#allocation105_spill] sm:$0xff]  ;;  %v7456_v48 = vld [vmem:[#allocation52_spill] sm:$0xff] }
 0x630   : > { %3672 = vrot.lane.b32.xlu1 %v7440_v24, %s7334_s18  ;;  %v2812_v25 = vadd.f32 %v2752_v53, %v2564_v21  ;;  %v1839_v27 = vadd.f32 %v1777_v7, %v1591_v15  ;;  %v1986_v2 = vsel %vm439_vm3, %v7449_v41, %v7448_v57  ;;  %v3000_v60 = vsel %vm570_vm7, %v7444_v8, %v2955_v13  ;;  %v7451_v53 = vld [vmem:[#allocation104_spill] sm:$0xff]  ;;  %v7452_v17 = vld [vmem:[#allocation45_spill] sm:$0xff]  ;;  %v7454_v24 = vld [vmem:[#allocation142_spill] sm:$0xff] }
 0x631   : > { %v1595_v30 = vadd.f32 %v1532_v63, %v1347_v59  ;;  %v1348_v10 = vadd.f32 %v1285_v3, %v1100_v19  ;;  %v3059_v22 = vadd.f32 %v2999_v1, %v2811_v28  ;;  %3687 = vrot.lane.b32.xlu0 %v3686_v39, %s7334_s18  ;;  %v1780_v15 = vsel %vm411_vm2, %v7451_v53, %v7450_v23  ;;  %v7455_v63 = vld [vmem:[#allocation10_spill] sm:$0xff] }
 0x632   : > { %v3060_v29 = vadd.f32 %v3000_v60, %v2812_v25  ;;  %v6475_v33 = vpop.permute.xlu0 %2482  ;;  %v2047_v20 = vadd.f32 %v1986_v2, %v1839_v27  ;;  %v1988_v52 = vsel %vm439_vm3, %v7453_v36, %v7452_v17  ;;  %v2233_v21 = vpop.permute.xlu1 %2232  ;;  %v1533_v19 = vsel %vm379_vm1, %v7441_v47, %v7454_v24  ;;  %v7457_v2 = vld [vmem:[#allocation146_spill] sm:$0xff] }
 0x633   : > { %v1781_v3 = vsel %vm411_vm2, %v7450_v23, %v7455_v63  ;;  %v2264_v39 = vsel %vm474_vm4, %v6189_v34, %v2233_v21  ;;  %v2265_v8 = vsel %vm474_vm4, %v2233_v21, %v6226_v38  ;;  %v1843_v1 = vadd.f32 %v1780_v15, %v1595_v30 }
 0x634   : > { %v3681_v56 = vpack.i.bf16 %v3060_v29, %v3059_v22  ;;  %v1596_v16 = vadd.f32 %v1533_v19, %v1348_v10  ;;  %v6493_v7 = vadd.f32 %v2264_v39, %v2047_v20  ;;  %v6496_v59 = vadd.f32 %v2265_v8, %v7456_v48 }
 0x635   : > { %v2051_v47 = vadd.f32 %v1988_v52, %v1843_v1  ;;  %v1989_v60 = vsel %vm439_vm3, %v7452_v17, %v7457_v2  ;;  %v3763_v17 = vld [vmem:[#allocation2 + $0x130] sm:$0xff] }
 0x636   : > { %3682 = vrot.lane.b32.xlu1 %v3681_v56, %s7334_s18  ;;  %v1844_v28 = vadd.f32 %v1781_v3, %v1596_v16  ;;  %v6499_v25 = vpop.permute.xlu1 %2238  ;;  %v6501_v27 = vpop.permute.xlu0 %2488  ;;  %v1101_v19 = vmul.f32 %v3763_v17, %v7439_v46  ;;  %v7462_v17 = vld [vmem:[#allocation26_spill] sm:$0xff] }
 0x637   : > { %v2267_v57 = vsel %vm474_vm4, %v6499_v25, %v6257_v55 }
 0x638   : > { %v6506_v38 = vadd.f32 %v2267_v57, %v2051_v47  ;;  %v2052_v10 = vadd.f32 %v1989_v60, %v1844_v28  ;;  %v7458_v28 = vld [vmem:[#allocation51_spill] sm:$0xff] }
 0x63a   : > { %v2243_v30 = vpop.permute.xlu1 %2242  ;;  %v6515_v20 = vpop.permute.xlu0 %2716 }
 0x63b   : > { %v2268_v22 = vsel %vm474_vm4, %v6257_v55, %v2243_v30  ;;  %v1349_v55 = vadd.f32 %v7443_v5, %v1101_v19 }
 0x63c   : > { %v6513_v29 = vadd.f32 %v2268_v22, %v2052_v10 }
 0x63d   : > { %v1597_v1 = vadd.f32 %v7454_v24, %v1349_v55  ;;  %v3764_v55 = vld [vmem:[#allocation2 + $0xa0] sm:$0xff] }
 0x63e   : > { %v2477_v23 = vpop.permute.xlu1 %2476  ;;  %v6522_v56 = vpop.permute.xlu0 %2958 }
 0x63f   : > { %v2511_v15 = vsel %vm506_vm5, %v6354_v62, %v2477_v23  ;;  %v1845_v62 = vadd.f32 %v7455_v63, %v1597_v1  ;;  %v7460_v63 = vld [vmem:[#allocation25_spill] sm:$0xff] }
 0x640   : > { %v6520_v52 = vadd.f32 %v2511_v15, %v6276_v18  ;;  %v2998_v18 = vsel %vm570_vm7, %v7429_v12, %v6408_v6  ;;  %v7459_v12 = vld [vmem:[#allocation30_spill] sm:$0xff] }
 0x641   : > { %v3057_v57 = vadd.f32 %v2998_v18, %v7458_v28  ;;  %v2053_v22 = vadd.f32 %v7457_v2, %v1845_v62  ;;  %v7461_v15 = vld [vmem:[#allocation66_spill] sm:$0xff]  ;;  %v7463_v2 = vld [vmem:[#allocation11_spill] sm:$0xff]  ;;  %v7464_v18 = vld [vmem:[#allocation73_spill] sm:$0xff] }
 0x642   : > { %v2713_v21 = vpop.permute.xlu1 %2712  ;;  %v6528_v39 = vpop.permute.xlu0 %2962  ;;  %v1086_v1 = vmul.f32 %v3764_v55, %v7463_v2  ;;  %v7471_v55 = vld [vmem:[#allocation57_spill] sm:$0xff] }
 0x646   : > { %v6525_v3 = vpop.permute.xlu1 %2718  ;;  %v6537_v16 = vpop.permute.xlu0 %2968 }
 0x64a   : > { %v6530_v8 = vpop.permute.xlu1 %2722  ;;  %v6544_v23 = vpop.permute.xlu0 %2484 }
 0x64e   : > { %v2957_v48 = vpop.permute.xlu1 %2956  ;;  %v6559_v28 = vpop.permute.xlu0 %2726 }
 0x64f   : > { %v3001_v47 = vsel %vm570_vm7, %v2955_v13, %v2957_v48  ;;  %v1274_v13 = vsel %vm347_vm0, %v7460_v63, %v7459_v12  ;;  %v7468_v12 = vld [vmem:[#allocation141_spill] sm:$0xff]  ;;  %v7469_v63 = vld [vmem:[#allocation42_spill] sm:$0xff] }
 0x650   : > { %v3061_v5 = vadd.f32 %v3001_v47, %v6399_v37  ;;  %v1277_v37 = vsel %vm347_vm0, %v7462_v17, %v7461_v15  ;;  %v1334_v48 = vadd.f32 %v1274_v13, %v1086_v1  ;;  %v1525_v15 = vsel %vm379_vm1, %v7469_v63, %v7468_v12  ;;  %v7470_v17 = vld [vmem:[#allocation154_spill] sm:$0xff] }
 0x651   : > { %v1773_v13 = vsel %vm411_vm2, %v7471_v55, %v7470_v17  ;;  %v2754_v12 = vsel %vm538_vm6, %v6317_v61, %v2713_v21  ;;  %v2755_v63 = vsel %vm538_vm6, %v2713_v21, %v6351_v45  ;;  %v7473_v17 = vld [vmem:[#allocation100_spill] sm:$0xff] }
 0x652   : > { %v3691_v60 = vpack.i.bf16 %v3061_v5, %v3057_v57  ;;  %v2245_v10 = vpop.permute.xlu1 %2244  ;;  %v7465_v5 = vld [vmem:[#allocation130_spill] sm:$0xff] }
 0x653   : > { %v2269_v24 = vsel %vm474_vm4, %v2243_v30, %v2245_v10  ;;  %v3765_v30 = vld [vmem:[#allocation2 + $0xc8] sm:$0xff] }
 0x654   : > { %v6546_v6 = vadd.f32 %v2269_v24, %v2053_v22  ;;  %3692 = vrot.lane.b32.xlu1 %v3691_v60, %s7334_s18  ;;  %v1090_v62 = vmul.f32 %v3765_v30, %v7464_v18  ;;  %v7466_v60 = vld [vmem:[#allocation41_spill] sm:$0xff]  ;;  %v7467_v22 = vld [vmem:[#allocation56_spill] sm:$0xff] }
 0x655   : > { %v1522_v10 = vsel %vm379_vm1, %v7466_v60, %v7465_v5  ;;  %v1770_v24 = vsel %vm411_vm2, %v7467_v22, %v7390_v26  ;;  %v7472_v26 = vld [vmem:[#allocation145_spill] sm:$0xff] }
 0x656   : > { %v6555_v19 = vpop.permute.xlu1 %2480  ;;  %v1338_v47 = vadd.f32 %v1277_v37, %v1090_v62  ;;  %v1582_v37 = vadd.f32 %v1522_v10, %v1334_v48  ;;  %v6577_v62 = vpop.permute.xlu0 %2730  ;;  %v2815_v10 = vadd.f32 %v2754_v12, %v6302_v31 }
 0x658   : > { %v1586_v2 = vadd.f32 %v1525_v15, %v1338_v47  ;;  %v1830_v30 = vadd.f32 %v1770_v24, %v1582_v37  ;;  %v2816_v24 = vadd.f32 %v2755_v63, %v6304_v51 }
 0x65a   : > { %v6561_v57 = vpop.permute.xlu1 %2486  ;;  %v1834_v18 = vadd.f32 %v1773_v13, %v1586_v2  ;;  %v2038_v5 = vadd.f32 %v7396_v42, %v1830_v30  ;;  %v6589_v15 = vpop.permute.xlu0 %2736 }
 0x65c   : > { %v2042_v22 = vadd.f32 %v7472_v26, %v1834_v18  ;;  %v2318_v47 = vadd.f32 %v7398_v50, %v2038_v5 }
 0x65e   : > { %v6575_v1 = vpop.permute.xlu1 %2490  ;;  %v2322_v48 = vadd.f32 %v7473_v17, %v2042_v22  ;;  %v2566_v55 = vadd.f32 %v7402_v14, %v2318_v47  ;;  %v2757_v14 = vsel %vm538_vm6, %v6525_v3, %v6385_v58  ;;  %v2965_v22 = vpop.permute.xlu0 %2964 }
 0x65f   : > { %v2819_v63 = vadd.f32 %v2757_v14, %v6340_v40  ;;  %v7474_v40 = vld [vmem:[#allocation28_spill] sm:$0xff] }
 0x660   : > { %v2570_v13 = vadd.f32 %v6326_v11, %v2322_v48  ;;  %v2814_v50 = vadd.f32 %v6317_v61, %v2566_v55  ;;  %v2758_v11 = vsel %vm538_vm6, %v6385_v58, %v6530_v8 }
 0x662   : > { %v2725_v60 = vpop.permute.xlu1 %2724  ;;  %v2818_v31 = vadd.f32 %v6525_v3, %v2570_v13  ;;  %v3062_v5 = vadd.f32 %v6522_v56, %v2814_v50  ;;  %v6614_v58 = vpop.permute.xlu0 %2732  ;;  %v3767_v50 = vld [vmem:[#allocation2 + $0xf0] sm:$0xff] }
 0x666   : > { %v2961_v42 = vpop.permute.xlu1 %2960  ;;  %v2975_v55 = vpop.permute.xlu0 %2974 }
 0x667   : > { %v3002_v37 = vsel %vm570_vm7, %v6522_v56, %v2961_v42  ;;  %v3003_v21 = vsel %vm570_vm7, %v2961_v42, %v6528_v39  ;;  %v2820_v56 = vadd.f32 %v2758_v11, %v6372_v0  ;;  %v1283_v0 = vsel %vm347_vm0, %v7474_v40, %v7434_v4 }
 0x668   : > { %v3063_v2 = vadd.f32 %v3002_v37, %v2815_v10  ;;  %v3064_v30 = vadd.f32 %v3003_v21, %v2816_v24  ;;  %v3766_v37 = vld [vmem:[#allocation2 + $0x118] sm:$0xff]  ;;  %v7475_v21 = vld [vmem:[#allocation85_spill] sm:$0xff]  ;;  %v2756_v4 = vsel %vm538_vm6, %v6351_v45, %v6515_v20  ;;  %v7481_v45 = vld [vmem:[#allocation58_spill] sm:$0xff] }
 0x669   : > { %v1776_v20 = vsel %vm411_vm2, %v7481_v45, %v7446_v49  ;;  %v2513_v49 = vsel %vm506_vm5, %v6555_v19, %v6475_v33 }
 0x66a   : > { %v3696_v51 = vpack.i.bf16 %v3064_v30, %v3063_v2  ;;  %v2967_v18 = vpop.permute.xlu1 %2966  ;;  %v7476_v2 = vld [vmem:[#allocation27_spill] sm:$0xff] }
 0x66b   : > { %v3066_v26 = vadd.f32 %v2967_v18, %v2818_v31  ;;  %v3005_v61 = vsel %vm570_vm7, %v2967_v18, %v6537_v16  ;;  %v1280_v30 = vsel %vm347_vm0, %v7476_v2, %v7475_v21  ;;  %v7477_v31 = vld [vmem:[#allocation12_spill] sm:$0xff] }
 0x66c   : > { %3697 = vrot.lane.b32.xlu0 %v3696_v51, %s7334_s18  ;;  %v3067_v48 = vadd.f32 %v3005_v61, %v2819_v63  ;;  %v1094_v51 = vmul.f32 %v3767_v50, %v7477_v31  ;;  %v7479_v61 = vld [vmem:[#allocation59_spill] sm:$0xff]  ;;  %v2576_v50 = vadd.f32 %v2513_v49, %v6496_v59 }
 0x66d   : > { %v3706_v12 = vpack.i.bf16 %v3066_v26, %v3062_v5  ;;  %v6627_v5 = vpop.permute.xlu0 %2978  ;;  %v7478_v26 = vld [vmem:[#allocation44_spill] sm:$0xff]  ;;  %v1779_v63 = vsel %vm411_vm2, %v7479_v61, %v7451_v53 }
 0x66e   : > { %v2971_v17 = vpop.permute.xlu1 %2970  ;;  %v1342_v11 = vadd.f32 %v1280_v30, %v1094_v51 }
 0x66f   : > { %v3006_v3 = vsel %vm570_vm7, %v6537_v16, %v2971_v17  ;;  %v1098_v16 = vmul.f32 %v3766_v37, %v7439_v46  ;;  %v2759_v46 = vsel %vm538_vm6, %v6530_v8, %v2725_v60  ;;  %v2817_v8 = vadd.f32 %v2756_v4, %v6299_v43 }
 0x670   : > { %v3068_v47 = vadd.f32 %v3006_v3, %v2820_v56  ;;  %3707 = vrot.lane.b32.xlu0 %v3706_v12, %s7334_s18  ;;  %v1531_v12 = vsel %vm379_vm1, %v7478_v26, %v7442_v35  ;;  %v3004_v3 = vsel %vm570_vm7, %v6528_v39, %v2965_v22  ;;  %v2821_v35 = vadd.f32 %v2759_v46, %v6520_v52 }
 0x671   : > { %v1346_v18 = vadd.f32 %v1283_v0, %v1098_v16  ;;  %v3065_v0 = vadd.f32 %v3004_v3, %v2817_v8  ;;  %v2985_v37 = vpop.permute.xlu0 %2984 }
 0x672   : > { %v3701_v10 = vpack.i.bf16 %v3068_v47, %v3067_v48  ;;  %v6616_v24 = vpop.permute.xlu1 %2492  ;;  %v7480_v48 = vld [vmem:[#allocation43_spill] sm:$0xff] }
 0x673   : > { %v1594_v56 = vadd.f32 %v1531_v12, %v1346_v18  ;;  %v1528_v47 = vsel %vm379_vm1, %v7480_v48, %v7424_v44  ;;  %v2512_v44 = vsel %vm506_vm5, %v6463_v9, %v6555_v19 }
 0x674   : > { %3702 = vrot.lane.b32.xlu1 %v3701_v10, %s7334_s18  ;;  %v1590_v10 = vadd.f32 %v1528_v47, %v1342_v11  ;;  %v2575_v30 = vadd.f32 %v2512_v44, %v6493_v7 }
 0x675   : > { %v1842_v40 = vadd.f32 %v1779_v63, %v1594_v56  ;;  %v2981_v51 = vpop.permute.xlu0 %2980 }
 0x676   : > { %v2729_v42 = vpop.permute.xlu1 %2728  ;;  %v1838_v22 = vadd.f32 %v1776_v20, %v1590_v10 }
 0x677   : > { %v2050_v21 = vadd.f32 %v7453_v36, %v1842_v40  ;;  %v2761_v2 = vsel %vm538_vm6, %v2729_v42, %v6577_v62 }
 0x678   : > { %v2046_v52 = vadd.f32 %v7449_v41, %v1838_v22  ;;  %v2824_v18 = vadd.f32 %v2761_v2, %v2576_v50 }
 0x679   : > { %v2330_v31 = vadd.f32 %v6499_v25, %v2050_v21  ;;  %v2516_v25 = vsel %vm506_vm5, %v6501_v27, %v6575_v1  ;;  %v3658_v47 = vpop.permute.xlu0 %3657 }
 0x67a   : > { %v2326_v19 = vadd.f32 %v6189_v34, %v2046_v52  ;;  %v2515_v34 = vsel %vm506_vm5, %v6561_v57, %v6501_v27  ;;  %v2580_v27 = vadd.f32 %v2516_v25, %v6513_v29 }
 0x67b   : > { %v2735_v13 = vpop.permute.xlu1 %2734  ;;  %v2578_v4 = vadd.f32 %v6561_v57, %v2330_v31  ;;  %v2514_v57 = vsel %vm506_vm5, %v6475_v33, %v6544_v23  ;;  %v2579_v48 = vadd.f32 %v2515_v34, %v6506_v38  ;;  %v2762_v33 = vsel %vm538_vm6, %v6577_v62, %v6614_v58 }
 0x67c   : > { %v2574_v11 = vadd.f32 %v6463_v9, %v2326_v19  ;;  %v2763_v56 = vsel %vm538_vm6, %v2735_v13, %v6589_v15  ;;  %v7482_v62 = vmov 0.0  }
 0x67d   : > { %v2826_v9 = vadd.f32 %v2735_v13, %v2578_v4  ;;  %3526 = vmatprep.mubr.msk.f32.mxu0 %vm3852_vm14, %v7482_v62 }
 0x67e   : > { %v2822_v26 = vadd.f32 %v6559_v28, %v2574_v11 }
 0x67f   : > { %v6629_v14 = vpop.permute.xlu1 %2738 }
 0x680   : > { %v3070_v63 = vadd.f32 %v2975_v55, %v2822_v26  ;;  %v2764_v3 = vsel %vm538_vm6, %v6589_v15, %v6629_v14  ;;  %v2827_v15 = vadd.f32 %v2763_v56, %v2579_v48 }
 0x681   : > { %v2828_v20 = vadd.f32 %v2764_v3, %v2580_v27 }
 0x683   : > { %v2973_v60 = vpop.permute.xlu1 %2972 }
 0x684   : > { %v3007_v53 = vsel %vm570_vm7, %v2971_v17, %v2973_v60  ;;  %v2760_v17 = vsel %vm538_vm6, %v6559_v28, %v2729_v42  ;;  %v3010_v60 = vsel %vm570_vm7, %v6627_v5, %v2981_v51 }
 0x685   : > { %v3069_v39 = vadd.f32 %v3007_v53, %v2821_v35  ;;  %v2823_v41 = vadd.f32 %v2760_v17, %v2575_v30  ;;  %v2577_v35 = vadd.f32 %v2514_v57, %v6447_v54  ;;  %v3079_v54 = vld [vmem:[%s6799_s7] sm:$0xff] }
 0x687   : > { %v3711_v43 = vpack.i.bf16 %v3069_v39, %v3065_v0  ;;  %v2741_v16 = vpop.permute.xlu1 %2740  ;;  %v2825_v58 = vadd.f32 %v2762_v33, %v2577_v35  ;;  %v3659_v39 = vunpack.i.l.bf16 %v3658_v47 }
 0x688   : > { %v2765_v38 = vsel %vm538_vm6, %v6629_v14, %v2741_v16  ;;  %v3668_v14 = vpop.permute.xlu0 %3667 }
 0x689   : > { %3712 = vrot.lane.b32.xlu1 %v3711_v43, %s7334_s18  ;;  %v3073_v0 = vadd.f32 %v3010_v60, %v2825_v58  ;;  %v3669_v22 = vunpack.i.l.bf16 %v3668_v14  ;;  %v3670_v43 = vunpack.i.h.bf16 %v3668_v14 }
 0x68b   : > { %v2977_v36 = vpop.permute.xlu1 %2976  ;;  %v3181_v21 = vsel %vm650_vm8, %v3669_v22, %v3659_v39 }
 0x68c   : > { %v3008_v42 = vsel %vm570_vm7, %v2975_v55, %v2977_v36  ;;  %v3009_v7 = vsel %vm570_vm7, %v2977_v36, %v6627_v5  ;;  %v2517_v55 = vsel %vm506_vm5, %v6575_v1, %v6616_v24  ;;  %v3660_v5 = vunpack.i.h.bf16 %v3658_v47 }
 0x68d   : > { %v3071_v59 = vadd.f32 %v3008_v42, %v2823_v41  ;;  %v3072_v46 = vadd.f32 %v3009_v7, %v2824_v18  ;;  %v2581_v23 = vadd.f32 %v2517_v55, %v6546_v6 }
 0x68e   : > { %v3182_v2 = vsel %vm650_vm8, %v3659_v39, %v3660_v5 }
 0x68f   : > { %v3716_v12 = vpack.i.bf16 %v3072_v46, %v3071_v59  ;;  %v2983_v61 = vpop.permute.xlu1 %2982  ;;  %v2829_v10 = vadd.f32 %v2765_v38, %v2581_v23 }
 0x690   : > { %v3074_v28 = vadd.f32 %v2983_v61, %v2826_v9  ;;  %v3011_v45 = vsel %vm570_vm7, %v2983_v61, %v2985_v37 }
 0x691   : > { %3717 = vrot.lane.b32.xlu0 %v3716_v12, %s7334_s18  ;;  %v3075_v1 = vadd.f32 %v3011_v45, %v2827_v15 }
 0x692   : > { %v3726_v13 = vpack.i.bf16 %v3074_v28, %v3070_v63 }
 0x693   : > { %v2987_v8 = vpop.permute.xlu1 %2986 }
 0x694   : > { %v3012_v29 = vsel %vm570_vm7, %v2985_v37, %v2987_v8 }
 0x695   : > { %v3076_v24 = vadd.f32 %v3012_v29, %v2828_v20  ;;  %3727 = vrot.lane.b32.xlu0 %v3726_v13, %s7334_s18 }
 0x697   : > { %v3721_v40 = vpack.i.bf16 %v3076_v24, %v3075_v1  ;;  %v2989_v53 = vpop.permute.xlu1 %2988 }
 0x698   : > { %v3013_v6 = vsel %vm570_vm7, %v2987_v8, %v2989_v53 }
 0x699   : > { %v3077_v37 = vadd.f32 %v3013_v6, %v2829_v10  ;;  %3082 = vperm.xlu0 %3655, %v3079_v54   ;;  %3722 = vrot.lane.b32.xlu1 %v3721_v40, %s7334_s18 }
 0x69b   : > { %v3731_v44 = vpack.i.bf16 %v3077_v37, %v3073_v0 }
 0x69d   : > { %3732 = vrot.lane.b32.xlu1 %v3731_v44, %s7334_s18  ;;  %s3768_s18 = scalar_lea.vmem %s6752_s13, 384 }
 0x69e   : > { %v3663_v49 = vpop.permute.xlu1 %3662  ;;  %p3769_p11 = scmp.ne.s32.totalorder %s6752_s13, %s3768_s18  ;;  %p3776_p1 = scmp.lt.s32.totalorder %s3774_s22, %s3768_s18 }
 0x69f   : > { %v3665_v16 = vunpack.i.h.bf16 %v3663_v49  ;;  %v3664_v52 = vunpack.i.l.bf16 %v3663_v49  ;;  %v3678_v31 = vpop.permute.xlu0 %3677 }
 0x6a0   : > { %v3680_v7 = vunpack.i.h.bf16 %v3678_v31  ;;  %v3679_v59 = vunpack.i.l.bf16 %v3678_v31  ;;  %p3770_p12 = pnand %p3769_p11, %p3937_p5  ;;  %p3777_p2 = por %p3776_p1, %p3775_p0 }
 0x6a1   : > { %v3184_v17 = vsel %vm650_vm8, %v3670_v43, %v3664_v52  ;;  %v3185_v30 = vsel %vm650_vm8, %v3664_v52, %v3665_v16 }
 0x6a2   : > { %v3531_v50 = vpack.c.bf16 %v3184_v17, %v3181_v21  ;;  %v3673_v19 = vpop.permute.xlu1 %3672  ;;  %v3529_v51 = vpack.c.bf16 %v3185_v30, %v3182_v2  ;;  %v3188_v63 = vsel %vm650_vm8, %v3679_v59, %v3680_v7  ;;  %p3771_p13 = pneg %p3770_p12 }
 0x6a3   : > { %v3675_v41 = vunpack.i.h.bf16 %v3673_v19  ;;  %v3674_v18 = vunpack.i.l.bf16 %v3673_v19  ;;  %v3688_v42 = vpop.permute.xlu0 %3687 }
 0x6a4   : > { %3530 = vmatprep.subr.bf16.mxu1 %v3529_v51  ;;  %v3689_v46 = vunpack.i.l.bf16 %v3688_v42  ;;  %v3690_v34 = vunpack.i.h.bf16 %v3688_v42  ;;  %p3778_p3 = pnand %p3777_p2, %p3771_p13 }
 0x6a5   : > { %v3186_v36 = vsel %vm650_vm8, %v3665_v16, %v3675_v41  ;;  %v3183_v11 = vsel %vm650_vm8, %v3660_v5, %v3674_v18  ;;  %3532 = vmatpush1.bf16.msra.mxu1 %v3531_v50 }
 0x6a6   : > { %v3546_v4 = vpack.c.bf16 %v3186_v36, %v3183_v11  ;;  %v3187_v12 = vsel %vm650_vm8, %v3689_v46, %v3679_v59  ;;  %v3078_v36 = vld [vmem:[%s6798_s6] sm:$0xff] }
 0x6a8   : > { %3547 = vmatpush3.bf16.msra.mxu0 %v3546_v4  ;;  %v3683_v26 = vpop.permute.xlu1 %3682 }
 0x6a9   : > { %3548 = vmatprep.subr.bf16.mxu0 %v3851_v32  ;;  %v3685_v25 = vunpack.i.h.bf16 %v3683_v26  ;;  %v3684_v9 = vunpack.i.l.bf16 %v3683_v26 }
 0x6ab   : > { %v3190_v61 = vsel %vm650_vm8, %v3690_v34, %v3684_v9  ;;  %v3191_v56 = vsel %vm650_vm8, %v3684_v9, %v3685_v25 }
 0x6ac   : > { %v3535_v3 = vpack.c.bf16 %v3190_v61, %v3187_v12  ;;  %v3533_v28 = vpack.c.bf16 %v3191_v56, %v3188_v63 }
 0x6ae   : > { %3534 = vmatprep.subr.bf16.mxu1 %v3533_v28 }
 0x6af   : > { %3536 = vmatpush1.bf16.msra.mxu1 %v3535_v3 }
 0x6c6   : > { %v3693_v57 = vpop.permute.xlu1 %3692 }
 0x6c7   : > { %v3695_v48 = vunpack.i.h.bf16 %v3693_v57  ;;  %v3694_v27 = vunpack.i.l.bf16 %v3693_v57 }
 0x6c9   : > { %v3192_v47 = vsel %vm650_vm8, %v3685_v25, %v3695_v48  ;;  %v3189_v55 = vsel %vm650_vm8, %v3680_v7, %v3694_v27 }
 0x6ca   : > { %v3549_v13 = vpack.c.bf16 %v3192_v47, %v3189_v55 }
 0x6cc   : > { %3550 = vmatpush3.bf16.msra.mxu0 %v3549_v13 }
 0x6cd   : > { %3551 = vmatprep.subr.bf16.mxu0 %v3851_v32 }
 0x6de   : > { %v3698_v45 = vpop.permute.xlu0 %3697 }
 0x6df   : > { %v3700_v20 = vunpack.i.h.bf16 %v3698_v45  ;;  %v3699_v8 = vunpack.i.l.bf16 %v3698_v45 }
 0x6e1   : > { %v3194_v60 = vsel %vm650_vm8, %v3699_v8, %v3700_v20 }
 0x6e2   : > { %v3708_v15 = vpop.permute.xlu0 %3707 }
 0x6e3   : > { %v3709_v35 = vunpack.i.l.bf16 %v3708_v15  ;;  %v3710_v38 = vunpack.i.h.bf16 %v3708_v15 }
 0x6e5   : > { %v3193_v1 = vsel %vm650_vm8, %v3709_v35, %v3699_v8 }
 0x6e6   : > { %v3703_v33 = vpop.permute.xlu1 %3702 }
 0x6e7   : > { %v3705_v29 = vunpack.i.h.bf16 %v3703_v33  ;;  %v3704_v23 = vunpack.i.l.bf16 %v3703_v33 }
 0x6e9   : > { %v3196_v24 = vsel %vm650_vm8, %v3710_v38, %v3704_v23  ;;  %v3197_v54 = vsel %vm650_vm8, %v3704_v23, %v3705_v29 }
 0x6ea   : > { %v3539_v62 = vpack.c.bf16 %v3196_v24, %v3193_v1  ;;  %v3537_v58 = vpack.c.bf16 %v3197_v54, %v3194_v60 }
 0x6ec   : > { %3538 = vmatprep.subr.bf16.mxu1 %v3537_v58 }
 0x6ed   : > { %3540 = vmatpush1.bf16.msra.mxu1 %v3539_v62 }
 0x6fb   : > { %v3713_v14 = vpop.permute.xlu1 %3712 }
 0x6fc   : > { %v3715_v10 = vunpack.i.h.bf16 %v3713_v14  ;;  %v3714_v40 = vunpack.i.l.bf16 %v3713_v14 }
 0x6fe   : > { %v3198_v53 = vsel %vm650_vm8, %v3705_v29, %v3715_v10  ;;  %v3195_v6 = vsel %vm650_vm8, %v3700_v20, %v3714_v40 }
 0x6ff   : > { %v3552_v0 = vpack.c.bf16 %v3198_v53, %v3195_v6 }
 0x701   : > { %3553 = vmatpush3.bf16.msra.mxu0 %v3552_v0 }
 0x702   : > { %3554 = vmatprep.subr.bf16.mxu0 %v3851_v32 }
 0x703   : > { %v3718_v37 = vpop.permute.xlu0 %3717 }
 0x704   : > { %v3720_v39 = vunpack.i.h.bf16 %v3718_v37  ;;  %v3719_v22 = vunpack.i.l.bf16 %v3718_v37 }
 0x706   : > { %v3200_v2 = vsel %vm650_vm8, %v3719_v22, %v3720_v39 }
 0x707   : > { %v3728_v5 = vpop.permute.xlu0 %3727 }
 0x708   : > { %v3729_v44 = vunpack.i.l.bf16 %v3728_v5  ;;  %v3730_v43 = vunpack.i.h.bf16 %v3728_v5 }
 0x70a   : > { %v3199_v21 = vsel %vm650_vm8, %v3729_v44, %v3719_v22 }
 0x70b   : > { %v3723_v49 = vpop.permute.xlu1 %3722 }
 0x70c   : > { %v3725_v16 = vunpack.i.h.bf16 %v3723_v49  ;;  %v3724_v52 = vunpack.i.l.bf16 %v3723_v49 }
 0x70e   : > { %v3202_v17 = vsel %vm650_vm8, %v3730_v43, %v3724_v52  ;;  %v3203_v30 = vsel %vm650_vm8, %v3724_v52, %v3725_v16 }
 0x70f   : > { %v3543_v50 = vpack.c.bf16 %v3202_v17, %v3199_v21  ;;  %v3733_v32 = vpop.permute.xlu1 %3732  ;;  %v3541_v19 = vpack.c.bf16 %v3203_v30, %v3200_v2 }
 0x710   : > { %v3735_v31 = vunpack.i.h.bf16 %v3733_v32  ;;  %v3734_v51 = vunpack.i.l.bf16 %v3733_v32 }
 0x711   : > { %3542 = vmatprep.subr.bf16.mxu1 %v3541_v19 }
 0x712   : > { %v3204_v41 = vsel %vm650_vm8, %v3725_v16, %v3735_v31  ;;  %v3201_v18 = vsel %vm650_vm8, %v3720_v39, %v3734_v51  ;;  %3544 = vmatpush1.bf16.msra.mxu1 %v3543_v50 }
 0x713   : > { %v3555_v11 = vpack.c.bf16 %v3204_v41, %v3201_v18 }
 0x715   : > { %3472 = vmatmul.mubr.msk.f32.vlgmr.msra.gmra.mrb[12].mxu1 %vm3229_vm15, %v3078_v36  ;;  %3556 = vmatpush3.bf16.msra.mxu0 %v3555_v11 }
 0x718   : > { %3527 = vmatmul.mubr.msk.f32.vlgmr.msra.gmra.mrb[12].mxu0 %vm3229_vm15, %v3078_v36  ;;  %v3083_v4 = vpop.permute.xlu0 %3082 }
 0x7e8   : > { %v3299_v42 = vpop.f32.mrb[12].mxu1 }
 0x7e9   : > { %v3300_v7 = vadd.f32 %v3299_v42, %v3083_v4  ;;  %v3301_v59 = vpop.f32.mrb[13].mxu1 }
 0x7ea   : > { %v3302_v46 = vadd.f32 %v3301_v59, %v3083_v4 }
 0x7eb   : > { %3374 = vst [vmem:[%s299_s12] sm:$0xff] %v3300_v7  ;;  %v3370_v26 = vpop.f32.mrb[12].mxu0 }
 0x7ec   : > { %3375 = vst [vmem:[%s299_s12 + $0x8] sm:$0xff] %v3302_v46  ;;  %v3371_v34 = vadd.f32 %v3370_v26, %v3083_v4  ;;  %v3528_v25 = vpop.f32.mrb[13].mxu0 }
 0x7ee   : > { %3376 = vst [vmem:[%s299_s12 + $0x10] sm:$0xff] %v3371_v34 }
 0x7ef   : > { %3781 = shalt.err (!%p3778_p3)
}
 0x7f0   : > { %s3782_s23 = scalar_lea.hbm %s6750_s21, 384  ;;  %s3786_s17 = scalar_lea.hbm %s6800_s8, 768 }
 0x7f1   : > { %p3783_p4 = scmp.ne.s32.totalorder %s6750_s21, %s3782_s23  ;;  %p3787_p9 = scmp.lt.u32.totalorder %s6750_s21, %s6800_s8 }
 0x7f2   : > { %p3788_p10 = scmp.lt.u32.totalorder %s3786_s17, %s3782_s23  ;;  %p3790_p12 = scmp.lt.u32.totalorder %s3782_s23, %s6750_s21 }
 0x7f3   : > { %p3784_p7 = pnand %p3783_p4, %p3937_p5 }
 0x7f4   : > { %p3789_p11 = por %p3788_p10, %p3787_p9 }
 0x7f5   : > { %p3785_p8 = pneg %p3784_p7 }
 0x7f6   : > { %p3791_p13 = por %p3790_p12, %p3789_p11 }
 0x7f8   : > { %p3792_p0 = pnand %p3791_p13, %p3785_p8 }
 0x7fa   : > { %3795 = shalt.err (!%p3792_p0)
}
 0x7fb   : > { %3560 = dma.vmem_to_hbm [thread:$0]  (%p3937_p5), %s6752_s13, 384, %s6750_s21, %s3378_s9  }
 0x7fc PF: > { %p3566_p1 = scmp.ge.s32.totalorder %s3830_s30, 2  ;;  %s3404_s10 = sand.u32 1, %s3818_s27  }
 0x7fd   : > { %s3405_s18 = scalar_lea.sflag [#allocation4], %s3404_s10 }
 0x7fe   : > { %p3563_p2 = pnand %p3566_p1, %p3941_p6 }
 0x800   : > { %3813 = dma.done.wait (!%p3563_p2), %s3405_s18, 384  }
 0x801   : > { %3815 = vsyncadd (!%p3563_p2), %s3405_s18, 4294966912  ;;  %p18_p3 = scmp.ge.s32.totalorder %s3924_s11, 4   ;;  %s7483_s27 = smov %s3822_s28 }
 0x802   : > { %s7484_s28 = smov %s3826_s29  ;;  %s7485_s29 = smov %s3935_s14 }
 0x803   : > { %s7486_s30 = smov %s3924_s11  ;;  %20 = sbr.rel (!%p18_p3) target bundleno = 3 (0x3), region = 87 }
 0x80a   :  { %3410 = vsyncpa [#allocation4], 1 }
 0x80b   :  { %3412 = vsyncpa [#allocation4 + $0x1], 1 }

</bundles_post_ra>
